<compile_context>
chip_gen: v6e
topology: v6e:2x2x1
jax: 0.10.0
libtpu: 0.0.40
codegen_flags: <defaults>
</compile_context>

<pallas_src>
import functools
import math

import jax
import jax.numpy as jnp
from jax.experimental import pallas as pl
from jax.experimental.pallas import tpu as pltpu


# Set to jnp.bfloat16 on v6e/v7x for MXU throughput at larger shapes (accumulation is f32).
_MXU_DTYPE = jnp.float32

_WEIGHT_NAMES = (
    "w_self_qkv", "b_self_qkv", "w_self_o", "b_self_o",
    "w_cross_q", "b_cross_q", "w_cross_kv", "b_cross_kv", "w_cross_o", "b_cross_o",
    "w_ffn1", "b_ffn1", "w_ffn2", "b_ffn2",
    "ln1_g", "ln1_b", "ln2_g", "ln2_b", "ln3_g", "ln3_b",
    "w_dense", "b_dense",
)


# ----------------------------- fused decoder-stack kernel -----------------------------

def _decoder_stack_kernel(
    x_ref, enc_ref, self_bias_ref, cross_bias_ref,
    w_self_qkv_ref, b_self_qkv_ref, w_self_o_ref, b_self_o_ref,
    w_cross_q_ref, b_cross_q_ref, w_cross_kv_ref, b_cross_kv_ref,
    w_cross_o_ref, b_cross_o_ref,
    w_ffn1_ref, b_ffn1_ref, w_ffn2_ref, b_ffn2_ref,
    ln1_g_ref, ln1_b_ref, ln2_g_ref, ln2_b_ref, ln3_g_ref, ln3_b_ref,
    w_dense_ref, b_dense_ref,
    out_ref, *, num_heads, num_layers,
):
    # One grid step == one batch element. Everything below lives in VMEM.
    x = x_ref[0]                   # (S, D)   decoder activations
    enc = enc_ref[0]               # (S, D)   encoder output
    self_bias = self_bias_ref[0]   # (S, S)   additive causal/attention bias (0 or -1e10)
    cross_bias = cross_bias_ref[0]  # (1, S)  additive key-padding bias (0 or -1e10)

    S, D = x.shape
    dh = D // num_heads
    inv_scale = 1.0 / math.sqrt(float(dh))

    def matmul(a, w, b):
        # MXU matmul (+ bias) with f32 accumulation; residual/LN epilogues stay fused in VMEM.
        return jnp.dot(a.astype(_MXU_DTYPE), w.astype(_MXU_DTYPE),
                       preferred_element_type=jnp.float32) + b

    def layer_norm(v, g, b):
        mean = jnp.mean(v, axis=-1, keepdims=True)
        cen = v - mean
        var = jnp.mean(cen * cen, axis=-1, keepdims=True)
        return cen * jax.lax.rsqrt(var + 1e-5) * g + b

    def sdpa(q, k, v, bias):
        # Per-head scaled-dot-product attention; heads are static lane slices of the
        # fused (S, D) projections, so no 4-D transposes / relayouts are needed.
        heads = []
        for h in range(num_heads):
            sl = slice(h * dh, (h + 1) * dh)
            qh, kh, vh = q[:, sl], k[:, sl], v[:, sl]
            s = jax.lax.dot_general(
                qh.astype(_MXU_DTYPE), kh.astype(_MXU_DTYPE),
                (((1,), (1,)), ((), ())),          # q @ k^T, contraction over dh
                preferred_element_type=jnp.float32) * inv_scale
            s = s + bias                            # additive mask bias (f32)
            s = s - jnp.max(s, axis=-1, keepdims=True)
            p = jnp.exp(s)
            p = p * pl.reciprocal(jnp.sum(p, axis=-1, keepdims=True), approx=True)
            heads.append(jnp.dot(p.astype(_MXU_DTYPE), vh.astype(_MXU_DTYPE),
                                 preferred_element_type=jnp.float32))
        return jnp.concatenate(heads, axis=-1)      # (S, D)

    for l in range(num_layers):
        # ---- masked multi-head self-attention (fused QKV projection) ----
        qkv = matmul(x, w_self_qkv_ref[l], b_self_qkv_ref[l])            # (S, 3D)
        attn = sdpa(qkv[:, :D], qkv[:, D:2 * D], qkv[:, 2 * D:], self_bias)
        attn = matmul(attn, w_self_o_ref[l], b_self_o_ref[l])
        x = layer_norm(x + attn, ln1_g_ref[l], ln1_b_ref[l])

        # ---- cross attention over encoder output (fused KV projection) ----
        q = matmul(x, w_cross_q_ref[l], b_cross_q_ref[l])                # (S, D)
        kv = matmul(enc, w_cross_kv_ref[l], b_cross_kv_ref[l])           # (S, 2D)
        attn = sdpa(q, kv[:, :D], kv[:, D:], cross_bias)
        attn = matmul(attn, w_cross_o_ref[l], b_cross_o_ref[l])
        x = layer_norm(x + attn, ln2_g_ref[l], ln2_b_ref[l])

        # ---- feed-forward ----
        h1 = jnp.maximum(matmul(x, w_ffn1_ref[l], b_ffn1_ref[l]), 0.0)   # (S, F)
        h2 = matmul(h1, w_ffn2_ref[l], b_ffn2_ref[l])                    # (S, D)
        x = layer_norm(x + h2, ln3_g_ref[l], ln3_b_ref[l])

    # final vocab projection; output lane dim is padded to a multiple of 128 (lane-dense store)
    out_ref[0] = matmul(x, w_dense_ref[...], b_dense_ref[...])


def _decoder_stack_call(x, enc, self_bias, cross_bias, params, num_heads, num_layers):
    B, S, D = x.shape
    Vp = params["w_dense"].shape[1]
    weights = [params[name] for name in _WEIGHT_NAMES]

    def per_batch(arr):
        return pl.BlockSpec((1,) + arr.shape[1:], lambda b: (b, 0, 0))

    def resident(arr):
        nd = arr.ndim
        return pl.BlockSpec(arr.shape, lambda b, _nd=nd: (0,) * _nd)

    in_specs = ([per_batch(x), per_batch(enc), per_batch(self_bias), per_batch(cross_bias)]
                + [resident(w) for w in weights])

    kern = functools.partial(_decoder_stack_kernel,
                             num_heads=num_heads, num_layers=num_layers)
    return pl.pallas_call(
        kern,
        grid=(B,),
        in_specs=in_specs,
        out_specs=pl.BlockSpec((1, S, Vp), lambda b: (b, 0, 0)),
        out_shape=jax.ShapeDtypeStruct((B, S, Vp), jnp.float32),
        compiler_params=pltpu.CompilerParams(dimension_semantics=("parallel",)),
    )(x, enc, self_bias, cross_bias, *weights)


# ----------------------------- plain-JAX glue (embedding, PE, mask -> bias) -----------------------------

def positional_encoding(max_length, embedding_dim):
    pos = jnp.arange(max_length, dtype=jnp.float32)[:, None]
    div = jnp.power(10000.0, jnp.arange(0, embedding_dim, 2, dtype=jnp.float32) / embedding_dim)
    angles = pos / div
    pe = jnp.zeros((max_length, embedding_dim), dtype=jnp.float32)
    pe = pe.at[:, 0::2].set(jnp.sin(angles))
    pe = pe.at[:, 1::2].set(jnp.cos(angles))
    return pe


def stacked_decoder_forward(params, tgt_ids, encoder_output, padding_mask, attention_mask,
                            *, num_heads, num_layers, vocab_size):
    # TODO(synk): embedding gather + positional-encoding add are data-dependent gathers kept in
    # plain JAX; everything else runs in the single fused Pallas kernel.
    S = tgt_ids.shape[1]
    x = params["embedding"][tgt_ids] + params["pos_enc"][:S, :]

    # masked_fill(mask == 0, -1e10) expressed as compact additive biases (no (B*H,S,S) tensor).
    self_bias = jnp.where(attention_mask[:, 0] == 0.0, -1.0e10, 0.0).astype(jnp.float32)   # (B,S,S)
    cross_bias = jnp.where(padding_mask[:, 0] == 0.0, -1.0e10, 0.0).astype(jnp.float32)    # (B,1,S)

    logits_padded = _decoder_stack_call(x, encoder_output, self_bias, cross_bias,
                                        params, num_heads, num_layers)
    return logits_padded[:, :, :vocab_size]


# ----------------------------- deterministic parameter init -----------------------------

def init_stacked_decoder_params(key, vocab_size, max_length, embedding_dim,
                                feed_forward_dim, num_layers):
    D, F, L = embedding_dim, feed_forward_dim, num_layers
    Vp = ((vocab_size + 127) // 128) * 128          # lane-dense padded logits dim

    ks = jax.random.split(key, 17)

    def w(k, shape):
        return jax.random.normal(k, shape, jnp.float32) * 0.02

    dense_w = jnp.pad(w(ks[15], (D, vocab_size)), ((0, 0), (0, Vp - vocab_size)))
    dense_b = jnp.pad(w(ks[16], (1, vocab_size)), ((0, 0), (0, Vp - vocab_size)))

    return dict(
        embedding=w(ks[0], (vocab_size, D)),
        pos_enc=positional_encoding(max_length, D),
        # per-layer weights stacked along a leading layer axis (kernel unrolls over it)
        w_self_qkv=w(ks[1], (L, D, 3 * D)), b_self_qkv=w(ks[2], (L, 1, 3 * D)),
        w_self_o=w(ks[3], (L, D, D)),       b_self_o=w(ks[4], (L, 1, D)),
        w_cross_q=w(ks[5], (L, D, D)),      b_cross_q=w(ks[6], (L, 1, D)),
        w_cross_kv=w(ks[7], (L, D, 2 * D)), b_cross_kv=w(ks[8], (L, 1, 2 * D)),
        w_cross_o=w(ks[9], (L, D, D)),      b_cross_o=w(ks[10], (L, 1, D)),
        w_ffn1=w(ks[11], (L, D, F)),        b_ffn1=w(ks[12], (L, 1, F)),
        w_ffn2=w(ks[13], (L, F, D)),        b_ffn2=w(ks[14], (L, 1, D)),
        ln1_g=jnp.ones((L, 1, D), jnp.float32), ln1_b=jnp.zeros((L, 1, D), jnp.float32),
        ln2_g=jnp.ones((L, 1, D), jnp.float32), ln2_b=jnp.zeros((L, 1, D), jnp.float32),
        ln3_g=jnp.ones((L, 1, D), jnp.float32), ln3_b=jnp.zeros((L, 1, D), jnp.float32),
        w_dense=dense_w, b_dense=dense_b,
    )


# ----------------------------- main -----------------------------

if __name__ == "__main__":
    vocab_size = 48
    max_length = 8
    embedding_dim = 32
    feed_forward_dim = 64
    num_heads = 4
    num_layers = 2
    batch = 2

    key = jax.random.PRNGKey(0)
    k_params, k_tgt, k_enc = jax.random.split(key, 3)

    params = init_stacked_decoder_params(k_params, vocab_size, max_length,
                                         embedding_dim, feed_forward_dim, num_layers)

    tgt_batch = jax.random.randint(k_tgt, (batch, max_length), 0, vocab_size, jnp.int32)
    encoder_output = jax.random.normal(k_enc, (batch, max_length, embedding_dim), jnp.float32)

    # padding mask over encoder key positions: (B, 1, 1, S) — 1 = keep, 0 = padded
    src_lens = jnp.array([max_length, max_length - 2], dtype=jnp.int32)
    key_pos = jnp.arange(max_length)[None, :]
    padding_mask = (key_pos < src_lens[:, None]).astype(jnp.float32)[:, None, None, :]

    # causal attention mask for decoder self-attention: (B, 1, S, S)
    causal = jnp.tril(jnp.ones((max_length, max_length), jnp.float32))
    attention_mask = jnp.broadcast_to(causal[None, None, :, :],
                                      (batch, 1, max_length, max_length))

    fwd = jax.jit(functools.partial(stacked_decoder_forward,
                                    num_heads=num_heads, num_layers=num_layers,
                                    vocab_size=vocab_size))
    out = fwd(params, tgt_batch, encoder_output, padding_mask, attention_mask)
    jax.block_until_ready(out)

    assert out.shape == (batch, max_length, vocab_size)
    assert bool(jnp.all(jnp.isfinite(out)))
    print("KERNEL_OK")
</pallas_src>

<mosaic_0001>
module attributes {stable_mosaic.version = 11 : i64} {
  func.func @_decoder_stack_kernel(%arg0: i32, %arg1: memref<1x8x32xf32, #tpu.memory_space<vmem>>, %arg2: memref<1x8x32xf32, #tpu.memory_space<vmem>>, %arg3: memref<1x8x8xf32, #tpu.memory_space<vmem>>, %arg4: memref<1x1x8xf32, #tpu.memory_space<vmem>>, %arg5: memref<2x32x96xf32, #tpu.memory_space<vmem>>, %arg6: memref<2x1x96xf32, #tpu.memory_space<vmem>>, %arg7: memref<2x32x32xf32, #tpu.memory_space<vmem>>, %arg8: memref<2x1x32xf32, #tpu.memory_space<vmem>>, %arg9: memref<2x32x32xf32, #tpu.memory_space<vmem>>, %arg10: memref<2x1x32xf32, #tpu.memory_space<vmem>>, %arg11: memref<2x32x64xf32, #tpu.memory_space<vmem>>, %arg12: memref<2x1x64xf32, #tpu.memory_space<vmem>>, %arg13: memref<2x32x32xf32, #tpu.memory_space<vmem>>, %arg14: memref<2x1x32xf32, #tpu.memory_space<vmem>>, %arg15: memref<2x32x64xf32, #tpu.memory_space<vmem>>, %arg16: memref<2x1x64xf32, #tpu.memory_space<vmem>>, %arg17: memref<2x64x32xf32, #tpu.memory_space<vmem>>, %arg18: memref<2x1x32xf32, #tpu.memory_space<vmem>>, %arg19: memref<2x1x32xf32, #tpu.memory_space<vmem>>, %arg20: memref<2x1x32xf32, #tpu.memory_space<vmem>>, %arg21: memref<2x1x32xf32, #tpu.memory_space<vmem>>, %arg22: memref<2x1x32xf32, #tpu.memory_space<vmem>>, %arg23: memref<2x1x32xf32, #tpu.memory_space<vmem>>, %arg24: memref<2x1x32xf32, #tpu.memory_space<vmem>>, %arg25: memref<32x128xf32, #tpu.memory_space<vmem>>, %arg26: memref<1x128xf32, #tpu.memory_space<vmem>>, %arg27: memref<1x8x128xf32, #tpu.memory_space<vmem>>) attributes {dimension_semantics = [#tpu.dimension_semantics<parallel>], iteration_bounds = array<i64: 2>, scalar_prefetch = 0 : i64, scratch_operands = 0 : i64, tpu.core_type = #tpu.core_type<tc>, window_params = [{transform_indices = @transform_0, window_bounds = array<i64: 1, 8, 32>}, {transform_indices = @transform_1, window_bounds = array<i64: 1, 8, 32>}, {transform_indices = @transform_2, window_bounds = array<i64: 1, 8, 8>}, {transform_indices = @transform_3, window_bounds = array<i64: 1, 1, 8>}, {pipeline_mode = #tpu.pipeline_mode<synchronous>, transform_indices = @transform_4, window_bounds = array<i64: 2, 32, 96>}, {pipeline_mode = #tpu.pipeline_mode<synchronous>, transform_indices = @transform_5, window_bounds = array<i64: 2, 1, 96>}, {pipeline_mode = #tpu.pipeline_mode<synchronous>, transform_indices = @transform_6, window_bounds = array<i64: 2, 32, 32>}, {pipeline_mode = #tpu.pipeline_mode<synchronous>, transform_indices = @transform_7, window_bounds = array<i64: 2, 1, 32>}, {pipeline_mode = #tpu.pipeline_mode<synchronous>, transform_indices = @transform_8, window_bounds = array<i64: 2, 32, 32>}, {pipeline_mode = #tpu.pipeline_mode<synchronous>, transform_indices = @transform_9, window_bounds = array<i64: 2, 1, 32>}, {pipeline_mode = #tpu.pipeline_mode<synchronous>, transform_indices = @transform_10, window_bounds = array<i64: 2, 32, 64>}, {pipeline_mode = #tpu.pipeline_mode<synchronous>, transform_indices = @transform_11, window_bounds = array<i64: 2, 1, 64>}, {pipeline_mode = #tpu.pipeline_mode<synchronous>, transform_indices = @transform_12, window_bounds = array<i64: 2, 32, 32>}, {pipeline_mode = #tpu.pipeline_mode<synchronous>, transform_indices = @transform_13, window_bounds = array<i64: 2, 1, 32>}, {pipeline_mode = #tpu.pipeline_mode<synchronous>, transform_indices = @transform_14, window_bounds = array<i64: 2, 32, 64>}, {pipeline_mode = #tpu.pipeline_mode<synchronous>, transform_indices = @transform_15, window_bounds = array<i64: 2, 1, 64>}, {pipeline_mode = #tpu.pipeline_mode<synchronous>, transform_indices = @transform_16, window_bounds = array<i64: 2, 64, 32>}, {pipeline_mode = #tpu.pipeline_mode<synchronous>, transform_indices = @transform_17, window_bounds = array<i64: 2, 1, 32>}, {pipeline_mode = #tpu.pipeline_mode<synchronous>, transform_indices = @transform_18, window_bounds = array<i64: 2, 1, 32>}, {pipeline_mode = #tpu.pipeline_mode<synchronous>, transform_indices = @transform_19, window_bounds = array<i64: 2, 1, 32>}, {pipeline_mode = #tpu.pipeline_mode<synchronous>, transform_indices = @transform_20, window_bounds = array<i64: 2, 1, 32>}, {pipeline_mode = #tpu.pipeline_mode<synchronous>, transform_indices = @transform_21, window_bounds = array<i64: 2, 1, 32>}, {pipeline_mode = #tpu.pipeline_mode<synchronous>, transform_indices = @transform_22, window_bounds = array<i64: 2, 1, 32>}, {pipeline_mode = #tpu.pipeline_mode<synchronous>, transform_indices = @transform_23, window_bounds = array<i64: 2, 1, 32>}, {pipeline_mode = #tpu.pipeline_mode<synchronous>, transform_indices = @transform_24, window_bounds = array<i64: 32, 128>}, {pipeline_mode = #tpu.pipeline_mode<synchronous>, transform_indices = @transform_25, window_bounds = array<i64: 1, 128>}, {transform_indices = @transform_26, window_bounds = array<i64: 1, 8, 128>}]} {
    %c0 = arith.constant 0 : index
    %c0_0 = arith.constant 0 : index
    %c0_1 = arith.constant 0 : index
    %0 = vector.load %arg1[%c0, %c0_0, %c0_1] : memref<1x8x32xf32, #tpu.memory_space<vmem>>, vector<1x8x32xf32>
    %1 = vector.shape_cast %0 : vector<1x8x32xf32> to vector<8x32xf32>
    %c0_2 = arith.constant 0 : index
    %c0_3 = arith.constant 0 : index
    %c0_4 = arith.constant 0 : index
    %2 = vector.load %arg2[%c0_2, %c0_3, %c0_4] : memref<1x8x32xf32, #tpu.memory_space<vmem>>, vector<1x8x32xf32>
    %3 = vector.shape_cast %2 : vector<1x8x32xf32> to vector<8x32xf32>
    %c0_5 = arith.constant 0 : index
    %c0_6 = arith.constant 0 : index
    %c0_7 = arith.constant 0 : index
    %4 = vector.load %arg3[%c0_5, %c0_6, %c0_7] : memref<1x8x8xf32, #tpu.memory_space<vmem>>, vector<1x8x8xf32>
    %5 = vector.shape_cast %4 : vector<1x8x8xf32> to vector<8x8xf32>
    %c0_8 = arith.constant 0 : index
    %c0_9 = arith.constant 0 : index
    %c0_10 = arith.constant 0 : index
    %6 = vector.load %arg4[%c0_8, %c0_9, %c0_10] : memref<1x1x8xf32, #tpu.memory_space<vmem>>, vector<1x1x8xf32>
    %7 = vector.shape_cast %6 : vector<1x1x8xf32> to vector<1x8xf32>
    %c0_11 = arith.constant 0 : index
    %c0_12 = arith.constant 0 : index
    %c0_13 = arith.constant 0 : index
    %8 = vector.load %arg5[%c0_11, %c0_12, %c0_13] : memref<2x32x96xf32, #tpu.memory_space<vmem>>, vector<1x32x96xf32>
    %9 = vector.shape_cast %8 : vector<1x32x96xf32> to vector<32x96xf32>
    %c0_14 = arith.constant 0 : index
    %c0_15 = arith.constant 0 : index
    %c0_16 = arith.constant 0 : index
    %10 = vector.load %arg6[%c0_14, %c0_15, %c0_16] : memref<2x1x96xf32, #tpu.memory_space<vmem>>, vector<1x1x96xf32>
    %11 = vector.shape_cast %10 : vector<1x1x96xf32> to vector<1x96xf32>
    %cst = arith.constant dense<0.000000e+00> : vector<8x96xf32>
    %12 = tpu.matmul %1, %9, %cst {dimension_numbers = #tpu.dot_dimension_numbers<[1], [0], [0], [1], [0, 0, 1, 1], [], []>} : vector<8x32xf32>, vector<32x96xf32>, vector<8x96xf32> -> vector<8x96xf32>
    %13 = vector.broadcast %11 : vector<1x96xf32> to vector<8x96xf32>
    %14 = arith.addf %12, %13 : vector<8x96xf32>
    %15 = vector.extract_strided_slice %14 {offsets = [0, 0], sizes = [8, 32], strides = [1, 1]} : vector<8x96xf32> to vector<8x32xf32>
    %16 = vector.extract_strided_slice %14 {offsets = [0, 32], sizes = [8, 32], strides = [1, 1]} : vector<8x96xf32> to vector<8x32xf32>
    %17 = vector.extract_strided_slice %14 {offsets = [0, 64], sizes = [8, 32], strides = [1, 1]} : vector<8x96xf32> to vector<8x32xf32>
    %18 = vector.extract_strided_slice %15 {offsets = [0, 0], sizes = [8, 8], strides = [1, 1]} : vector<8x32xf32> to vector<8x8xf32>
    %19 = vector.extract_strided_slice %16 {offsets = [0, 0], sizes = [8, 8], strides = [1, 1]} : vector<8x32xf32> to vector<8x8xf32>
    %20 = vector.extract_strided_slice %17 {offsets = [0, 0], sizes = [8, 8], strides = [1, 1]} : vector<8x32xf32> to vector<8x8xf32>
    %cst_17 = arith.constant dense<0.000000e+00> : vector<8x8xf32>
    %21 = tpu.matmul %18, %19, %cst_17 {dimension_numbers = #tpu.dot_dimension_numbers<[1], [1], [0], [0], [0, 0, 1, 0], [], []>} : vector<8x8xf32>, vector<8x8xf32>, vector<8x8xf32> -> vector<8x8xf32>
    %cst_18 = arith.constant 0.353553385 : f32
    %22 = vector.broadcast %cst_18 : f32 to vector<8x8xf32>
    %23 = arith.mulf %21, %22 : vector<8x8xf32>
    %24 = arith.addf %23, %5 : vector<8x8xf32>
    %cst_19 = arith.constant dense<0xFF800000> : vector<8xf32>
    %25 = vector.multi_reduction <maximumf>, %24, %cst_19 [1] : vector<8x8xf32> to vector<8xf32>
    %26 = vector.shape_cast %25 : vector<8xf32> to vector<8x1xf32>
    %27 = vector.broadcast %26 : vector<8x1xf32> to vector<8x8xf32>
    %28 = arith.subf %24, %27 : vector<8x8xf32>
    %29 = math.exp %28 : vector<8x8xf32>
    %cst_20 = arith.constant dense<0.000000e+00> : vector<8xf32>
    %30 = vector.multi_reduction <add>, %29, %cst_20 [1] : vector<8x8xf32> to vector<8xf32>
    %31 = vector.shape_cast %30 : vector<8xf32> to vector<8x1xf32>
    %32 = tpu.reciprocal %31 {approx = true} : vector<8x1xf32> -> vector<8x1xf32>
    %33 = vector.broadcast %32 : vector<8x1xf32> to vector<8x8xf32>
    %34 = arith.mulf %29, %33 : vector<8x8xf32>
    %cst_21 = arith.constant dense<0.000000e+00> : vector<8x8xf32>
    %35 = tpu.matmul %34, %20, %cst_21 {dimension_numbers = #tpu.dot_dimension_numbers<[1], [0], [0], [1], [0, 0, 1, 1], [], []>} : vector<8x8xf32>, vector<8x8xf32>, vector<8x8xf32> -> vector<8x8xf32>
    %36 = vector.extract_strided_slice %15 {offsets = [0, 8], sizes = [8, 8], strides = [1, 1]} : vector<8x32xf32> to vector<8x8xf32>
    %37 = vector.extract_strided_slice %16 {offsets = [0, 8], sizes = [8, 8], strides = [1, 1]} : vector<8x32xf32> to vector<8x8xf32>
    %38 = vector.extract_strided_slice %17 {offsets = [0, 8], sizes = [8, 8], strides = [1, 1]} : vector<8x32xf32> to vector<8x8xf32>
    %cst_22 = arith.constant dense<0.000000e+00> : vector<8x8xf32>
    %39 = tpu.matmul %36, %37, %cst_22 {dimension_numbers = #tpu.dot_dimension_numbers<[1], [1], [0], [0], [0, 0, 1, 0], [], []>} : vector<8x8xf32>, vector<8x8xf32>, vector<8x8xf32> -> vector<8x8xf32>
    %cst_23 = arith.constant 0.353553385 : f32
    %40 = vector.broadcast %cst_23 : f32 to vector<8x8xf32>
    %41 = arith.mulf %39, %40 : vector<8x8xf32>
    %42 = arith.addf %41, %5 : vector<8x8xf32>
    %cst_24 = arith.constant dense<0xFF800000> : vector<8xf32>
    %43 = vector.multi_reduction <maximumf>, %42, %cst_24 [1] : vector<8x8xf32> to vector<8xf32>
    %44 = vector.shape_cast %43 : vector<8xf32> to vector<8x1xf32>
    %45 = vector.broadcast %44 : vector<8x1xf32> to vector<8x8xf32>
    %46 = arith.subf %42, %45 : vector<8x8xf32>
    %47 = math.exp %46 : vector<8x8xf32>
    %cst_25 = arith.constant dense<0.000000e+00> : vector<8xf32>
    %48 = vector.multi_reduction <add>, %47, %cst_25 [1] : vector<8x8xf32> to vector<8xf32>
    %49 = vector.shape_cast %48 : vector<8xf32> to vector<8x1xf32>
    %50 = tpu.reciprocal %49 {approx = true} : vector<8x1xf32> -> vector<8x1xf32>
    %51 = vector.broadcast %50 : vector<8x1xf32> to vector<8x8xf32>
    %52 = arith.mulf %47, %51 : vector<8x8xf32>
    %cst_26 = arith.constant dense<0.000000e+00> : vector<8x8xf32>
    %53 = tpu.matmul %52, %38, %cst_26 {dimension_numbers = #tpu.dot_dimension_numbers<[1], [0], [0], [1], [0, 0, 1, 1], [], []>} : vector<8x8xf32>, vector<8x8xf32>, vector<8x8xf32> -> vector<8x8xf32>
    %54 = vector.extract_strided_slice %15 {offsets = [0, 16], sizes = [8, 8], strides = [1, 1]} : vector<8x32xf32> to vector<8x8xf32>
    %55 = vector.extract_strided_slice %16 {offsets = [0, 16], sizes = [8, 8], strides = [1, 1]} : vector<8x32xf32> to vector<8x8xf32>
    %56 = vector.extract_strided_slice %17 {offsets = [0, 16], sizes = [8, 8], strides = [1, 1]} : vector<8x32xf32> to vector<8x8xf32>
    %cst_27 = arith.constant dense<0.000000e+00> : vector<8x8xf32>
    %57 = tpu.matmul %54, %55, %cst_27 {dimension_numbers = #tpu.dot_dimension_numbers<[1], [1], [0], [0], [0, 0, 1, 0], [], []>} : vector<8x8xf32>, vector<8x8xf32>, vector<8x8xf32> -> vector<8x8xf32>
    %cst_28 = arith.constant 0.353553385 : f32
    %58 = vector.broadcast %cst_28 : f32 to vector<8x8xf32>
    %59 = arith.mulf %57, %58 : vector<8x8xf32>
    %60 = arith.addf %59, %5 : vector<8x8xf32>
    %cst_29 = arith.constant dense<0xFF800000> : vector<8xf32>
    %61 = vector.multi_reduction <maximumf>, %60, %cst_29 [1] : vector<8x8xf32> to vector<8xf32>
    %62 = vector.shape_cast %61 : vector<8xf32> to vector<8x1xf32>
    %63 = vector.broadcast %62 : vector<8x1xf32> to vector<8x8xf32>
    %64 = arith.subf %60, %63 : vector<8x8xf32>
    %65 = math.exp %64 : vector<8x8xf32>
    %cst_30 = arith.constant dense<0.000000e+00> : vector<8xf32>
    %66 = vector.multi_reduction <add>, %65, %cst_30 [1] : vector<8x8xf32> to vector<8xf32>
    %67 = vector.shape_cast %66 : vector<8xf32> to vector<8x1xf32>
    %68 = tpu.reciprocal %67 {approx = true} : vector<8x1xf32> -> vector<8x1xf32>
    %69 = vector.broadcast %68 : vector<8x1xf32> to vector<8x8xf32>
    %70 = arith.mulf %65, %69 : vector<8x8xf32>
    %cst_31 = arith.constant dense<0.000000e+00> : vector<8x8xf32>
    %71 = tpu.matmul %70, %56, %cst_31 {dimension_numbers = #tpu.dot_dimension_numbers<[1], [0], [0], [1], [0, 0, 1, 1], [], []>} : vector<8x8xf32>, vector<8x8xf32>, vector<8x8xf32> -> vector<8x8xf32>
    %72 = vector.extract_strided_slice %15 {offsets = [0, 24], sizes = [8, 8], strides = [1, 1]} : vector<8x32xf32> to vector<8x8xf32>
    %73 = vector.extract_strided_slice %16 {offsets = [0, 24], sizes = [8, 8], strides = [1, 1]} : vector<8x32xf32> to vector<8x8xf32>
    %74 = vector.extract_strided_slice %17 {offsets = [0, 24], sizes = [8, 8], strides = [1, 1]} : vector<8x32xf32> to vector<8x8xf32>
    %cst_32 = arith.constant dense<0.000000e+00> : vector<8x8xf32>
    %75 = tpu.matmul %72, %73, %cst_32 {dimension_numbers = #tpu.dot_dimension_numbers<[1], [1], [0], [0], [0, 0, 1, 0], [], []>} : vector<8x8xf32>, vector<8x8xf32>, vector<8x8xf32> -> vector<8x8xf32>
    %cst_33 = arith.constant 0.353553385 : f32
    %76 = vector.broadcast %cst_33 : f32 to vector<8x8xf32>
    %77 = arith.mulf %75, %76 : vector<8x8xf32>
    %78 = arith.addf %77, %5 : vector<8x8xf32>
    %cst_34 = arith.constant dense<0xFF800000> : vector<8xf32>
    %79 = vector.multi_reduction <maximumf>, %78, %cst_34 [1] : vector<8x8xf32> to vector<8xf32>
    %80 = vector.shape_cast %79 : vector<8xf32> to vector<8x1xf32>
    %81 = vector.broadcast %80 : vector<8x1xf32> to vector<8x8xf32>
    %82 = arith.subf %78, %81 : vector<8x8xf32>
    %83 = math.exp %82 : vector<8x8xf32>
    %cst_35 = arith.constant dense<0.000000e+00> : vector<8xf32>
    %84 = vector.multi_reduction <add>, %83, %cst_35 [1] : vector<8x8xf32> to vector<8xf32>
    %85 = vector.shape_cast %84 : vector<8xf32> to vector<8x1xf32>
    %86 = tpu.reciprocal %85 {approx = true} : vector<8x1xf32> -> vector<8x1xf32>
    %87 = vector.broadcast %86 : vector<8x1xf32> to vector<8x8xf32>
    %88 = arith.mulf %83, %87 : vector<8x8xf32>
    %cst_36 = arith.constant dense<0.000000e+00> : vector<8x8xf32>
    %89 = tpu.matmul %88, %74, %cst_36 {dimension_numbers = #tpu.dot_dimension_numbers<[1], [0], [0], [1], [0, 0, 1, 1], [], []>} : vector<8x8xf32>, vector<8x8xf32>, vector<8x8xf32> -> vector<8x8xf32>
    %90 = tpu.concatenate %35, %53, %71, %89 in 1 : vector<8x8xf32>, vector<8x8xf32>, vector<8x8xf32>, vector<8x8xf32> -> vector<8x32xf32>
    %c0_37 = arith.constant 0 : index
    %c0_38 = arith.constant 0 : index
    %c0_39 = arith.constant 0 : index
    %91 = vector.load %arg7[%c0_37, %c0_38, %c0_39] : memref<2x32x32xf32, #tpu.memory_space<vmem>>, vector<1x32x32xf32>
    %92 = vector.shape_cast %91 : vector<1x32x32xf32> to vector<32x32xf32>
    %c0_40 = arith.constant 0 : index
    %c0_41 = arith.constant 0 : index
    %c0_42 = arith.constant 0 : index
    %93 = vector.load %arg8[%c0_40, %c0_41, %c0_42] : memref<2x1x32xf32, #tpu.memory_space<vmem>>, vector<1x1x32xf32>
    %94 = vector.shape_cast %93 : vector<1x1x32xf32> to vector<1x32xf32>
    %cst_43 = arith.constant dense<0.000000e+00> : vector<8x32xf32>
    %95 = tpu.matmul %90, %92, %cst_43 {dimension_numbers = #tpu.dot_dimension_numbers<[1], [0], [0], [1], [0, 0, 1, 1], [], []>} : vector<8x32xf32>, vector<32x32xf32>, vector<8x32xf32> -> vector<8x32xf32>
    %96 = vector.broadcast %94 : vector<1x32xf32> to vector<8x32xf32>
    %97 = arith.addf %95, %96 : vector<8x32xf32>
    %98 = arith.addf %1, %97 : vector<8x32xf32>
    %c0_44 = arith.constant 0 : index
    %c0_45 = arith.constant 0 : index
    %c0_46 = arith.constant 0 : index
    %99 = vector.load %arg19[%c0_44, %c0_45, %c0_46] : memref<2x1x32xf32, #tpu.memory_space<vmem>>, vector<1x1x32xf32>
    %100 = vector.shape_cast %99 : vector<1x1x32xf32> to vector<1x32xf32>
    %c0_47 = arith.constant 0 : index
    %c0_48 = arith.constant 0 : index
    %c0_49 = arith.constant 0 : index
    %101 = vector.load %arg20[%c0_47, %c0_48, %c0_49] : memref<2x1x32xf32, #tpu.memory_space<vmem>>, vector<1x1x32xf32>
    %102 = vector.shape_cast %101 : vector<1x1x32xf32> to vector<1x32xf32>
    %cst_50 = arith.constant dense<0.000000e+00> : vector<8xf32>
    %103 = vector.multi_reduction <add>, %98, %cst_50 [1] : vector<8x32xf32> to vector<8xf32>
    %104 = vector.shape_cast %103 : vector<8xf32> to vector<8x1xf32>
    %cst_51 = arith.constant 3.200000e+01 : f32
    %105 = vector.broadcast %cst_51 : f32 to vector<8x1xf32>
    %106 = arith.divf %104, %105 : vector<8x1xf32>
    %107 = vector.broadcast %106 : vector<8x1xf32> to vector<8x32xf32>
    %108 = arith.subf %98, %107 : vector<8x32xf32>
    %109 = arith.mulf %108, %108 : vector<8x32xf32>
    %cst_52 = arith.constant dense<0.000000e+00> : vector<8xf32>
    %110 = vector.multi_reduction <add>, %109, %cst_52 [1] : vector<8x32xf32> to vector<8xf32>
    %111 = vector.shape_cast %110 : vector<8xf32> to vector<8x1xf32>
    %cst_53 = arith.constant 3.200000e+01 : f32
    %112 = vector.broadcast %cst_53 : f32 to vector<8x1xf32>
    %113 = arith.divf %111, %112 : vector<8x1xf32>
    %cst_54 = arith.constant 9.99999974E-6 : f32
    %114 = vector.broadcast %cst_54 : f32 to vector<8x1xf32>
    %115 = arith.addf %113, %114 : vector<8x1xf32>
    %116 = math.rsqrt %115 : vector<8x1xf32>
    %117 = vector.broadcast %116 : vector<8x1xf32> to vector<8x32xf32>
    %118 = arith.mulf %108, %117 : vector<8x32xf32>
    %119 = vector.broadcast %100 : vector<1x32xf32> to vector<8x32xf32>
    %120 = arith.mulf %118, %119 : vector<8x32xf32>
    %121 = vector.broadcast %102 : vector<1x32xf32> to vector<8x32xf32>
    %122 = arith.addf %120, %121 : vector<8x32xf32>
    %c0_55 = arith.constant 0 : index
    %c0_56 = arith.constant 0 : index
    %c0_57 = arith.constant 0 : index
    %123 = vector.load %arg9[%c0_55, %c0_56, %c0_57] : memref<2x32x32xf32, #tpu.memory_space<vmem>>, vector<1x32x32xf32>
    %124 = vector.shape_cast %123 : vector<1x32x32xf32> to vector<32x32xf32>
    %c0_58 = arith.constant 0 : index
    %c0_59 = arith.constant 0 : index
    %c0_60 = arith.constant 0 : index
    %125 = vector.load %arg10[%c0_58, %c0_59, %c0_60] : memref<2x1x32xf32, #tpu.memory_space<vmem>>, vector<1x1x32xf32>
    %126 = vector.shape_cast %125 : vector<1x1x32xf32> to vector<1x32xf32>
    %cst_61 = arith.constant dense<0.000000e+00> : vector<8x32xf32>
    %127 = tpu.matmul %122, %124, %cst_61 {dimension_numbers = #tpu.dot_dimension_numbers<[1], [0], [0], [1], [0, 0, 1, 1], [], []>} : vector<8x32xf32>, vector<32x32xf32>, vector<8x32xf32> -> vector<8x32xf32>
    %128 = vector.broadcast %126 : vector<1x32xf32> to vector<8x32xf32>
    %129 = arith.addf %127, %128 : vector<8x32xf32>
    %c0_62 = arith.constant 0 : index
    %c0_63 = arith.constant 0 : index
    %c0_64 = arith.constant 0 : index
    %130 = vector.load %arg11[%c0_62, %c0_63, %c0_64] : memref<2x32x64xf32, #tpu.memory_space<vmem>>, vector<1x32x64xf32>
    %131 = vector.shape_cast %130 : vector<1x32x64xf32> to vector<32x64xf32>
    %c0_65 = arith.constant 0 : index
    %c0_66 = arith.constant 0 : index
    %c0_67 = arith.constant 0 : index
    %132 = vector.load %arg12[%c0_65, %c0_66, %c0_67] : memref<2x1x64xf32, #tpu.memory_space<vmem>>, vector<1x1x64xf32>
    %133 = vector.shape_cast %132 : vector<1x1x64xf32> to vector<1x64xf32>
    %cst_68 = arith.constant dense<0.000000e+00> : vector<8x64xf32>
    %134 = tpu.matmul %3, %131, %cst_68 {dimension_numbers = #tpu.dot_dimension_numbers<[1], [0], [0], [1], [0, 0, 1, 1], [], []>} : vector<8x32xf32>, vector<32x64xf32>, vector<8x64xf32> -> vector<8x64xf32>
    %135 = vector.broadcast %133 : vector<1x64xf32> to vector<8x64xf32>
    %136 = arith.addf %134, %135 : vector<8x64xf32>
    %137 = vector.extract_strided_slice %136 {offsets = [0, 0], sizes = [8, 32], strides = [1, 1]} : vector<8x64xf32> to vector<8x32xf32>
    %138 = vector.extract_strided_slice %136 {offsets = [0, 32], sizes = [8, 32], strides = [1, 1]} : vector<8x64xf32> to vector<8x32xf32>
    %139 = vector.extract_strided_slice %129 {offsets = [0, 0], sizes = [8, 8], strides = [1, 1]} : vector<8x32xf32> to vector<8x8xf32>
    %140 = vector.extract_strided_slice %137 {offsets = [0, 0], sizes = [8, 8], strides = [1, 1]} : vector<8x32xf32> to vector<8x8xf32>
    %141 = vector.extract_strided_slice %138 {offsets = [0, 0], sizes = [8, 8], strides = [1, 1]} : vector<8x32xf32> to vector<8x8xf32>
    %cst_69 = arith.constant dense<0.000000e+00> : vector<8x8xf32>
    %142 = tpu.matmul %139, %140, %cst_69 {dimension_numbers = #tpu.dot_dimension_numbers<[1], [1], [0], [0], [0, 0, 1, 0], [], []>} : vector<8x8xf32>, vector<8x8xf32>, vector<8x8xf32> -> vector<8x8xf32>
    %cst_70 = arith.constant 0.353553385 : f32
    %143 = vector.broadcast %cst_70 : f32 to vector<8x8xf32>
    %144 = arith.mulf %142, %143 : vector<8x8xf32>
    %145 = vector.broadcast %7 : vector<1x8xf32> to vector<8x8xf32>
    %146 = arith.addf %144, %145 : vector<8x8xf32>
    %cst_71 = arith.constant dense<0xFF800000> : vector<8xf32>
    %147 = vector.multi_reduction <maximumf>, %146, %cst_71 [1] : vector<8x8xf32> to vector<8xf32>
    %148 = vector.shape_cast %147 : vector<8xf32> to vector<8x1xf32>
    %149 = vector.broadcast %148 : vector<8x1xf32> to vector<8x8xf32>
    %150 = arith.subf %146, %149 : vector<8x8xf32>
    %151 = math.exp %150 : vector<8x8xf32>
    %cst_72 = arith.constant dense<0.000000e+00> : vector<8xf32>
    %152 = vector.multi_reduction <add>, %151, %cst_72 [1] : vector<8x8xf32> to vector<8xf32>
    %153 = vector.shape_cast %152 : vector<8xf32> to vector<8x1xf32>
    %154 = tpu.reciprocal %153 {approx = true} : vector<8x1xf32> -> vector<8x1xf32>
    %155 = vector.broadcast %154 : vector<8x1xf32> to vector<8x8xf32>
    %156 = arith.mulf %151, %155 : vector<8x8xf32>
    %cst_73 = arith.constant dense<0.000000e+00> : vector<8x8xf32>
    %157 = tpu.matmul %156, %141, %cst_73 {dimension_numbers = #tpu.dot_dimension_numbers<[1], [0], [0], [1], [0, 0, 1, 1], [], []>} : vector<8x8xf32>, vector<8x8xf32>, vector<8x8xf32> -> vector<8x8xf32>
    %158 = vector.extract_strided_slice %129 {offsets = [0, 8], sizes = [8, 8], strides = [1, 1]} : vector<8x32xf32> to vector<8x8xf32>
    %159 = vector.extract_strided_slice %137 {offsets = [0, 8], sizes = [8, 8], strides = [1, 1]} : vector<8x32xf32> to vector<8x8xf32>
    %160 = vector.extract_strided_slice %138 {offsets = [0, 8], sizes = [8, 8], strides = [1, 1]} : vector<8x32xf32> to vector<8x8xf32>
    %cst_74 = arith.constant dense<0.000000e+00> : vector<8x8xf32>
    %161 = tpu.matmul %158, %159, %cst_74 {dimension_numbers = #tpu.dot_dimension_numbers<[1], [1], [0], [0], [0, 0, 1, 0], [], []>} : vector<8x8xf32>, vector<8x8xf32>, vector<8x8xf32> -> vector<8x8xf32>
    %cst_75 = arith.constant 0.353553385 : f32
    %162 = vector.broadcast %cst_75 : f32 to vector<8x8xf32>
    %163 = arith.mulf %161, %162 : vector<8x8xf32>
    %164 = vector.broadcast %7 : vector<1x8xf32> to vector<8x8xf32>
    %165 = arith.addf %163, %164 : vector<8x8xf32>
    %cst_76 = arith.constant dense<0xFF800000> : vector<8xf32>
    %166 = vector.multi_reduction <maximumf>, %165, %cst_76 [1] : vector<8x8xf32> to vector<8xf32>
    %167 = vector.shape_cast %166 : vector<8xf32> to vector<8x1xf32>
    %168 = vector.broadcast %167 : vector<8x1xf32> to vector<8x8xf32>
    %169 = arith.subf %165, %168 : vector<8x8xf32>
    %170 = math.exp %169 : vector<8x8xf32>
    %cst_77 = arith.constant dense<0.000000e+00> : vector<8xf32>
    %171 = vector.multi_reduction <add>, %170, %cst_77 [1] : vector<8x8xf32> to vector<8xf32>
    %172 = vector.shape_cast %171 : vector<8xf32> to vector<8x1xf32>
    %173 = tpu.reciprocal %172 {approx = true} : vector<8x1xf32> -> vector<8x1xf32>
    %174 = vector.broadcast %173 : vector<8x1xf32> to vector<8x8xf32>
    %175 = arith.mulf %170, %174 : vector<8x8xf32>
    %cst_78 = arith.constant dense<0.000000e+00> : vector<8x8xf32>
    %176 = tpu.matmul %175, %160, %cst_78 {dimension_numbers = #tpu.dot_dimension_numbers<[1], [0], [0], [1], [0, 0, 1, 1], [], []>} : vector<8x8xf32>, vector<8x8xf32>, vector<8x8xf32> -> vector<8x8xf32>
    %177 = vector.extract_strided_slice %129 {offsets = [0, 16], sizes = [8, 8], strides = [1, 1]} : vector<8x32xf32> to vector<8x8xf32>
    %178 = vector.extract_strided_slice %137 {offsets = [0, 16], sizes = [8, 8], strides = [1, 1]} : vector<8x32xf32> to vector<8x8xf32>
    %179 = vector.extract_strided_slice %138 {offsets = [0, 16], sizes = [8, 8], strides = [1, 1]} : vector<8x32xf32> to vector<8x8xf32>
    %cst_79 = arith.constant dense<0.000000e+00> : vector<8x8xf32>
    %180 = tpu.matmul %177, %178, %cst_79 {dimension_numbers = #tpu.dot_dimension_numbers<[1], [1], [0], [0], [0, 0, 1, 0], [], []>} : vector<8x8xf32>, vector<8x8xf32>, vector<8x8xf32> -> vector<8x8xf32>
    %cst_80 = arith.constant 0.353553385 : f32
    %181 = vector.broadcast %cst_80 : f32 to vector<8x8xf32>
    %182 = arith.mulf %180, %181 : vector<8x8xf32>
    %183 = vector.broadcast %7 : vector<1x8xf32> to vector<8x8xf32>
    %184 = arith.addf %182, %183 : vector<8x8xf32>
    %cst_81 = arith.constant dense<0xFF800000> : vector<8xf32>
    %185 = vector.multi_reduction <maximumf>, %184, %cst_81 [1] : vector<8x8xf32> to vector<8xf32>
    %186 = vector.shape_cast %185 : vector<8xf32> to vector<8x1xf32>
    %187 = vector.broadcast %186 : vector<8x1xf32> to vector<8x8xf32>
    %188 = arith.subf %184, %187 : vector<8x8xf32>
    %189 = math.exp %188 : vector<8x8xf32>
    %cst_82 = arith.constant dense<0.000000e+00> : vector<8xf32>
    %190 = vector.multi_reduction <add>, %189, %cst_82 [1] : vector<8x8xf32> to vector<8xf32>
    %191 = vector.shape_cast %190 : vector<8xf32> to vector<8x1xf32>
    %192 = tpu.reciprocal %191 {approx = true} : vector<8x1xf32> -> vector<8x1xf32>
    %193 = vector.broadcast %192 : vector<8x1xf32> to vector<8x8xf32>
    %194 = arith.mulf %189, %193 : vector<8x8xf32>
    %cst_83 = arith.constant dense<0.000000e+00> : vector<8x8xf32>
    %195 = tpu.matmul %194, %179, %cst_83 {dimension_numbers = #tpu.dot_dimension_numbers<[1], [0], [0], [1], [0, 0, 1, 1], [], []>} : vector<8x8xf32>, vector<8x8xf32>, vector<8x8xf32> -> vector<8x8xf32>
    %196 = vector.extract_strided_slice %129 {offsets = [0, 24], sizes = [8, 8], strides = [1, 1]} : vector<8x32xf32> to vector<8x8xf32>
    %197 = vector.extract_strided_slice %137 {offsets = [0, 24], sizes = [8, 8], strides = [1, 1]} : vector<8x32xf32> to vector<8x8xf32>
    %198 = vector.extract_strided_slice %138 {offsets = [0, 24], sizes = [8, 8], strides = [1, 1]} : vector<8x32xf32> to vector<8x8xf32>
    %cst_84 = arith.constant dense<0.000000e+00> : vector<8x8xf32>
    %199 = tpu.matmul %196, %197, %cst_84 {dimension_numbers = #tpu.dot_dimension_numbers<[1], [1], [0], [0], [0, 0, 1, 0], [], []>} : vector<8x8xf32>, vector<8x8xf32>, vector<8x8xf32> -> vector<8x8xf32>
    %cst_85 = arith.constant 0.353553385 : f32
    %200 = vector.broadcast %cst_85 : f32 to vector<8x8xf32>
    %201 = arith.mulf %199, %200 : vector<8x8xf32>
    %202 = vector.broadcast %7 : vector<1x8xf32> to vector<8x8xf32>
    %203 = arith.addf %201, %202 : vector<8x8xf32>
    %cst_86 = arith.constant dense<0xFF800000> : vector<8xf32>
    %204 = vector.multi_reduction <maximumf>, %203, %cst_86 [1] : vector<8x8xf32> to vector<8xf32>
    %205 = vector.shape_cast %204 : vector<8xf32> to vector<8x1xf32>
    %206 = vector.broadcast %205 : vector<8x1xf32> to vector<8x8xf32>
    %207 = arith.subf %203, %206 : vector<8x8xf32>
    %208 = math.exp %207 : vector<8x8xf32>
    %cst_87 = arith.constant dense<0.000000e+00> : vector<8xf32>
    %209 = vector.multi_reduction <add>, %208, %cst_87 [1] : vector<8x8xf32> to vector<8xf32>
    %210 = vector.shape_cast %209 : vector<8xf32> to vector<8x1xf32>
    %211 = tpu.reciprocal %210 {approx = true} : vector<8x1xf32> -> vector<8x1xf32>
    %212 = vector.broadcast %211 : vector<8x1xf32> to vector<8x8xf32>
    %213 = arith.mulf %208, %212 : vector<8x8xf32>
    %cst_88 = arith.constant dense<0.000000e+00> : vector<8x8xf32>
    %214 = tpu.matmul %213, %198, %cst_88 {dimension_numbers = #tpu.dot_dimension_numbers<[1], [0], [0], [1], [0, 0, 1, 1], [], []>} : vector<8x8xf32>, vector<8x8xf32>, vector<8x8xf32> -> vector<8x8xf32>
    %215 = tpu.concatenate %157, %176, %195, %214 in 1 : vector<8x8xf32>, vector<8x8xf32>, vector<8x8xf32>, vector<8x8xf32> -> vector<8x32xf32>
    %c0_89 = arith.constant 0 : index
    %c0_90 = arith.constant 0 : index
    %c0_91 = arith.constant 0 : index
    %216 = vector.load %arg13[%c0_89, %c0_90, %c0_91] : memref<2x32x32xf32, #tpu.memory_space<vmem>>, vector<1x32x32xf32>
    %217 = vector.shape_cast %216 : vector<1x32x32xf32> to vector<32x32xf32>
    %c0_92 = arith.constant 0 : index
    %c0_93 = arith.constant 0 : index
    %c0_94 = arith.constant 0 : index
    %218 = vector.load %arg14[%c0_92, %c0_93, %c0_94] : memref<2x1x32xf32, #tpu.memory_space<vmem>>, vector<1x1x32xf32>
    %219 = vector.shape_cast %218 : vector<1x1x32xf32> to vector<1x32xf32>
    %cst_95 = arith.constant dense<0.000000e+00> : vector<8x32xf32>
    %220 = tpu.matmul %215, %217, %cst_95 {dimension_numbers = #tpu.dot_dimension_numbers<[1], [0], [0], [1], [0, 0, 1, 1], [], []>} : vector<8x32xf32>, vector<32x32xf32>, vector<8x32xf32> -> vector<8x32xf32>
    %221 = vector.broadcast %219 : vector<1x32xf32> to vector<8x32xf32>
    %222 = arith.addf %220, %221 : vector<8x32xf32>
    %223 = arith.addf %122, %222 : vector<8x32xf32>
    %c0_96 = arith.constant 0 : index
    %c0_97 = arith.constant 0 : index
    %c0_98 = arith.constant 0 : index
    %224 = vector.load %arg21[%c0_96, %c0_97, %c0_98] : memref<2x1x32xf32, #tpu.memory_space<vmem>>, vector<1x1x32xf32>
    %225 = vector.shape_cast %224 : vector<1x1x32xf32> to vector<1x32xf32>
    %c0_99 = arith.constant 0 : index
    %c0_100 = arith.constant 0 : index
    %c0_101 = arith.constant 0 : index
    %226 = vector.load %arg22[%c0_99, %c0_100, %c0_101] : memref<2x1x32xf32, #tpu.memory_space<vmem>>, vector<1x1x32xf32>
    %227 = vector.shape_cast %226 : vector<1x1x32xf32> to vector<1x32xf32>
    %cst_102 = arith.constant dense<0.000000e+00> : vector<8xf32>
    %228 = vector.multi_reduction <add>, %223, %cst_102 [1] : vector<8x32xf32> to vector<8xf32>
    %229 = vector.shape_cast %228 : vector<8xf32> to vector<8x1xf32>
    %cst_103 = arith.constant 3.200000e+01 : f32
    %230 = vector.broadcast %cst_103 : f32 to vector<8x1xf32>
    %231 = arith.divf %229, %230 : vector<8x1xf32>
    %232 = vector.broadcast %231 : vector<8x1xf32> to vector<8x32xf32>
    %233 = arith.subf %223, %232 : vector<8x32xf32>
    %234 = arith.mulf %233, %233 : vector<8x32xf32>
    %cst_104 = arith.constant dense<0.000000e+00> : vector<8xf32>
    %235 = vector.multi_reduction <add>, %234, %cst_104 [1] : vector<8x32xf32> to vector<8xf32>
    %236 = vector.shape_cast %235 : vector<8xf32> to vector<8x1xf32>
    %cst_105 = arith.constant 3.200000e+01 : f32
    %237 = vector.broadcast %cst_105 : f32 to vector<8x1xf32>
    %238 = arith.divf %236, %237 : vector<8x1xf32>
    %cst_106 = arith.constant 9.99999974E-6 : f32
    %239 = vector.broadcast %cst_106 : f32 to vector<8x1xf32>
    %240 = arith.addf %238, %239 : vector<8x1xf32>
    %241 = math.rsqrt %240 : vector<8x1xf32>
    %242 = vector.broadcast %241 : vector<8x1xf32> to vector<8x32xf32>
    %243 = arith.mulf %233, %242 : vector<8x32xf32>
    %244 = vector.broadcast %225 : vector<1x32xf32> to vector<8x32xf32>
    %245 = arith.mulf %243, %244 : vector<8x32xf32>
    %246 = vector.broadcast %227 : vector<1x32xf32> to vector<8x32xf32>
    %247 = arith.addf %245, %246 : vector<8x32xf32>
    %c0_107 = arith.constant 0 : index
    %c0_108 = arith.constant 0 : index
    %c0_109 = arith.constant 0 : index
    %248 = vector.load %arg15[%c0_107, %c0_108, %c0_109] : memref<2x32x64xf32, #tpu.memory_space<vmem>>, vector<1x32x64xf32>
    %249 = vector.shape_cast %248 : vector<1x32x64xf32> to vector<32x64xf32>
    %c0_110 = arith.constant 0 : index
    %c0_111 = arith.constant 0 : index
    %c0_112 = arith.constant 0 : index
    %250 = vector.load %arg16[%c0_110, %c0_111, %c0_112] : memref<2x1x64xf32, #tpu.memory_space<vmem>>, vector<1x1x64xf32>
    %251 = vector.shape_cast %250 : vector<1x1x64xf32> to vector<1x64xf32>
    %cst_113 = arith.constant dense<0.000000e+00> : vector<8x64xf32>
    %252 = tpu.matmul %247, %249, %cst_113 {dimension_numbers = #tpu.dot_dimension_numbers<[1], [0], [0], [1], [0, 0, 1, 1], [], []>} : vector<8x32xf32>, vector<32x64xf32>, vector<8x64xf32> -> vector<8x64xf32>
    %253 = vector.broadcast %251 : vector<1x64xf32> to vector<8x64xf32>
    %254 = arith.addf %252, %253 : vector<8x64xf32>
    %cst_114 = arith.constant 0.000000e+00 : f32
    %255 = vector.broadcast %cst_114 : f32 to vector<8x64xf32>
    %256 = arith.maximumf %254, %255 : vector<8x64xf32>
    %c0_115 = arith.constant 0 : index
    %c0_116 = arith.constant 0 : index
    %c0_117 = arith.constant 0 : index
    %257 = vector.load %arg17[%c0_115, %c0_116, %c0_117] : memref<2x64x32xf32, #tpu.memory_space<vmem>>, vector<1x64x32xf32>
    %258 = vector.shape_cast %257 : vector<1x64x32xf32> to vector<64x32xf32>
    %c0_118 = arith.constant 0 : index
    %c0_119 = arith.constant 0 : index
    %c0_120 = arith.constant 0 : index
    %259 = vector.load %arg18[%c0_118, %c0_119, %c0_120] : memref<2x1x32xf32, #tpu.memory_space<vmem>>, vector<1x1x32xf32>
    %260 = vector.shape_cast %259 : vector<1x1x32xf32> to vector<1x32xf32>
    %cst_121 = arith.constant dense<0.000000e+00> : vector<8x32xf32>
    %261 = tpu.matmul %256, %258, %cst_121 {dimension_numbers = #tpu.dot_dimension_numbers<[1], [0], [0], [1], [0, 0, 1, 1], [], []>} : vector<8x64xf32>, vector<64x32xf32>, vector<8x32xf32> -> vector<8x32xf32>
    %262 = vector.broadcast %260 : vector<1x32xf32> to vector<8x32xf32>
    %263 = arith.addf %261, %262 : vector<8x32xf32>
    %264 = arith.addf %247, %263 : vector<8x32xf32>
    %c0_122 = arith.constant 0 : index
    %c0_123 = arith.constant 0 : index
    %c0_124 = arith.constant 0 : index
    %265 = vector.load %arg23[%c0_122, %c0_123, %c0_124] : memref<2x1x32xf32, #tpu.memory_space<vmem>>, vector<1x1x32xf32>
    %266 = vector.shape_cast %265 : vector<1x1x32xf32> to vector<1x32xf32>
    %c0_125 = arith.constant 0 : index
    %c0_126 = arith.constant 0 : index
    %c0_127 = arith.constant 0 : index
    %267 = vector.load %arg24[%c0_125, %c0_126, %c0_127] : memref<2x1x32xf32, #tpu.memory_space<vmem>>, vector<1x1x32xf32>
    %268 = vector.shape_cast %267 : vector<1x1x32xf32> to vector<1x32xf32>
    %cst_128 = arith.constant dense<0.000000e+00> : vector<8xf32>
    %269 = vector.multi_reduction <add>, %264, %cst_128 [1] : vector<8x32xf32> to vector<8xf32>
    %270 = vector.shape_cast %269 : vector<8xf32> to vector<8x1xf32>
    %cst_129 = arith.constant 3.200000e+01 : f32
    %271 = vector.broadcast %cst_129 : f32 to vector<8x1xf32>
    %272 = arith.divf %270, %271 : vector<8x1xf32>
    %273 = vector.broadcast %272 : vector<8x1xf32> to vector<8x32xf32>
    %274 = arith.subf %264, %273 : vector<8x32xf32>
    %275 = arith.mulf %274, %274 : vector<8x32xf32>
    %cst_130 = arith.constant dense<0.000000e+00> : vector<8xf32>
    %276 = vector.multi_reduction <add>, %275, %cst_130 [1] : vector<8x32xf32> to vector<8xf32>
    %277 = vector.shape_cast %276 : vector<8xf32> to vector<8x1xf32>
    %cst_131 = arith.constant 3.200000e+01 : f32
    %278 = vector.broadcast %cst_131 : f32 to vector<8x1xf32>
    %279 = arith.divf %277, %278 : vector<8x1xf32>
    %cst_132 = arith.constant 9.99999974E-6 : f32
    %280 = vector.broadcast %cst_132 : f32 to vector<8x1xf32>
    %281 = arith.addf %279, %280 : vector<8x1xf32>
    %282 = math.rsqrt %281 : vector<8x1xf32>
    %283 = vector.broadcast %282 : vector<8x1xf32> to vector<8x32xf32>
    %284 = arith.mulf %274, %283 : vector<8x32xf32>
    %285 = vector.broadcast %266 : vector<1x32xf32> to vector<8x32xf32>
    %286 = arith.mulf %284, %285 : vector<8x32xf32>
    %287 = vector.broadcast %268 : vector<1x32xf32> to vector<8x32xf32>
    %288 = arith.addf %286, %287 : vector<8x32xf32>
    %c1 = arith.constant 1 : index
    %c0_133 = arith.constant 0 : index
    %c0_134 = arith.constant 0 : index
    %289 = vector.load %arg5[%c1, %c0_133, %c0_134] : memref<2x32x96xf32, #tpu.memory_space<vmem>>, vector<1x32x96xf32>
    %290 = vector.shape_cast %289 : vector<1x32x96xf32> to vector<32x96xf32>
    %c1_135 = arith.constant 1 : index
    %c0_136 = arith.constant 0 : index
    %c0_137 = arith.constant 0 : index
    %291 = vector.load %arg6[%c1_135, %c0_136, %c0_137] : memref<2x1x96xf32, #tpu.memory_space<vmem>>, vector<1x1x96xf32>
    %292 = vector.shape_cast %291 : vector<1x1x96xf32> to vector<1x96xf32>
    %cst_138 = arith.constant dense<0.000000e+00> : vector<8x96xf32>
    %293 = tpu.matmul %288, %290, %cst_138 {dimension_numbers = #tpu.dot_dimension_numbers<[1], [0], [0], [1], [0, 0, 1, 1], [], []>} : vector<8x32xf32>, vector<32x96xf32>, vector<8x96xf32> -> vector<8x96xf32>
    %294 = vector.broadcast %292 : vector<1x96xf32> to vector<8x96xf32>
    %295 = arith.addf %293, %294 : vector<8x96xf32>
    %296 = vector.extract_strided_slice %295 {offsets = [0, 0], sizes = [8, 32], strides = [1, 1]} : vector<8x96xf32> to vector<8x32xf32>
    %297 = vector.extract_strided_slice %295 {offsets = [0, 32], sizes = [8, 32], strides = [1, 1]} : vector<8x96xf32> to vector<8x32xf32>
    %298 = vector.extract_strided_slice %295 {offsets = [0, 64], sizes = [8, 32], strides = [1, 1]} : vector<8x96xf32> to vector<8x32xf32>
    %299 = vector.extract_strided_slice %296 {offsets = [0, 0], sizes = [8, 8], strides = [1, 1]} : vector<8x32xf32> to vector<8x8xf32>
    %300 = vector.extract_strided_slice %297 {offsets = [0, 0], sizes = [8, 8], strides = [1, 1]} : vector<8x32xf32> to vector<8x8xf32>
    %301 = vector.extract_strided_slice %298 {offsets = [0, 0], sizes = [8, 8], strides = [1, 1]} : vector<8x32xf32> to vector<8x8xf32>
    %cst_139 = arith.constant dense<0.000000e+00> : vector<8x8xf32>
    %302 = tpu.matmul %299, %300, %cst_139 {dimension_numbers = #tpu.dot_dimension_numbers<[1], [1], [0], [0], [0, 0, 1, 0], [], []>} : vector<8x8xf32>, vector<8x8xf32>, vector<8x8xf32> -> vector<8x8xf32>
    %cst_140 = arith.constant 0.353553385 : f32
    %303 = vector.broadcast %cst_140 : f32 to vector<8x8xf32>
    %304 = arith.mulf %302, %303 : vector<8x8xf32>
    %305 = arith.addf %304, %5 : vector<8x8xf32>
    %cst_141 = arith.constant dense<0xFF800000> : vector<8xf32>
    %306 = vector.multi_reduction <maximumf>, %305, %cst_141 [1] : vector<8x8xf32> to vector<8xf32>
    %307 = vector.shape_cast %306 : vector<8xf32> to vector<8x1xf32>
    %308 = vector.broadcast %307 : vector<8x1xf32> to vector<8x8xf32>
    %309 = arith.subf %305, %308 : vector<8x8xf32>
    %310 = math.exp %309 : vector<8x8xf32>
    %cst_142 = arith.constant dense<0.000000e+00> : vector<8xf32>
    %311 = vector.multi_reduction <add>, %310, %cst_142 [1] : vector<8x8xf32> to vector<8xf32>
    %312 = vector.shape_cast %311 : vector<8xf32> to vector<8x1xf32>
    %313 = tpu.reciprocal %312 {approx = true} : vector<8x1xf32> -> vector<8x1xf32>
    %314 = vector.broadcast %313 : vector<8x1xf32> to vector<8x8xf32>
    %315 = arith.mulf %310, %314 : vector<8x8xf32>
    %cst_143 = arith.constant dense<0.000000e+00> : vector<8x8xf32>
    %316 = tpu.matmul %315, %301, %cst_143 {dimension_numbers = #tpu.dot_dimension_numbers<[1], [0], [0], [1], [0, 0, 1, 1], [], []>} : vector<8x8xf32>, vector<8x8xf32>, vector<8x8xf32> -> vector<8x8xf32>
    %317 = vector.extract_strided_slice %296 {offsets = [0, 8], sizes = [8, 8], strides = [1, 1]} : vector<8x32xf32> to vector<8x8xf32>
    %318 = vector.extract_strided_slice %297 {offsets = [0, 8], sizes = [8, 8], strides = [1, 1]} : vector<8x32xf32> to vector<8x8xf32>
    %319 = vector.extract_strided_slice %298 {offsets = [0, 8], sizes = [8, 8], strides = [1, 1]} : vector<8x32xf32> to vector<8x8xf32>
    %cst_144 = arith.constant dense<0.000000e+00> : vector<8x8xf32>
    %320 = tpu.matmul %317, %318, %cst_144 {dimension_numbers = #tpu.dot_dimension_numbers<[1], [1], [0], [0], [0, 0, 1, 0], [], []>} : vector<8x8xf32>, vector<8x8xf32>, vector<8x8xf32> -> vector<8x8xf32>
    %cst_145 = arith.constant 0.353553385 : f32
    %321 = vector.broadcast %cst_145 : f32 to vector<8x8xf32>
    %322 = arith.mulf %320, %321 : vector<8x8xf32>
    %323 = arith.addf %322, %5 : vector<8x8xf32>
    %cst_146 = arith.constant dense<0xFF800000> : vector<8xf32>
    %324 = vector.multi_reduction <maximumf>, %323, %cst_146 [1] : vector<8x8xf32> to vector<8xf32>
    %325 = vector.shape_cast %324 : vector<8xf32> to vector<8x1xf32>
    %326 = vector.broadcast %325 : vector<8x1xf32> to vector<8x8xf32>
    %327 = arith.subf %323, %326 : vector<8x8xf32>
    %328 = math.exp %327 : vector<8x8xf32>
    %cst_147 = arith.constant dense<0.000000e+00> : vector<8xf32>
    %329 = vector.multi_reduction <add>, %328, %cst_147 [1] : vector<8x8xf32> to vector<8xf32>
    %330 = vector.shape_cast %329 : vector<8xf32> to vector<8x1xf32>
    %331 = tpu.reciprocal %330 {approx = true} : vector<8x1xf32> -> vector<8x1xf32>
    %332 = vector.broadcast %331 : vector<8x1xf32> to vector<8x8xf32>
    %333 = arith.mulf %328, %332 : vector<8x8xf32>
    %cst_148 = arith.constant dense<0.000000e+00> : vector<8x8xf32>
    %334 = tpu.matmul %333, %319, %cst_148 {dimension_numbers = #tpu.dot_dimension_numbers<[1], [0], [0], [1], [0, 0, 1, 1], [], []>} : vector<8x8xf32>, vector<8x8xf32>, vector<8x8xf32> -> vector<8x8xf32>
    %335 = vector.extract_strided_slice %296 {offsets = [0, 16], sizes = [8, 8], strides = [1, 1]} : vector<8x32xf32> to vector<8x8xf32>
    %336 = vector.extract_strided_slice %297 {offsets = [0, 16], sizes = [8, 8], strides = [1, 1]} : vector<8x32xf32> to vector<8x8xf32>
    %337 = vector.extract_strided_slice %298 {offsets = [0, 16], sizes = [8, 8], strides = [1, 1]} : vector<8x32xf32> to vector<8x8xf32>
    %cst_149 = arith.constant dense<0.000000e+00> : vector<8x8xf32>
    %338 = tpu.matmul %335, %336, %cst_149 {dimension_numbers = #tpu.dot_dimension_numbers<[1], [1], [0], [0], [0, 0, 1, 0], [], []>} : vector<8x8xf32>, vector<8x8xf32>, vector<8x8xf32> -> vector<8x8xf32>
    %cst_150 = arith.constant 0.353553385 : f32
    %339 = vector.broadcast %cst_150 : f32 to vector<8x8xf32>
    %340 = arith.mulf %338, %339 : vector<8x8xf32>
    %341 = arith.addf %340, %5 : vector<8x8xf32>
    %cst_151 = arith.constant dense<0xFF800000> : vector<8xf32>
    %342 = vector.multi_reduction <maximumf>, %341, %cst_151 [1] : vector<8x8xf32> to vector<8xf32>
    %343 = vector.shape_cast %342 : vector<8xf32> to vector<8x1xf32>
    %344 = vector.broadcast %343 : vector<8x1xf32> to vector<8x8xf32>
    %345 = arith.subf %341, %344 : vector<8x8xf32>
    %346 = math.exp %345 : vector<8x8xf32>
    %cst_152 = arith.constant dense<0.000000e+00> : vector<8xf32>
    %347 = vector.multi_reduction <add>, %346, %cst_152 [1] : vector<8x8xf32> to vector<8xf32>
    %348 = vector.shape_cast %347 : vector<8xf32> to vector<8x1xf32>
    %349 = tpu.reciprocal %348 {approx = true} : vector<8x1xf32> -> vector<8x1xf32>
    %350 = vector.broadcast %349 : vector<8x1xf32> to vector<8x8xf32>
    %351 = arith.mulf %346, %350 : vector<8x8xf32>
    %cst_153 = arith.constant dense<0.000000e+00> : vector<8x8xf32>
    %352 = tpu.matmul %351, %337, %cst_153 {dimension_numbers = #tpu.dot_dimension_numbers<[1], [0], [0], [1], [0, 0, 1, 1], [], []>} : vector<8x8xf32>, vector<8x8xf32>, vector<8x8xf32> -> vector<8x8xf32>
    %353 = vector.extract_strided_slice %296 {offsets = [0, 24], sizes = [8, 8], strides = [1, 1]} : vector<8x32xf32> to vector<8x8xf32>
    %354 = vector.extract_strided_slice %297 {offsets = [0, 24], sizes = [8, 8], strides = [1, 1]} : vector<8x32xf32> to vector<8x8xf32>
    %355 = vector.extract_strided_slice %298 {offsets = [0, 24], sizes = [8, 8], strides = [1, 1]} : vector<8x32xf32> to vector<8x8xf32>
    %cst_154 = arith.constant dense<0.000000e+00> : vector<8x8xf32>
    %356 = tpu.matmul %353, %354, %cst_154 {dimension_numbers = #tpu.dot_dimension_numbers<[1], [1], [0], [0], [0, 0, 1, 0], [], []>} : vector<8x8xf32>, vector<8x8xf32>, vector<8x8xf32> -> vector<8x8xf32>
    %cst_155 = arith.constant 0.353553385 : f32
    %357 = vector.broadcast %cst_155 : f32 to vector<8x8xf32>
    %358 = arith.mulf %356, %357 : vector<8x8xf32>
    %359 = arith.addf %358, %5 : vector<8x8xf32>
    %cst_156 = arith.constant dense<0xFF800000> : vector<8xf32>
    %360 = vector.multi_reduction <maximumf>, %359, %cst_156 [1] : vector<8x8xf32> to vector<8xf32>
    %361 = vector.shape_cast %360 : vector<8xf32> to vector<8x1xf32>
    %362 = vector.broadcast %361 : vector<8x1xf32> to vector<8x8xf32>
    %363 = arith.subf %359, %362 : vector<8x8xf32>
    %364 = math.exp %363 : vector<8x8xf32>
    %cst_157 = arith.constant dense<0.000000e+00> : vector<8xf32>
    %365 = vector.multi_reduction <add>, %364, %cst_157 [1] : vector<8x8xf32> to vector<8xf32>
    %366 = vector.shape_cast %365 : vector<8xf32> to vector<8x1xf32>
    %367 = tpu.reciprocal %366 {approx = true} : vector<8x1xf32> -> vector<8x1xf32>
    %368 = vector.broadcast %367 : vector<8x1xf32> to vector<8x8xf32>
    %369 = arith.mulf %364, %368 : vector<8x8xf32>
    %cst_158 = arith.constant dense<0.000000e+00> : vector<8x8xf32>
    %370 = tpu.matmul %369, %355, %cst_158 {dimension_numbers = #tpu.dot_dimension_numbers<[1], [0], [0], [1], [0, 0, 1, 1], [], []>} : vector<8x8xf32>, vector<8x8xf32>, vector<8x8xf32> -> vector<8x8xf32>
    %371 = tpu.concatenate %316, %334, %352, %370 in 1 : vector<8x8xf32>, vector<8x8xf32>, vector<8x8xf32>, vector<8x8xf32> -> vector<8x32xf32>
    %c1_159 = arith.constant 1 : index
    %c0_160 = arith.constant 0 : index
    %c0_161 = arith.constant 0 : index
    %372 = vector.load %arg7[%c1_159, %c0_160, %c0_161] : memref<2x32x32xf32, #tpu.memory_space<vmem>>, vector<1x32x32xf32>
    %373 = vector.shape_cast %372 : vector<1x32x32xf32> to vector<32x32xf32>
    %c1_162 = arith.constant 1 : index
    %c0_163 = arith.constant 0 : index
    %c0_164 = arith.constant 0 : index
    %374 = vector.load %arg8[%c1_162, %c0_163, %c0_164] : memref<2x1x32xf32, #tpu.memory_space<vmem>>, vector<1x1x32xf32>
    %375 = vector.shape_cast %374 : vector<1x1x32xf32> to vector<1x32xf32>
    %cst_165 = arith.constant dense<0.000000e+00> : vector<8x32xf32>
    %376 = tpu.matmul %371, %373, %cst_165 {dimension_numbers = #tpu.dot_dimension_numbers<[1], [0], [0], [1], [0, 0, 1, 1], [], []>} : vector<8x32xf32>, vector<32x32xf32>, vector<8x32xf32> -> vector<8x32xf32>
    %377 = vector.broadcast %375 : vector<1x32xf32> to vector<8x32xf32>
    %378 = arith.addf %376, %377 : vector<8x32xf32>
    %379 = arith.addf %288, %378 : vector<8x32xf32>
    %c1_166 = arith.constant 1 : index
    %c0_167 = arith.constant 0 : index
    %c0_168 = arith.constant 0 : index
    %380 = vector.load %arg19[%c1_166, %c0_167, %c0_168] : memref<2x1x32xf32, #tpu.memory_space<vmem>>, vector<1x1x32xf32>
    %381 = vector.shape_cast %380 : vector<1x1x32xf32> to vector<1x32xf32>
    %c1_169 = arith.constant 1 : index
    %c0_170 = arith.constant 0 : index
    %c0_171 = arith.constant 0 : index
    %382 = vector.load %arg20[%c1_169, %c0_170, %c0_171] : memref<2x1x32xf32, #tpu.memory_space<vmem>>, vector<1x1x32xf32>
    %383 = vector.shape_cast %382 : vector<1x1x32xf32> to vector<1x32xf32>
    %cst_172 = arith.constant dense<0.000000e+00> : vector<8xf32>
    %384 = vector.multi_reduction <add>, %379, %cst_172 [1] : vector<8x32xf32> to vector<8xf32>
    %385 = vector.shape_cast %384 : vector<8xf32> to vector<8x1xf32>
    %cst_173 = arith.constant 3.200000e+01 : f32
    %386 = vector.broadcast %cst_173 : f32 to vector<8x1xf32>
    %387 = arith.divf %385, %386 : vector<8x1xf32>
    %388 = vector.broadcast %387 : vector<8x1xf32> to vector<8x32xf32>
    %389 = arith.subf %379, %388 : vector<8x32xf32>
    %390 = arith.mulf %389, %389 : vector<8x32xf32>
    %cst_174 = arith.constant dense<0.000000e+00> : vector<8xf32>
    %391 = vector.multi_reduction <add>, %390, %cst_174 [1] : vector<8x32xf32> to vector<8xf32>
    %392 = vector.shape_cast %391 : vector<8xf32> to vector<8x1xf32>
    %cst_175 = arith.constant 3.200000e+01 : f32
    %393 = vector.broadcast %cst_175 : f32 to vector<8x1xf32>
    %394 = arith.divf %392, %393 : vector<8x1xf32>
    %cst_176 = arith.constant 9.99999974E-6 : f32
    %395 = vector.broadcast %cst_176 : f32 to vector<8x1xf32>
    %396 = arith.addf %394, %395 : vector<8x1xf32>
    %397 = math.rsqrt %396 : vector<8x1xf32>
    %398 = vector.broadcast %397 : vector<8x1xf32> to vector<8x32xf32>
    %399 = arith.mulf %389, %398 : vector<8x32xf32>
    %400 = vector.broadcast %381 : vector<1x32xf32> to vector<8x32xf32>
    %401 = arith.mulf %399, %400 : vector<8x32xf32>
    %402 = vector.broadcast %383 : vector<1x32xf32> to vector<8x32xf32>
    %403 = arith.addf %401, %402 : vector<8x32xf32>
    %c1_177 = arith.constant 1 : index
    %c0_178 = arith.constant 0 : index
    %c0_179 = arith.constant 0 : index
    %404 = vector.load %arg9[%c1_177, %c0_178, %c0_179] : memref<2x32x32xf32, #tpu.memory_space<vmem>>, vector<1x32x32xf32>
    %405 = vector.shape_cast %404 : vector<1x32x32xf32> to vector<32x32xf32>
    %c1_180 = arith.constant 1 : index
    %c0_181 = arith.constant 0 : index
    %c0_182 = arith.constant 0 : index
    %406 = vector.load %arg10[%c1_180, %c0_181, %c0_182] : memref<2x1x32xf32, #tpu.memory_space<vmem>>, vector<1x1x32xf32>
    %407 = vector.shape_cast %406 : vector<1x1x32xf32> to vector<1x32xf32>
    %cst_183 = arith.constant dense<0.000000e+00> : vector<8x32xf32>
    %408 = tpu.matmul %403, %405, %cst_183 {dimension_numbers = #tpu.dot_dimension_numbers<[1], [0], [0], [1], [0, 0, 1, 1], [], []>} : vector<8x32xf32>, vector<32x32xf32>, vector<8x32xf32> -> vector<8x32xf32>
    %409 = vector.broadcast %407 : vector<1x32xf32> to vector<8x32xf32>
    %410 = arith.addf %408, %409 : vector<8x32xf32>
    %c1_184 = arith.constant 1 : index
    %c0_185 = arith.constant 0 : index
    %c0_186 = arith.constant 0 : index
    %411 = vector.load %arg11[%c1_184, %c0_185, %c0_186] : memref<2x32x64xf32, #tpu.memory_space<vmem>>, vector<1x32x64xf32>
    %412 = vector.shape_cast %411 : vector<1x32x64xf32> to vector<32x64xf32>
    %c1_187 = arith.constant 1 : index
    %c0_188 = arith.constant 0 : index
    %c0_189 = arith.constant 0 : index
    %413 = vector.load %arg12[%c1_187, %c0_188, %c0_189] : memref<2x1x64xf32, #tpu.memory_space<vmem>>, vector<1x1x64xf32>
    %414 = vector.shape_cast %413 : vector<1x1x64xf32> to vector<1x64xf32>
    %cst_190 = arith.constant dense<0.000000e+00> : vector<8x64xf32>
    %415 = tpu.matmul %3, %412, %cst_190 {dimension_numbers = #tpu.dot_dimension_numbers<[1], [0], [0], [1], [0, 0, 1, 1], [], []>} : vector<8x32xf32>, vector<32x64xf32>, vector<8x64xf32> -> vector<8x64xf32>
    %416 = vector.broadcast %414 : vector<1x64xf32> to vector<8x64xf32>
    %417 = arith.addf %415, %416 : vector<8x64xf32>
    %418 = vector.extract_strided_slice %417 {offsets = [0, 0], sizes = [8, 32], strides = [1, 1]} : vector<8x64xf32> to vector<8x32xf32>
    %419 = vector.extract_strided_slice %417 {offsets = [0, 32], sizes = [8, 32], strides = [1, 1]} : vector<8x64xf32> to vector<8x32xf32>
    %420 = vector.extract_strided_slice %410 {offsets = [0, 0], sizes = [8, 8], strides = [1, 1]} : vector<8x32xf32> to vector<8x8xf32>
    %421 = vector.extract_strided_slice %418 {offsets = [0, 0], sizes = [8, 8], strides = [1, 1]} : vector<8x32xf32> to vector<8x8xf32>
    %422 = vector.extract_strided_slice %419 {offsets = [0, 0], sizes = [8, 8], strides = [1, 1]} : vector<8x32xf32> to vector<8x8xf32>
    %cst_191 = arith.constant dense<0.000000e+00> : vector<8x8xf32>
    %423 = tpu.matmul %420, %421, %cst_191 {dimension_numbers = #tpu.dot_dimension_numbers<[1], [1], [0], [0], [0, 0, 1, 0], [], []>} : vector<8x8xf32>, vector<8x8xf32>, vector<8x8xf32> -> vector<8x8xf32>
    %cst_192 = arith.constant 0.353553385 : f32
    %424 = vector.broadcast %cst_192 : f32 to vector<8x8xf32>
    %425 = arith.mulf %423, %424 : vector<8x8xf32>
    %426 = vector.broadcast %7 : vector<1x8xf32> to vector<8x8xf32>
    %427 = arith.addf %425, %426 : vector<8x8xf32>
    %cst_193 = arith.constant dense<0xFF800000> : vector<8xf32>
    %428 = vector.multi_reduction <maximumf>, %427, %cst_193 [1] : vector<8x8xf32> to vector<8xf32>
    %429 = vector.shape_cast %428 : vector<8xf32> to vector<8x1xf32>
    %430 = vector.broadcast %429 : vector<8x1xf32> to vector<8x8xf32>
    %431 = arith.subf %427, %430 : vector<8x8xf32>
    %432 = math.exp %431 : vector<8x8xf32>
    %cst_194 = arith.constant dense<0.000000e+00> : vector<8xf32>
    %433 = vector.multi_reduction <add>, %432, %cst_194 [1] : vector<8x8xf32> to vector<8xf32>
    %434 = vector.shape_cast %433 : vector<8xf32> to vector<8x1xf32>
    %435 = tpu.reciprocal %434 {approx = true} : vector<8x1xf32> -> vector<8x1xf32>
    %436 = vector.broadcast %435 : vector<8x1xf32> to vector<8x8xf32>
    %437 = arith.mulf %432, %436 : vector<8x8xf32>
    %cst_195 = arith.constant dense<0.000000e+00> : vector<8x8xf32>
    %438 = tpu.matmul %437, %422, %cst_195 {dimension_numbers = #tpu.dot_dimension_numbers<[1], [0], [0], [1], [0, 0, 1, 1], [], []>} : vector<8x8xf32>, vector<8x8xf32>, vector<8x8xf32> -> vector<8x8xf32>
    %439 = vector.extract_strided_slice %410 {offsets = [0, 8], sizes = [8, 8], strides = [1, 1]} : vector<8x32xf32> to vector<8x8xf32>
    %440 = vector.extract_strided_slice %418 {offsets = [0, 8], sizes = [8, 8], strides = [1, 1]} : vector<8x32xf32> to vector<8x8xf32>
    %441 = vector.extract_strided_slice %419 {offsets = [0, 8], sizes = [8, 8], strides = [1, 1]} : vector<8x32xf32> to vector<8x8xf32>
    %cst_196 = arith.constant dense<0.000000e+00> : vector<8x8xf32>
    %442 = tpu.matmul %439, %440, %cst_196 {dimension_numbers = #tpu.dot_dimension_numbers<[1], [1], [0], [0], [0, 0, 1, 0], [], []>} : vector<8x8xf32>, vector<8x8xf32>, vector<8x8xf32> -> vector<8x8xf32>
    %cst_197 = arith.constant 0.353553385 : f32
    %443 = vector.broadcast %cst_197 : f32 to vector<8x8xf32>
    %444 = arith.mulf %442, %443 : vector<8x8xf32>
    %445 = vector.broadcast %7 : vector<1x8xf32> to vector<8x8xf32>
    %446 = arith.addf %444, %445 : vector<8x8xf32>
    %cst_198 = arith.constant dense<0xFF800000> : vector<8xf32>
    %447 = vector.multi_reduction <maximumf>, %446, %cst_198 [1] : vector<8x8xf32> to vector<8xf32>
    %448 = vector.shape_cast %447 : vector<8xf32> to vector<8x1xf32>
    %449 = vector.broadcast %448 : vector<8x1xf32> to vector<8x8xf32>
    %450 = arith.subf %446, %449 : vector<8x8xf32>
    %451 = math.exp %450 : vector<8x8xf32>
    %cst_199 = arith.constant dense<0.000000e+00> : vector<8xf32>
    %452 = vector.multi_reduction <add>, %451, %cst_199 [1] : vector<8x8xf32> to vector<8xf32>
    %453 = vector.shape_cast %452 : vector<8xf32> to vector<8x1xf32>
    %454 = tpu.reciprocal %453 {approx = true} : vector<8x1xf32> -> vector<8x1xf32>
    %455 = vector.broadcast %454 : vector<8x1xf32> to vector<8x8xf32>
    %456 = arith.mulf %451, %455 : vector<8x8xf32>
    %cst_200 = arith.constant dense<0.000000e+00> : vector<8x8xf32>
    %457 = tpu.matmul %456, %441, %cst_200 {dimension_numbers = #tpu.dot_dimension_numbers<[1], [0], [0], [1], [0, 0, 1, 1], [], []>} : vector<8x8xf32>, vector<8x8xf32>, vector<8x8xf32> -> vector<8x8xf32>
    %458 = vector.extract_strided_slice %410 {offsets = [0, 16], sizes = [8, 8], strides = [1, 1]} : vector<8x32xf32> to vector<8x8xf32>
    %459 = vector.extract_strided_slice %418 {offsets = [0, 16], sizes = [8, 8], strides = [1, 1]} : vector<8x32xf32> to vector<8x8xf32>
    %460 = vector.extract_strided_slice %419 {offsets = [0, 16], sizes = [8, 8], strides = [1, 1]} : vector<8x32xf32> to vector<8x8xf32>
    %cst_201 = arith.constant dense<0.000000e+00> : vector<8x8xf32>
    %461 = tpu.matmul %458, %459, %cst_201 {dimension_numbers = #tpu.dot_dimension_numbers<[1], [1], [0], [0], [0, 0, 1, 0], [], []>} : vector<8x8xf32>, vector<8x8xf32>, vector<8x8xf32> -> vector<8x8xf32>
    %cst_202 = arith.constant 0.353553385 : f32
    %462 = vector.broadcast %cst_202 : f32 to vector<8x8xf32>
    %463 = arith.mulf %461, %462 : vector<8x8xf32>
    %464 = vector.broadcast %7 : vector<1x8xf32> to vector<8x8xf32>
    %465 = arith.addf %463, %464 : vector<8x8xf32>
    %cst_203 = arith.constant dense<0xFF800000> : vector<8xf32>
    %466 = vector.multi_reduction <maximumf>, %465, %cst_203 [1] : vector<8x8xf32> to vector<8xf32>
    %467 = vector.shape_cast %466 : vector<8xf32> to vector<8x1xf32>
    %468 = vector.broadcast %467 : vector<8x1xf32> to vector<8x8xf32>
    %469 = arith.subf %465, %468 : vector<8x8xf32>
    %470 = math.exp %469 : vector<8x8xf32>
    %cst_204 = arith.constant dense<0.000000e+00> : vector<8xf32>
    %471 = vector.multi_reduction <add>, %470, %cst_204 [1] : vector<8x8xf32> to vector<8xf32>
    %472 = vector.shape_cast %471 : vector<8xf32> to vector<8x1xf32>
    %473 = tpu.reciprocal %472 {approx = true} : vector<8x1xf32> -> vector<8x1xf32>
    %474 = vector.broadcast %473 : vector<8x1xf32> to vector<8x8xf32>
    %475 = arith.mulf %470, %474 : vector<8x8xf32>
    %cst_205 = arith.constant dense<0.000000e+00> : vector<8x8xf32>
    %476 = tpu.matmul %475, %460, %cst_205 {dimension_numbers = #tpu.dot_dimension_numbers<[1], [0], [0], [1], [0, 0, 1, 1], [], []>} : vector<8x8xf32>, vector<8x8xf32>, vector<8x8xf32> -> vector<8x8xf32>
    %477 = vector.extract_strided_slice %410 {offsets = [0, 24], sizes = [8, 8], strides = [1, 1]} : vector<8x32xf32> to vector<8x8xf32>
    %478 = vector.extract_strided_slice %418 {offsets = [0, 24], sizes = [8, 8], strides = [1, 1]} : vector<8x32xf32> to vector<8x8xf32>
    %479 = vector.extract_strided_slice %419 {offsets = [0, 24], sizes = [8, 8], strides = [1, 1]} : vector<8x32xf32> to vector<8x8xf32>
    %cst_206 = arith.constant dense<0.000000e+00> : vector<8x8xf32>
    %480 = tpu.matmul %477, %478, %cst_206 {dimension_numbers = #tpu.dot_dimension_numbers<[1], [1], [0], [0], [0, 0, 1, 0], [], []>} : vector<8x8xf32>, vector<8x8xf32>, vector<8x8xf32> -> vector<8x8xf32>
    %cst_207 = arith.constant 0.353553385 : f32
    %481 = vector.broadcast %cst_207 : f32 to vector<8x8xf32>
    %482 = arith.mulf %480, %481 : vector<8x8xf32>
    %483 = vector.broadcast %7 : vector<1x8xf32> to vector<8x8xf32>
    %484 = arith.addf %482, %483 : vector<8x8xf32>
    %cst_208 = arith.constant dense<0xFF800000> : vector<8xf32>
    %485 = vector.multi_reduction <maximumf>, %484, %cst_208 [1] : vector<8x8xf32> to vector<8xf32>
    %486 = vector.shape_cast %485 : vector<8xf32> to vector<8x1xf32>
    %487 = vector.broadcast %486 : vector<8x1xf32> to vector<8x8xf32>
    %488 = arith.subf %484, %487 : vector<8x8xf32>
    %489 = math.exp %488 : vector<8x8xf32>
    %cst_209 = arith.constant dense<0.000000e+00> : vector<8xf32>
    %490 = vector.multi_reduction <add>, %489, %cst_209 [1] : vector<8x8xf32> to vector<8xf32>
    %491 = vector.shape_cast %490 : vector<8xf32> to vector<8x1xf32>
    %492 = tpu.reciprocal %491 {approx = true} : vector<8x1xf32> -> vector<8x1xf32>
    %493 = vector.broadcast %492 : vector<8x1xf32> to vector<8x8xf32>
    %494 = arith.mulf %489, %493 : vector<8x8xf32>
    %cst_210 = arith.constant dense<0.000000e+00> : vector<8x8xf32>
    %495 = tpu.matmul %494, %479, %cst_210 {dimension_numbers = #tpu.dot_dimension_numbers<[1], [0], [0], [1], [0, 0, 1, 1], [], []>} : vector<8x8xf32>, vector<8x8xf32>, vector<8x8xf32> -> vector<8x8xf32>
    %496 = tpu.concatenate %438, %457, %476, %495 in 1 : vector<8x8xf32>, vector<8x8xf32>, vector<8x8xf32>, vector<8x8xf32> -> vector<8x32xf32>
    %c1_211 = arith.constant 1 : index
    %c0_212 = arith.constant 0 : index
    %c0_213 = arith.constant 0 : index
    %497 = vector.load %arg13[%c1_211, %c0_212, %c0_213] : memref<2x32x32xf32, #tpu.memory_space<vmem>>, vector<1x32x32xf32>
    %498 = vector.shape_cast %497 : vector<1x32x32xf32> to vector<32x32xf32>
    %c1_214 = arith.constant 1 : index
    %c0_215 = arith.constant 0 : index
    %c0_216 = arith.constant 0 : index
    %499 = vector.load %arg14[%c1_214, %c0_215, %c0_216] : memref<2x1x32xf32, #tpu.memory_space<vmem>>, vector<1x1x32xf32>
    %500 = vector.shape_cast %499 : vector<1x1x32xf32> to vector<1x32xf32>
    %cst_217 = arith.constant dense<0.000000e+00> : vector<8x32xf32>
    %501 = tpu.matmul %496, %498, %cst_217 {dimension_numbers = #tpu.dot_dimension_numbers<[1], [0], [0], [1], [0, 0, 1, 1], [], []>} : vector<8x32xf32>, vector<32x32xf32>, vector<8x32xf32> -> vector<8x32xf32>
    %502 = vector.broadcast %500 : vector<1x32xf32> to vector<8x32xf32>
    %503 = arith.addf %501, %502 : vector<8x32xf32>
    %504 = arith.addf %403, %503 : vector<8x32xf32>
    %c1_218 = arith.constant 1 : index
    %c0_219 = arith.constant 0 : index
    %c0_220 = arith.constant 0 : index
    %505 = vector.load %arg21[%c1_218, %c0_219, %c0_220] : memref<2x1x32xf32, #tpu.memory_space<vmem>>, vector<1x1x32xf32>
    %506 = vector.shape_cast %505 : vector<1x1x32xf32> to vector<1x32xf32>
    %c1_221 = arith.constant 1 : index
    %c0_222 = arith.constant 0 : index
    %c0_223 = arith.constant 0 : index
    %507 = vector.load %arg22[%c1_221, %c0_222, %c0_223] : memref<2x1x32xf32, #tpu.memory_space<vmem>>, vector<1x1x32xf32>
    %508 = vector.shape_cast %507 : vector<1x1x32xf32> to vector<1x32xf32>
    %cst_224 = arith.constant dense<0.000000e+00> : vector<8xf32>
    %509 = vector.multi_reduction <add>, %504, %cst_224 [1] : vector<8x32xf32> to vector<8xf32>
    %510 = vector.shape_cast %509 : vector<8xf32> to vector<8x1xf32>
    %cst_225 = arith.constant 3.200000e+01 : f32
    %511 = vector.broadcast %cst_225 : f32 to vector<8x1xf32>
    %512 = arith.divf %510, %511 : vector<8x1xf32>
    %513 = vector.broadcast %512 : vector<8x1xf32> to vector<8x32xf32>
    %514 = arith.subf %504, %513 : vector<8x32xf32>
    %515 = arith.mulf %514, %514 : vector<8x32xf32>
    %cst_226 = arith.constant dense<0.000000e+00> : vector<8xf32>
    %516 = vector.multi_reduction <add>, %515, %cst_226 [1] : vector<8x32xf32> to vector<8xf32>
    %517 = vector.shape_cast %516 : vector<8xf32> to vector<8x1xf32>
    %cst_227 = arith.constant 3.200000e+01 : f32
    %518 = vector.broadcast %cst_227 : f32 to vector<8x1xf32>
    %519 = arith.divf %517, %518 : vector<8x1xf32>
    %cst_228 = arith.constant 9.99999974E-6 : f32
    %520 = vector.broadcast %cst_228 : f32 to vector<8x1xf32>
    %521 = arith.addf %519, %520 : vector<8x1xf32>
    %522 = math.rsqrt %521 : vector<8x1xf32>
    %523 = vector.broadcast %522 : vector<8x1xf32> to vector<8x32xf32>
    %524 = arith.mulf %514, %523 : vector<8x32xf32>
    %525 = vector.broadcast %506 : vector<1x32xf32> to vector<8x32xf32>
    %526 = arith.mulf %524, %525 : vector<8x32xf32>
    %527 = vector.broadcast %508 : vector<1x32xf32> to vector<8x32xf32>
    %528 = arith.addf %526, %527 : vector<8x32xf32>
    %c1_229 = arith.constant 1 : index
    %c0_230 = arith.constant 0 : index
    %c0_231 = arith.constant 0 : index
    %529 = vector.load %arg15[%c1_229, %c0_230, %c0_231] : memref<2x32x64xf32, #tpu.memory_space<vmem>>, vector<1x32x64xf32>
    %530 = vector.shape_cast %529 : vector<1x32x64xf32> to vector<32x64xf32>
    %c1_232 = arith.constant 1 : index
    %c0_233 = arith.constant 0 : index
    %c0_234 = arith.constant 0 : index
    %531 = vector.load %arg16[%c1_232, %c0_233, %c0_234] : memref<2x1x64xf32, #tpu.memory_space<vmem>>, vector<1x1x64xf32>
    %532 = vector.shape_cast %531 : vector<1x1x64xf32> to vector<1x64xf32>
    %cst_235 = arith.constant dense<0.000000e+00> : vector<8x64xf32>
    %533 = tpu.matmul %528, %530, %cst_235 {dimension_numbers = #tpu.dot_dimension_numbers<[1], [0], [0], [1], [0, 0, 1, 1], [], []>} : vector<8x32xf32>, vector<32x64xf32>, vector<8x64xf32> -> vector<8x64xf32>
    %534 = vector.broadcast %532 : vector<1x64xf32> to vector<8x64xf32>
    %535 = arith.addf %533, %534 : vector<8x64xf32>
    %cst_236 = arith.constant 0.000000e+00 : f32
    %536 = vector.broadcast %cst_236 : f32 to vector<8x64xf32>
    %537 = arith.maximumf %535, %536 : vector<8x64xf32>
    %c1_237 = arith.constant 1 : index
    %c0_238 = arith.constant 0 : index
    %c0_239 = arith.constant 0 : index
    %538 = vector.load %arg17[%c1_237, %c0_238, %c0_239] : memref<2x64x32xf32, #tpu.memory_space<vmem>>, vector<1x64x32xf32>
    %539 = vector.shape_cast %538 : vector<1x64x32xf32> to vector<64x32xf32>
    %c1_240 = arith.constant 1 : index
    %c0_241 = arith.constant 0 : index
    %c0_242 = arith.constant 0 : index
    %540 = vector.load %arg18[%c1_240, %c0_241, %c0_242] : memref<2x1x32xf32, #tpu.memory_space<vmem>>, vector<1x1x32xf32>
    %541 = vector.shape_cast %540 : vector<1x1x32xf32> to vector<1x32xf32>
    %cst_243 = arith.constant dense<0.000000e+00> : vector<8x32xf32>
    %542 = tpu.matmul %537, %539, %cst_243 {dimension_numbers = #tpu.dot_dimension_numbers<[1], [0], [0], [1], [0, 0, 1, 1], [], []>} : vector<8x64xf32>, vector<64x32xf32>, vector<8x32xf32> -> vector<8x32xf32>
    %543 = vector.broadcast %541 : vector<1x32xf32> to vector<8x32xf32>
    %544 = arith.addf %542, %543 : vector<8x32xf32>
    %545 = arith.addf %528, %544 : vector<8x32xf32>
    %c1_244 = arith.constant 1 : index
    %c0_245 = arith.constant 0 : index
    %c0_246 = arith.constant 0 : index
    %546 = vector.load %arg23[%c1_244, %c0_245, %c0_246] : memref<2x1x32xf32, #tpu.memory_space<vmem>>, vector<1x1x32xf32>
    %547 = vector.shape_cast %546 : vector<1x1x32xf32> to vector<1x32xf32>
    %c1_247 = arith.constant 1 : index
    %c0_248 = arith.constant 0 : index
    %c0_249 = arith.constant 0 : index
    %548 = vector.load %arg24[%c1_247, %c0_248, %c0_249] : memref<2x1x32xf32, #tpu.memory_space<vmem>>, vector<1x1x32xf32>
    %549 = vector.shape_cast %548 : vector<1x1x32xf32> to vector<1x32xf32>
    %cst_250 = arith.constant dense<0.000000e+00> : vector<8xf32>
    %550 = vector.multi_reduction <add>, %545, %cst_250 [1] : vector<8x32xf32> to vector<8xf32>
    %551 = vector.shape_cast %550 : vector<8xf32> to vector<8x1xf32>
    %cst_251 = arith.constant 3.200000e+01 : f32
    %552 = vector.broadcast %cst_251 : f32 to vector<8x1xf32>
    %553 = arith.divf %551, %552 : vector<8x1xf32>
    %554 = vector.broadcast %553 : vector<8x1xf32> to vector<8x32xf32>
    %555 = arith.subf %545, %554 : vector<8x32xf32>
    %556 = arith.mulf %555, %555 : vector<8x32xf32>
    %cst_252 = arith.constant dense<0.000000e+00> : vector<8xf32>
    %557 = vector.multi_reduction <add>, %556, %cst_252 [1] : vector<8x32xf32> to vector<8xf32>
    %558 = vector.shape_cast %557 : vector<8xf32> to vector<8x1xf32>
    %cst_253 = arith.constant 3.200000e+01 : f32
    %559 = vector.broadcast %cst_253 : f32 to vector<8x1xf32>
    %560 = arith.divf %558, %559 : vector<8x1xf32>
    %cst_254 = arith.constant 9.99999974E-6 : f32
    %561 = vector.broadcast %cst_254 : f32 to vector<8x1xf32>
    %562 = arith.addf %560, %561 : vector<8x1xf32>
    %563 = math.rsqrt %562 : vector<8x1xf32>
    %564 = vector.broadcast %563 : vector<8x1xf32> to vector<8x32xf32>
    %565 = arith.mulf %555, %564 : vector<8x32xf32>
    %566 = vector.broadcast %547 : vector<1x32xf32> to vector<8x32xf32>
    %567 = arith.mulf %565, %566 : vector<8x32xf32>
    %568 = vector.broadcast %549 : vector<1x32xf32> to vector<8x32xf32>
    %569 = arith.addf %567, %568 : vector<8x32xf32>
    %c0_255 = arith.constant 0 : index
    %c0_256 = arith.constant 0 : index
    %570 = vector.load %arg25[%c0_255, %c0_256] : memref<32x128xf32, #tpu.memory_space<vmem>>, vector<32x128xf32>
    %c0_257 = arith.constant 0 : index
    %c0_258 = arith.constant 0 : index
    %571 = vector.load %arg26[%c0_257, %c0_258] : memref<1x128xf32, #tpu.memory_space<vmem>>, vector<1x128xf32>
    %cst_259 = arith.constant dense<0.000000e+00> : vector<8x128xf32>
    %572 = tpu.matmul %569, %570, %cst_259 {dimension_numbers = #tpu.dot_dimension_numbers<[1], [0], [0], [1], [0, 0, 1, 1], [], []>} : vector<8x32xf32>, vector<32x128xf32>, vector<8x128xf32> -> vector<8x128xf32>
    %573 = vector.broadcast %571 : vector<1x128xf32> to vector<8x128xf32>
    %574 = arith.addf %572, %573 : vector<8x128xf32>
    %c0_260 = arith.constant 0 : index
    %c0_261 = arith.constant 0 : index
    %c0_262 = arith.constant 0 : index
    %575 = vector.load %arg27[%c0_260, %c0_261, %c0_262] : memref<1x8x128xf32, #tpu.memory_space<vmem>>, vector<1x8x128xf32>
    %576 = vector.shape_cast %575 : vector<1x8x128xf32> to vector<8x128xf32>
    %577 = vector.shape_cast %574 : vector<8x128xf32> to vector<1x8x128xf32>
    tpu.vector_store %arg27[%c0_260, %c0_261, %c0_262], %577 {strides = array<i32>} : memref<1x8x128xf32, #tpu.memory_space<vmem>>, vector<1x8x128xf32>,
    return
  }
  func.func @transform_0(%arg0: i32) -> (i32, i32, i32) {
    %c0_i32 = arith.constant 0 : i32
    %c0_i32_0 = arith.constant 0 : i32
    %c0_i32_1 = arith.constant 0 : i32
    return %arg0, %c0_i32, %c0_i32_0 : i32, i32, i32
  }
  func.func @transform_1(%arg0: i32) -> (i32, i32, i32) {
    %c0_i32 = arith.constant 0 : i32
    %c0_i32_0 = arith.constant 0 : i32
    %c0_i32_1 = arith.constant 0 : i32
    return %arg0, %c0_i32, %c0_i32_0 : i32, i32, i32
  }
  func.func @transform_2(%arg0: i32) -> (i32, i32, i32) {
    %c0_i32 = arith.constant 0 : i32
    %c0_i32_0 = arith.constant 0 : i32
    %c0_i32_1 = arith.constant 0 : i32
    return %arg0, %c0_i32, %c0_i32_0 : i32, i32, i32
  }
  func.func @transform_3(%arg0: i32) -> (i32, i32, i32) {
    %c0_i32 = arith.constant 0 : i32
    %c0_i32_0 = arith.constant 0 : i32
    %c0_i32_1 = arith.constant 0 : i32
    return %arg0, %c0_i32, %c0_i32_0 : i32, i32, i32
  }
  func.func @transform_4(%arg0: i32) -> (i32, i32, i32) {
    %c0_i32 = arith.constant 0 : i32
    %c0_i32_0 = arith.constant 0 : i32
    %c0_i32_1 = arith.constant 0 : i32
    %c0_i32_2 = arith.constant 0 : i32
    return %c0_i32, %c0_i32_0, %c0_i32_1 : i32, i32, i32
  }
  func.func @transform_5(%arg0: i32) -> (i32, i32, i32) {
    %c0_i32 = arith.constant 0 : i32
    %c0_i32_0 = arith.constant 0 : i32
    %c0_i32_1 = arith.constant 0 : i32
    %c0_i32_2 = arith.constant 0 : i32
    return %c0_i32, %c0_i32_0, %c0_i32_1 : i32, i32, i32
  }
  func.func @transform_6(%arg0: i32) -> (i32, i32, i32) {
    %c0_i32 = arith.constant 0 : i32
    %c0_i32_0 = arith.constant 0 : i32
    %c0_i32_1 = arith.constant 0 : i32
    %c0_i32_2 = arith.constant 0 : i32
    return %c0_i32, %c0_i32_0, %c0_i32_1 : i32, i32, i32
  }
  func.func @transform_7(%arg0: i32) -> (i32, i32, i32) {
    %c0_i32 = arith.constant 0 : i32
    %c0_i32_0 = arith.constant 0 : i32
    %c0_i32_1 = arith.constant 0 : i32
    %c0_i32_2 = arith.constant 0 : i32
    return %c0_i32, %c0_i32_0, %c0_i32_1 : i32, i32, i32
  }
  func.func @transform_8(%arg0: i32) -> (i32, i32, i32) {
    %c0_i32 = arith.constant 0 : i32
    %c0_i32_0 = arith.constant 0 : i32
    %c0_i32_1 = arith.constant 0 : i32
    %c0_i32_2 = arith.constant 0 : i32
    return %c0_i32, %c0_i32_0, %c0_i32_1 : i32, i32, i32
  }
  func.func @transform_9(%arg0: i32) -> (i32, i32, i32) {
    %c0_i32 = arith.constant 0 : i32
    %c0_i32_0 = arith.constant 0 : i32
    %c0_i32_1 = arith.constant 0 : i32
    %c0_i32_2 = arith.constant 0 : i32
    return %c0_i32, %c0_i32_0, %c0_i32_1 : i32, i32, i32
  }
  func.func @transform_10(%arg0: i32) -> (i32, i32, i32) {
    %c0_i32 = arith.constant 0 : i32
    %c0_i32_0 = arith.constant 0 : i32
    %c0_i32_1 = arith.constant 0 : i32
    %c0_i32_2 = arith.constant 0 : i32
    return %c0_i32, %c0_i32_0, %c0_i32_1 : i32, i32, i32
  }
  func.func @transform_11(%arg0: i32) -> (i32, i32, i32) {
    %c0_i32 = arith.constant 0 : i32
    %c0_i32_0 = arith.constant 0 : i32
    %c0_i32_1 = arith.constant 0 : i32
    %c0_i32_2 = arith.constant 0 : i32
    return %c0_i32, %c0_i32_0, %c0_i32_1 : i32, i32, i32
  }
  func.func @transform_12(%arg0: i32) -> (i32, i32, i32) {
    %c0_i32 = arith.constant 0 : i32
    %c0_i32_0 = arith.constant 0 : i32
    %c0_i32_1 = arith.constant 0 : i32
    %c0_i32_2 = arith.constant 0 : i32
    return %c0_i32, %c0_i32_0, %c0_i32_1 : i32, i32, i32
  }
  func.func @transform_13(%arg0: i32) -> (i32, i32, i32) {
    %c0_i32 = arith.constant 0 : i32
    %c0_i32_0 = arith.constant 0 : i32
    %c0_i32_1 = arith.constant 0 : i32
    %c0_i32_2 = arith.constant 0 : i32
    return %c0_i32, %c0_i32_0, %c0_i32_1 : i32, i32, i32
  }
  func.func @transform_14(%arg0: i32) -> (i32, i32, i32) {
    %c0_i32 = arith.constant 0 : i32
    %c0_i32_0 = arith.constant 0 : i32
    %c0_i32_1 = arith.constant 0 : i32
    %c0_i32_2 = arith.constant 0 : i32
    return %c0_i32, %c0_i32_0, %c0_i32_1 : i32, i32, i32
  }
  func.func @transform_15(%arg0: i32) -> (i32, i32, i32) {
    %c0_i32 = arith.constant 0 : i32
    %c0_i32_0 = arith.constant 0 : i32
    %c0_i32_1 = arith.constant 0 : i32
    %c0_i32_2 = arith.constant 0 : i32
    return %c0_i32, %c0_i32_0, %c0_i32_1 : i32, i32, i32
  }
  func.func @transform_16(%arg0: i32) -> (i32, i32, i32) {
    %c0_i32 = arith.constant 0 : i32
    %c0_i32_0 = arith.constant 0 : i32
    %c0_i32_1 = arith.constant 0 : i32
    %c0_i32_2 = arith.constant 0 : i32
    return %c0_i32, %c0_i32_0, %c0_i32_1 : i32, i32, i32
  }
  func.func @transform_17(%arg0: i32) -> (i32, i32, i32) {
    %c0_i32 = arith.constant 0 : i32
    %c0_i32_0 = arith.constant 0 : i32
    %c0_i32_1 = arith.constant 0 : i32
    %c0_i32_2 = arith.constant 0 : i32
    return %c0_i32, %c0_i32_0, %c0_i32_1 : i32, i32, i32
  }
  func.func @transform_18(%arg0: i32) -> (i32, i32, i32) {
    %c0_i32 = arith.constant 0 : i32
    %c0_i32_0 = arith.constant 0 : i32
    %c0_i32_1 = arith.constant 0 : i32
    %c0_i32_2 = arith.constant 0 : i32
    return %c0_i32, %c0_i32_0, %c0_i32_1 : i32, i32, i32
  }
  func.func @transform_19(%arg0: i32) -> (i32, i32, i32) {
    %c0_i32 = arith.constant 0 : i32
    %c0_i32_0 = arith.constant 0 : i32
    %c0_i32_1 = arith.constant 0 : i32
    %c0_i32_2 = arith.constant 0 : i32
    return %c0_i32, %c0_i32_0, %c0_i32_1 : i32, i32, i32
  }
  func.func @transform_20(%arg0: i32) -> (i32, i32, i32) {
    %c0_i32 = arith.constant 0 : i32
    %c0_i32_0 = arith.constant 0 : i32
    %c0_i32_1 = arith.constant 0 : i32
    %c0_i32_2 = arith.constant 0 : i32
    return %c0_i32, %c0_i32_0, %c0_i32_1 : i32, i32, i32
  }
  func.func @transform_21(%arg0: i32) -> (i32, i32, i32) {
    %c0_i32 = arith.constant 0 : i32
    %c0_i32_0 = arith.constant 0 : i32
    %c0_i32_1 = arith.constant 0 : i32
    %c0_i32_2 = arith.constant 0 : i32
    return %c0_i32, %c0_i32_0, %c0_i32_1 : i32, i32, i32
  }
  func.func @transform_22(%arg0: i32) -> (i32, i32, i32) {
    %c0_i32 = arith.constant 0 : i32
    %c0_i32_0 = arith.constant 0 : i32
    %c0_i32_1 = arith.constant 0 : i32
    %c0_i32_2 = arith.constant 0 : i32
    return %c0_i32, %c0_i32_0, %c0_i32_1 : i32, i32, i32
  }
  func.func @transform_23(%arg0: i32) -> (i32, i32, i32) {
    %c0_i32 = arith.constant 0 : i32
    %c0_i32_0 = arith.constant 0 : i32
    %c0_i32_1 = arith.constant 0 : i32
    %c0_i32_2 = arith.constant 0 : i32
    return %c0_i32, %c0_i32_0, %c0_i32_1 : i32, i32, i32
  }
  func.func @transform_24(%arg0: i32) -> (i32, i32) {
    %c0_i32 = arith.constant 0 : i32
    %c0_i32_0 = arith.constant 0 : i32
    %c0_i32_1 = arith.constant 0 : i32
    return %c0_i32, %c0_i32_0 : i32, i32
  }
  func.func @transform_25(%arg0: i32) -> (i32, i32) {
    %c0_i32 = arith.constant 0 : i32
    %c0_i32_0 = arith.constant 0 : i32
    %c0_i32_1 = arith.constant 0 : i32
    return %c0_i32, %c0_i32_0 : i32, i32
  }
  func.func @transform_26(%arg0: i32) -> (i32, i32, i32) {
    %c0_i32 = arith.constant 0 : i32
    %c0_i32_0 = arith.constant 0 : i32
    %c0_i32_1 = arith.constant 0 : i32
    return %arg0, %c0_i32, %c0_i32_0 : i32, i32, i32
  }
}

</mosaic_0001>

<bundles_post_ra>
// kernel: stacked_decoder_forward.1
= control target key start
LH: loop header
LB: loop body
LE: loop exit
PB: predicated region body
PF: predicated region fallthrough
CT: control target
= control target key end

     0   :  { %s8006_s0 = inlined_call_operand.vmem [shape: f32[2,8,32], index: 0, kind: input, shape index: {}]   ;;  %s8007_s1 = inlined_call_operand.vmem [shape: f32[2,8,32], index: 1, kind: input, shape index: {}]   ;;  %s8008_s2 = inlined_call_operand.vmem [shape: f32[2,8,8], index: 2, kind: input, shape index: {}]   ;;  %s8009_s3 = inlined_call_operand.vmem [shape: f32[2,1,8], index: 3, kind: input, shape index: {}]   ;;  %s8010_s4 = inlined_call_operand.vmem [shape: f32[2,32,96], index: 4, kind: input, shape index: {}]   ;;  %s8011_s5 = inlined_call_operand.hbm [shape: f32[2,1,96], index: 5, kind: input, shape index: {}]   ;;  %s8012_s6 = inlined_call_operand.vmem [shape: f32[2,32,32], index: 6, kind: input, shape index: {}]   ;;  %s8013_s7 = inlined_call_operand.hbm [shape: f32[2,1,32], index: 7, kind: input, shape index: {}]   ;;  %s8014_s8 = inlined_call_operand.vmem [shape: f32[2,32,32], index: 8, kind: input, shape index: {}]   ;;  %s8015_s9 = inlined_call_operand.hbm [shape: f32[2,1,32], index: 9, kind: input, shape index: {}]   ;;  %s8016_s10 = inlined_call_operand.vmem [shape: f32[2,32,64], index: 10, kind: input, shape index: {}]   ;;  %s8017_s11 = inlined_call_operand.hbm [shape: f32[2,1,64], index: 11, kind: input, shape index: {}]   ;;  %s8018_s12 = inlined_call_operand.vmem [shape: f32[2,32,32], index: 12, kind: input, shape index: {}]   ;;  %s8019_s13 = inlined_call_operand.hbm [shape: f32[2,1,32], index: 13, kind: input, shape index: {}]   ;;  %s8020_s14 = inlined_call_operand.vmem [shape: f32[2,32,64], index: 14, kind: input, shape index: {}]   ;;  %s8021_s15 = inlined_call_operand.hbm [shape: f32[2,1,64], index: 15, kind: input, shape index: {}]   ;;  %s8022_s16 = inlined_call_operand.vmem [shape: f32[2,64,32], index: 16, kind: input, shape index: {}]   ;;  %s8023_s17 = inlined_call_operand.hbm [shape: f32[2,1,32], index: 17, kind: input, shape index: {}]   ;;  %s8024_s18 = inlined_call_operand.hbm [shape: f32[2,1,32], index: 18, kind: input, shape index: {}]   ;;  %s8025_s19 = inlined_call_operand.hbm [shape: f32[2,1,32], index: 19, kind: input, shape index: {}]   ;;  %s8026_s20 = inlined_call_operand.hbm [shape: f32[2,1,32], index: 20, kind: input, shape index: {}]   ;;  %s8027_s21 = inlined_call_operand.hbm [shape: f32[2,1,32], index: 21, kind: input, shape index: {}]   ;;  %s8028_s22 = inlined_call_operand.hbm [shape: f32[2,1,32], index: 22, kind: input, shape index: {}]   ;;  %s8029_s23 = inlined_call_operand.hbm [shape: f32[2,1,32], index: 23, kind: input, shape index: {}]   ;;  %s8030_s24 = inlined_call_operand.vmem [shape: f32[32,128], index: 24, kind: input, shape index: {}]   ;;  %s8031_s25 = inlined_call_operand.hbm [shape: f32[1,128], index: 25, kind: input, shape index: {}]   ;;  %s8032_s26 = inlined_call_operand.hbm [shape: f32[2,8,128], index: 26, kind: output, shape index: {}]  }
   0x1   :  { %8071 = sst [smem:[#allocation42_spill]] %s8006_s0 }
   0x2   :  { %8072 = sst [smem:[#allocation43_spill]] %s8007_s1 }
   0x3   :  { %8073 = sst [smem:[#allocation44_spill]] %s8008_s2 }
   0x4   :  { %8074 = sst [smem:[#allocation45_spill]] %s8009_s3 }
   0x5   :  { %8075 = sst [smem:[#allocation46_spill]] %s8010_s4 }
   0x6   :  { %8076 = sst [smem:[#allocation47_spill]] %s8011_s5 }
   0x7   :  { %8077 = sst [smem:[#allocation48_spill]] %s8012_s6 }
   0x8   :  { %8078 = sst [smem:[#allocation49_spill]] %s8013_s7 }
   0x9   :  { %8079 = sst [smem:[#allocation50_spill]] %s8014_s8 }
   0xa   :  { %8080 = sst [smem:[#allocation51_spill]] %s8015_s9 }
   0xb   :  { %8081 = sst [smem:[#allocation52_spill]] %s8016_s10 }
   0xc   :  { %8082 = sst [smem:[#allocation53_spill]] %s8017_s11 }
   0xd   :  { %8083 = sst [smem:[#allocation54_spill]] %s8019_s13 }
   0xe   :  { %8084 = sst [smem:[#allocation55_spill]] %s8021_s15 }
   0xf   :  { %8085 = sst [smem:[#allocation56_spill]] %s8023_s17 }
  0x10   :  { %8086 = sst [smem:[#allocation57_spill]] %s8024_s18 }
  0x11   :  { %8087 = sst [smem:[#allocation58_spill]] %s8025_s19 }
  0x12   :  { %8088 = sst [smem:[#allocation59_spill]] %s8026_s20 }
  0x13   :  { %8089 = sst [smem:[#allocation60_spill]] %s8027_s21 }
  0x14   :  { %8090 = sst [smem:[#allocation61_spill]] %s8028_s22 }
  0x15   :  { %8091 = sst [smem:[#allocation62_spill]] %s8032_s26 }
  0x16   :  { %31 = vsyncpa [#allocation3], 0 }
  0x17   :  { %32 = vsyncpa [#allocation6], 0 }
  0x18   :  { %33 = vsyncpa [#allocation9], 0 }
  0x19   :  { %34 = vsyncpa [#allocation12], 0 }
  0x1a   :  { %35 = vsyncpa [#allocation15], 0 }
  0x1b   :  { %36 = vsyncpa [#allocation18], 0 }
  0x1c   :  { %37 = vsyncpa [#allocation21], 0 }
  0x1d   :  { %38 = vsyncpa [#allocation24], 0 }
  0x1e   :  { %39 = vsyncpa [#allocation4], 0 }
  0x1f   :  { %41 = vsyncpa [#allocation4 + $0x1], 0  ;;  %s7041_s27 = smov 0   ;;  %s7043_s3 = smov 0  }
  0x20   :  { %s7045_s7 = smov 0   ;;  %s7047_s28 = smov 0  }
  0x21 LB: > { %8092 = sst [smem:[#allocation35_spill]] %s6859_s27  ;;  %s7062_s8 = sadd.s32 4294967295, %s6871_s28   ;;  %s6871_s28 = sphi %s7047_s28, %s8161_s28   ;;  %s6867_s7 = sphi %s7045_s7, %s8163_s7   ;;  %s6863_s3 = sphi %s7043_s3, %s8165_s3   ;;  %s6859_s27 = sphi %s7041_s27, %s8164_s27  }
  0x22   : > { %8093 = sst [smem:[#allocation36_spill]] %s6867_s7  ;;  %s5489_s4 = sadd.s32 4294967294, %s6871_s28  }
  0x23   : > { %8094 = sst [smem:[#allocation37_spill]] %s6871_s28  ;;  %s7066_s29 = sadd.s32 1, %s6871_s28  }
  0x24   : > { %8095 = sst [smem:[#allocation38_spill]] %s7066_s29  ;;  %s620_s0 = sadd.s32 1, %s6867_s7 }
  0x25   : > { %s617_s9 = ssub.s32 %s6871_s28, %s7066_s29  ;;  %p630_p0 = scmp.ne.s32.totalorder %s6867_s7, %s6863_s3 }
  0x26   : > { %p618_p1 = scmp.eq.s32.totalorder %s617_s9, 0  ;;  %p631_p2 = scmp.eq.s32.totalorder %s7062_s8, 1 }
  0x27   : > { %p636_p3 = scmp.ne.s32.totalorder %s6863_s3, %s6859_s27  ;;  %p637_p4 = scmp.eq.s32.totalorder %s5489_s4, 1 }
  0x28   : > { %s7077_s30 = scalar_select %p618_p1, %s6867_s7, %s620_s0  }
  0x29   : > { %p7079_p5 = por %p631_p2, %p630_p0  ;;  %p7083_p6 = por %p637_p4, %p636_p3 }
  0x2a   : > { %8096 = sst [smem:[#allocation39_spill]] %s7077_s30  ;;  %p5490_p7 = scmp.ge.s32.totalorder %s6871_s28, 1 }
  0x2b   : > { %s8097_s2 = scalar_select %p7079_p5, 1, 0 }
  0x2c   : > { %s8099_s5 = scalar_select %p7083_p6, 1, 0 }
  0x2d   : > { %8098 = sst [smem:[#allocation40_spill]] %s8097_s2  ;;  %p644_p8 = scmp.lt.s32.totalorder %s6871_s28, 3 }
  0x2e   : > { %8100 = sst [smem:[#allocation41_spill]] %s8099_s5  ;;  %p8046_p9 = scmp.eq.s32.totalorder %s7062_s8, 0 }
  0x2f   : > { %p7090_p10 = pnand %p5490_p7, %p644_p8  ;;  %s6873_s6 = smov [#allocation5]  }
  0x30   : > { %s675_s1 = sshll.u32 %s6873_s6, 4  ;;  %s6874_s0 = smov [#allocation8]   ;;  %s676_s1 = int_to_ptr.vmem [resolvable:$true] %s675_s1 }
  0x31   : > { %p6198_p11 = pneg %p7090_p10  ;;  %s707_s9 = sshll.u32 %s6874_s0, 4  ;;  %s708_s9 = int_to_ptr.vmem [resolvable:$true] %s707_s9 }
  0x32   : > { %s6875_s30 = smov [#allocation11]   ;;  %s6426_s5 = scalar_lea.vmem %s676_s1, 32 }
  0x33   : > { %p7098_p12 = pnand %p8046_p9, %p6198_p11  ;;  %s739_s7 = sshll.u32 %s6875_s30, 4  ;;  %s740_s7 = int_to_ptr.vmem [resolvable:$true] %s739_s7 }
  0x34   : > { %p6427_p0 = scmp.ne.s32.totalorder %s676_s1, %s6426_s5  ;;  %p6434_p3 = scmp.lt.s32.totalorder %s676_s1, %s676_s1 }
  0x35   : > { %p7104_p13 = pneg %p7098_p12  ;;  %p6435_p4 = scmp.lt.s32.totalorder %s6426_s5, %s6426_s5 }
  0x37   : > { %p6429_p1 = pnand %p6427_p0, %p7104_p13  ;;  %p6436_p7 = por %p6435_p4, %p6434_p3 }
  0x39   : > { %p6430_p2 = pneg %p6429_p1 }
  0x3b   : > { %p6437_p8 = pnand %p6436_p7, %p6430_p2 }
  0x3d   : > { %6440 = shalt.err (!%p6437_p8)
}
  0x3e   : > { %s6876_s6 = smov 16   ;;  %s6877_s30 = smov 1  }
  0x3f   : > { %s8104_s28 = sld [smem:[#allocation49_spill]]  ;;  %s6452_s26 = scalar_lea.vmem %s708_s9, 32 }
  0x40   : > { %p6453_p11 = scmp.ne.s32.totalorder %s708_s9, %s6452_s26  ;;  %p6460_p3 = scmp.lt.s32.totalorder %s708_s9, %s708_s9 }
  0x41   : > { %p6461_p2 = scmp.lt.s32.totalorder %s6452_s26, %s6452_s26 }
  0x42   : > { %p6455_p0 = pnand %p6453_p11, %p7104_p13 }
  0x43   : > { %p6462_p4 = por %p6461_p2, %p6460_p3 }
  0x44   : > { %p6456_p1 = pneg %p6455_p0 }
  0x45   : > { %6204 = dma.hbm_to_vmem [thread:$0]  (!%p7098_p12), %s8104_s28, 32, %s676_s1, [#allocation6], %s6876_s6, %s6876_s6, %s6877_s30  }
  0x46   : > { %p6463_p7 = pnand %p6462_p4, %p6456_p1 }
  0x48   : > { %6466 = shalt.err (!%p6463_p7)
}
  0x49   : > { %s8105_s11 = sld [smem:[#allocation53_spill]]  ;;  %s6478_s27 = scalar_lea.vmem %s740_s7, 32 }
  0x4a   : > { %p6479_p8 = scmp.ne.s32.totalorder %s740_s7, %s6478_s27  ;;  %p6486_p9 = scmp.lt.s32.totalorder %s740_s7, %s740_s7 }
  0x4b   : > { %p6487_p3 = scmp.lt.s32.totalorder %s6478_s27, %s6478_s27 }
  0x4c   : > { %p6481_p11 = pnand %p6479_p8, %p7104_p13 }
  0x4d   : > { %p6488_p1 = por %p6487_p3, %p6486_p9 }
  0x4e   : > { %p6482_p0 = pneg %p6481_p11 }
  0x4f   : > { %6210 = dma.hbm_to_vmem [thread:$0]  (!%p7098_p12), %s8105_s11, 32, %s708_s9, [#allocation9], %s6876_s6, %s6876_s6, %s6877_s30  }
  0x50   : > { %p6489_p2 = pnand %p6488_p1, %p6482_p0 }
  0x52   : > { %6492 = shalt.err (!%p6489_p2)
}
  0x53   : > { %s8106_s15 = sld [smem:[#allocation55_spill]]  ;;  %s6878_s2 = smov [#allocation14]  }
  0x54   : > { %s768_s1 = sshll.u32 %s6878_s2, 4  ;;  %s6879_s9 = smov [#allocation17]   ;;  %s769_s1 = int_to_ptr.vmem [resolvable:$true] %s768_s1 }
  0x55   : > { %s794_s0 = sshll.u32 %s6879_s9, 4  ;;  %s6504_s5 = scalar_lea.vmem %s769_s1, 32  ;;  %s795_s0 = int_to_ptr.vmem [resolvable:$true] %s794_s0 }
  0x56   : > { %p6505_p4 = scmp.ne.s32.totalorder %s769_s1, %s6504_s5  ;;  %p6512_p8 = scmp.lt.s32.totalorder %s769_s1, %s769_s1 }
  0x57   : > { %p6513_p11 = scmp.lt.s32.totalorder %s6504_s5, %s6504_s5 }
  0x58   : > { %p6507_p9 = pnand %p6505_p4, %p7104_p13 }
  0x59   : > { %6216 = dma.hbm_to_vmem [thread:$0]  (!%p7098_p12), %s8106_s15, 32, %s740_s7, [#allocation12], %s6876_s6, %s6876_s6, %s6877_s30  }
  0x5a   : > { %p6508_p7 = pneg %p6507_p9  ;;  %p6514_p0 = por %p6513_p11, %p6512_p8 }
  0x5c   : > { %p6515_p3 = pnand %p6514_p0, %p6508_p7 }
  0x5e   : > { %6518 = shalt.err (!%p6515_p3)
}
  0x5f   : > { %s8107_s18 = sld [smem:[#allocation57_spill]]  ;;  %s6530_s26 = scalar_lea.vmem %s795_s0, 32 }
  0x60   : > { %p6531_p1 = scmp.ne.s32.totalorder %s795_s0, %s6530_s26  ;;  %p6538_p9 = scmp.lt.s32.totalorder %s795_s0, %s795_s0 }
  0x61   : > { %p6539_p8 = scmp.lt.s32.totalorder %s6530_s26, %s6530_s26 }
  0x62   : > { %p6533_p2 = pnand %p6531_p1, %p7104_p13 }
  0x63   : > { %p6540_p7 = por %p6539_p8, %p6538_p9 }
  0x64   : > { %p6534_p4 = pneg %p6533_p2 }
  0x65   : > { %6222 = dma.hbm_to_vmem [thread:$0]  (!%p7098_p12), %s8107_s18, 32, %s769_s1, [#allocation15], %s6876_s6, %s6876_s6, %s6877_s30  }
  0x66   : > { %p6541_p11 = pnand %p6540_p7, %p6534_p4 }
  0x68   : > { %6544 = shalt.err (!%p6541_p11)
}
  0x69   : > { %s8108_s20 = sld [smem:[#allocation59_spill]]  ;;  %s6880_s1 = smov [#allocation20]  }
  0x6a   : > { %s820_s9 = sshll.u32 %s6880_s1, 4  ;;  %s6881_s5 = smov [#allocation2]   ;;  %s821_s9 = int_to_ptr.vmem [resolvable:$true] %s820_s9 }
  0x6b   : > { %s659_s7 = sshll.u32 %s6881_s5, 4  ;;  %s6556_s27 = scalar_lea.vmem %s821_s9, 32  ;;  %s660_s7 = int_to_ptr.vmem [resolvable:$true] %s659_s7 }
  0x6c   : > { %p6557_p0 = scmp.ne.s32.totalorder %s821_s9, %s6556_s27  ;;  %p6564_p2 = scmp.lt.s32.totalorder %s821_s9, %s821_s9 }
  0x6d   : > { %p6565_p4 = scmp.lt.s32.totalorder %s6556_s27, %s6556_s27 }
  0x6e   : > { %p6559_p3 = pnand %p6557_p0, %p7104_p13 }
  0x6f   : > { %6228 = dma.hbm_to_vmem [thread:$0]  (!%p7098_p12), %s8108_s20, 32, %s795_s0, [#allocation18], %s6876_s6, %s6876_s6, %s6877_s30  }
  0x70   : > { %p6560_p1 = pneg %p6559_p3  ;;  %p6566_p9 = por %p6565_p4, %p6564_p2 }
  0x72   : > { %p6567_p8 = pnand %p6566_p9, %p6560_p1 }
  0x74   : > { %6570 = shalt.err (!%p6567_p8)
}
  0x75   : > { %s8109_s22 = sld [smem:[#allocation61_spill]]  ;;  %s6582_s28 = scalar_lea.vmem %s660_s7, 32 }
  0x76   : > { %p6583_p7 = scmp.ne.s32.totalorder %s660_s7, %s6582_s28  ;;  %p6590_p3 = scmp.lt.s32.totalorder %s660_s7, %s660_s7 }
  0x77   : > { %p6591_p2 = scmp.lt.s32.totalorder %s6582_s28, %s6582_s28 }
  0x78   : > { %p6585_p11 = pnand %p6583_p7, %p7104_p13 }
  0x79   : > { %p6592_p1 = por %p6591_p2, %p6590_p3 }
  0x7a   : > { %p6586_p0 = pneg %p6585_p11 }
  0x7b   : > { %6234 = dma.hbm_to_vmem [thread:$0]  (!%p7098_p12), %s8109_s22, 32, %s821_s9, [#allocation21], %s6876_s6, %s6876_s6, %s6877_s30  }
  0x7c   : > { %p6593_p4 = pnand %p6592_p1, %p6586_p0 }
  0x7e   : > { %6596 = shalt.err (!%p6593_p4)
}
  0x7f   : > { %s8110_s5 = sld [smem:[#allocation47_spill]]  ;;  %s6882_s9 = smov [#allocation7]  }
  0x80   : > { %s691_s27 = sshll.u32 %s6882_s9, 4  ;;  %s6883_s0 = smov [#allocation10]   ;;  %s692_s27 = int_to_ptr.vmem [resolvable:$true] %s691_s27 }
  0x81   : > { %s723_s26 = sshll.u32 %s6883_s0, 4  ;;  %s6608_s11 = scalar_lea.vmem %s692_s27, 32  ;;  %s724_s26 = int_to_ptr.vmem [resolvable:$true] %s723_s26 }
  0x82   : > { %p6609_p9 = scmp.ne.s32.totalorder %s692_s27, %s6608_s11  ;;  %p6616_p11 = scmp.lt.s32.totalorder %s692_s27, %s692_s27 }
  0x83   : > { %p6617_p0 = scmp.lt.s32.totalorder %s6608_s11, %s6608_s11 }
  0x84   : > { %p6611_p8 = pnand %p6609_p9, %p7104_p13 }
  0x85   : > { %6201 = dma.hbm_to_vmem [thread:$0]  (!%p7098_p12), %s8110_s5, 32, %s660_s7, [#allocation3], %s6876_s6, %s6876_s6, %s6877_s30  }
  0x86   : > { %p6612_p7 = pneg %p6611_p8  ;;  %p6618_p3 = por %p6617_p0, %p6616_p11 }
  0x88   : > { %p6619_p2 = pnand %p6618_p3, %p6612_p7 }
  0x8a   : > { %6622 = shalt.err (!%p6619_p2)
}
  0x8b   : > { %s8111_s2 = sld [smem:[#allocation51_spill]]  ;;  %s6634_s1 = scalar_lea.vmem %s724_s26, 32 }
  0x8c   : > { %p6635_p1 = scmp.ne.s32.totalorder %s724_s26, %s6634_s1  ;;  %p6642_p8 = scmp.lt.s32.totalorder %s724_s26, %s724_s26 }
  0x8d   : > { %p6643_p11 = scmp.lt.s32.totalorder %s6634_s1, %s6634_s1 }
  0x8e   : > { %p6637_p4 = pnand %p6635_p1, %p7104_p13 }
  0x8f   : > { %p6644_p7 = por %p6643_p11, %p6642_p8 }
  0x90   : > { %p6638_p9 = pneg %p6637_p4 }
  0x91   : > { %6207 = dma.hbm_to_vmem [thread:$0]  (!%p7098_p12), %s8111_s2, 32, %s692_s27, [#allocation6], %s6876_s6, %s6876_s6, %s6877_s30  }
  0x92   : > { %p6645_p0 = pnand %p6644_p7, %p6638_p9 }
  0x94   : > { %6648 = shalt.err (!%p6645_p0)
}
  0x95   : > { %s8112_s13 = sld [smem:[#allocation54_spill]]  ;;  %s6884_s9 = smov [#allocation13]  }
  0x96   : > { %s755_s27 = sshll.u32 %s6884_s9, 4  ;;  %s6885_s0 = smov [#allocation16]   ;;  %s756_s27 = int_to_ptr.vmem [resolvable:$true] %s755_s27 }
  0x97   : > { %s781_s7 = sshll.u32 %s6885_s0, 4  ;;  %s6660_s28 = scalar_lea.vmem %s756_s27, 32  ;;  %s782_s7 = int_to_ptr.vmem [resolvable:$true] %s781_s7 }
  0x98   : > { %p6661_p3 = scmp.ne.s32.totalorder %s756_s27, %s6660_s28  ;;  %p6668_p4 = scmp.lt.s32.totalorder %s756_s27, %s756_s27 }
  0x99   : > { %p6669_p9 = scmp.lt.s32.totalorder %s6660_s28, %s6660_s28 }
  0x9a   : > { %p6663_p2 = pnand %p6661_p3, %p7104_p13 }
  0x9b   : > { %6213 = dma.hbm_to_vmem [thread:$0]  (!%p7098_p12), %s8112_s13, 32, %s724_s26, [#allocation9], %s6876_s6, %s6876_s6, %s6877_s30  }
  0x9c   : > { %p6664_p1 = pneg %p6663_p2  ;;  %p6670_p8 = por %p6669_p9, %p6668_p4 }
  0x9e   : > { %p6671_p11 = pnand %p6670_p8, %p6664_p1 }
  0xa0   : > { %6674 = shalt.err (!%p6671_p11)
}
  0xa1   : > { %s8113_s17 = sld [smem:[#allocation56_spill]]  ;;  %s6686_s1 = scalar_lea.vmem %s782_s7, 32 }
  0xa2   : > { %p6687_p7 = scmp.ne.s32.totalorder %s782_s7, %s6686_s1  ;;  %p6694_p2 = scmp.lt.s32.totalorder %s782_s7, %s782_s7 }
  0xa3   : > { %p6695_p4 = scmp.lt.s32.totalorder %s6686_s1, %s6686_s1 }
  0xa4   : > { %p6689_p0 = pnand %p6687_p7, %p7104_p13 }
  0xa5   : > { %p6696_p1 = por %p6695_p4, %p6694_p2 }
  0xa6   : > { %p6690_p3 = pneg %p6689_p0 }
  0xa7   : > { %6219 = dma.hbm_to_vmem [thread:$0]  (!%p7098_p12), %s8113_s17, 32, %s756_s27, [#allocation12], %s6876_s6, %s6876_s6, %s6877_s30  }
  0xa8   : > { %p6697_p9 = pnand %p6696_p1, %p6690_p3 }
  0xaa   : > { %6700 = shalt.err (!%p6697_p9)
}
  0xab   : > { %s8114_s19 = sld [smem:[#allocation58_spill]]  ;;  %s6886_s9 = smov [#allocation19]  }
  0xac   : > { %s807_s27 = sshll.u32 %s6886_s9, 4  ;;  %s6887_s0 = smov [#allocation22]   ;;  %s808_s27 = int_to_ptr.vmem [resolvable:$true] %s807_s27 }
  0xad   : > { %s833_s28 = sshll.u32 %s6887_s0, 4  ;;  %s6712_s26 = scalar_lea.vmem %s808_s27, 32  ;;  %s834_s28 = int_to_ptr.vmem [resolvable:$true] %s833_s28 }
  0xae   : > { %p6713_p8 = scmp.ne.s32.totalorder %s808_s27, %s6712_s26  ;;  %p6720_p0 = scmp.lt.s32.totalorder %s808_s27, %s808_s27 }
  0xaf   : > { %p6721_p3 = scmp.lt.s32.totalorder %s6712_s26, %s6712_s26 }
  0xb0   : > { %p6715_p11 = pnand %p6713_p8, %p7104_p13 }
  0xb1   : > { %6225 = dma.hbm_to_vmem [thread:$0]  (!%p7098_p12), %s8114_s19, 32, %s782_s7, [#allocation15], %s6876_s6, %s6876_s6, %s6877_s30  }
  0xb2   : > { %p6716_p7 = pneg %p6715_p11  ;;  %p6722_p2 = por %p6721_p3, %p6720_p0 }
  0xb4   : > { %p6723_p4 = pnand %p6722_p2, %p6716_p7 }
  0xb6   : > { %6726 = shalt.err (!%p6723_p4)
}
  0xb7   : > { %s8115_s21 = sld [smem:[#allocation60_spill]]  ;;  %s6738_s1 = scalar_lea.vmem %s834_s28, 32 }
  0xb8   : > { %p6739_p1 = scmp.ne.s32.totalorder %s834_s28, %s6738_s1  ;;  %p6746_p11 = scmp.lt.s32.totalorder %s834_s28, %s834_s28 }
  0xb9   : > { %p6747_p0 = scmp.lt.s32.totalorder %s6738_s1, %s6738_s1 }
  0xba   : > { %p6741_p9 = pnand %p6739_p1, %p7104_p13 }
  0xbb   : > { %p6748_p7 = por %p6747_p0, %p6746_p11 }
  0xbc   : > { %p6742_p8 = pneg %p6741_p9 }
  0xbd   : > { %6231 = dma.hbm_to_vmem [thread:$0]  (!%p7098_p12), %s8115_s21, 32, %s808_s27, [#allocation18], %s6876_s6, %s6876_s6, %s6877_s30  }
  0xbe   : > { %p6749_p3 = pnand %p6748_p7, %p6742_p8 }
  0xc0   : > { %6752 = shalt.err (!%p6749_p3)
}
  0xc1   : > { %6237 = dma.hbm_to_vmem [thread:$0]  (!%p7098_p12), %s8029_s23, 32, %s834_s28, [#allocation21], %s6876_s6, %s6876_s6, %s6877_s30  }
  0xc2   : > { %s6888_s9 = smov [#allocation23]  }
  0xc3   : > { %s850_s27 = sshll.u32 %s6888_s9, 4  ;;  %s851_s27 = int_to_ptr.vmem [resolvable:$true] %s850_s27 }
  0xc4   : > { %s6764_s0 = scalar_lea.vmem %s851_s27, 16  ;;  %s6771_s26 = scalar_lea.vmem %s851_s27, 32 }
  0xc5   : > { %p6765_p2 = scmp.ne.s32.totalorder %s851_s27, %s6764_s0  ;;  %p6772_p9 = scmp.lt.s32.totalorder %s851_s27, %s851_s27 }
  0xc6   : > { %p6773_p8 = scmp.lt.s32.totalorder %s6771_s26, %s6764_s0 }
  0xc7   : > { %p6767_p4 = pnand %p6765_p2, %p7104_p13 }
  0xc8   : > { %p6774_p11 = por %p6773_p8, %p6772_p9 }
  0xc9   : > { %p6768_p1 = pneg %p6767_p4 }
  0xcb   : > { %p6775_p0 = pnand %p6774_p11, %p6768_p1 }
  0xcd   : > { %6778 = shalt.err (!%p6775_p0)
}
  0xce   : > { %6240 = dma.hbm_to_vmem [thread:$0]  (!%p7098_p12), %s8031_s25, 16, %s851_s27, [#allocation24]  }
  0xcf   : > { %890 = sbr.rel (%p7090_p10) target bundleno = 8988 (0x231c), region = 124  ;;  %p8116_p7 = scmp.eq.s32.totalorder (!%p7090_p10), %s7062_s8, 0 }
  0xd4   : > { %6822 = dma.done.wait (%p8116_p7), [#allocation3], 32   ;;  %p8117_p13 = pmov %p8116_p7 }
  0xd5   : > { %p8118_p3 = pmov %p8116_p7 }
  0xd6   : > { %6824 = vsyncadd (%p8117_p13), [#allocation3], 4294967264 }
  0xd7   : > { %6826 = dma.done.wait (%p8118_p3), [#allocation6], 64   ;;  %p8119_p2 = pmov %p8118_p3 }
  0xd9   : > { %6828 = vsyncadd (%p8119_p2), [#allocation6], 4294967232  ;;  %p8120_p4 = pmov %p8119_p2 }
  0xda   : > { %p8121_p12 = pmov %p8119_p2 }
  0xdb   : > { %6830 = dma.done.wait (%p8120_p4), [#allocation9], 64  }
  0xdc   : > { %6832 = vsyncadd (%p8121_p12), [#allocation9], 4294967232  ;;  %p8122_p10 = pmov %p8119_p2 }
  0xdd   : > { %p8123_p1 = pmov %p8119_p2 }
  0xde   : > { %6834 = dma.done.wait (%p8122_p10), [#allocation12], 64  }
  0xdf   : > { %6836 = vsyncadd (%p8123_p1), [#allocation12], 4294967232  ;;  %p8124_p9 = pmov %p8123_p1 }
  0xe0   : > { %p8125_p8 = pmov %p8123_p1 }
  0xe1   : > { %6838 = dma.done.wait (%p8124_p9), [#allocation15], 64  }
  0xe2   : > { %6840 = vsyncadd (%p8125_p8), [#allocation15], 4294967232  ;;  %p8126_p11 = pmov %p8123_p1 }
  0xe3   : > { %p8127_p0 = pmov %p8123_p1 }
  0xe4   : > { %6842 = dma.done.wait (%p8126_p11), [#allocation18], 64  }
  0xe5   : > { %6844 = vsyncadd (%p8127_p0), [#allocation18], 4294967232  ;;  %p8128_p7 = pmov %p8127_p0 }
  0xe6   : > { %p8129_p13 = pmov %p8127_p0 }
  0xe7   : > { %6846 = dma.done.wait (%p8128_p7), [#allocation21], 64  }
  0xe8   : > { %6848 = vsyncadd (%p8129_p13), [#allocation21], 4294967232  ;;  %p8130_p3 = pmov %p8127_p0 }
  0xe9   : > { %p8131_p2 = pmov %p8127_p0 }
  0xea   : > { %6850 = dma.done.wait (%p8130_p3), [#allocation24], 16  }
  0xeb   : > { %6852 = vsyncadd (%p8131_p2), [#allocation24], 4294967280  ;;  %p1022_p4 = scmp.lt.s32.totalorder %s7062_s8, 1  ;;  %v6889_v0 = vmov 0.0   ;;  %vm6890_vm0 = vmmov 0   ;;  %s8132_s30 = sld [smem:[#allocation46_spill]] }
  0xec   : > { %5799 = vmatprep.subr.mxu0 %v6889_v0  ;;  %5807 = vmatprep.mubr.msk.f32.mxu0 %vm6890_vm0, %v6889_v0  ;;  %s8133_s0 = sld [smem:[#allocation42_spill]]  ;;  %vm1052_vm1 = vcmask 261120   ;;  %v5525_v6 = vld [vmem:[#allocation2] ss:$0 sm:$0xff]  ;;  %s8050_s4 = smov 64   ;;  %vm1129_vm2 = vcmask 64512  }
  0xed   : > { %s7284_s29 = scalar_select %p1022_p4, %s7062_s8, 1  ;;  %5810 = vmatprep.subr.mxu1 %v6889_v0  ;;  %5812 = vmatprep.mubr.msk.f32.mxu1 %vm6890_vm0, %v6889_v0  ;;  %vm1807_vm3 = vcmask 130048   ;;  %vm1809_vm4 = vcmask 195584   ;;  %vm2995_vm5 = vcmask 523264  }
  0xee   : > { %s8057_s6 = smov 96   ;;  %s8051_s28 = smov 88  }
  0xef   : > { %s7290_s10 = sshll.u32 %s7284_s29, 3  ;;  %s8069_s1 = smov 120  }
  0xf0   : > { %s8055_s11 = smov 80   ;;  %s8134_s27 = sld [smem:[#allocation44_spill]] }
  0xf1   : > { %v1044_v1 = vld [vmem:[%s8132_s30 + $0x18] sm:$0xff]  ;;  %v1043_v2 = vld [vmem:[%s8132_s30 + $0x10] sm:$0xff]  ;;  %v1042_v3 = vld [vmem:[%s8132_s30 + $0x8] sm:$0xff]  ;;  %s8067_s7 = smov 112   ;;  %s8065_s2 = smov 104  }
  0xf2   : > { %5800 = vmatpush3.msra.mxu0 %v1044_v1  ;;  %s1025_s26 = scalar_lea.vmem %s8133_s0, %s7290_s10  ;;  %v1041_v4 = vld [vmem:[%s8132_s30] sm:$0xff]  ;;  %s8047_s5 = smov 56  }
  0xf3   : > { %5801 = vmatprep.subr.mxu0 %v6889_v0  ;;  %v7310_v5 = vld [vmem:[%s1025_s26] sm:$0xff]  ;;  %s8053_s26 = smov 72   ;;  %s8049_s9 = smov 48  }
  0xf4   : > { %5802 = vmatpush3.msra.mxu0 %v1043_v2  ;;  %s8150_s15 = smov 16   ;;  %s8151_s17 = smov 24  }
  0xf5   : > { %5803 = vmatprep.subr.mxu0 %v6889_v0  ;;  %s8152_s18 = smov 64   ;;  %s6905_s19 = smov [#allocation25]  }
  0xf6   : > { %5804 = vmatpush3.msra.mxu0 %v1042_v3  ;;  %s7343_s0 = scalar_lea.vmem %s8134_s27, %s7290_s10  ;;  %s8048_s27 = smov 40  }
  0xf7   : > { %5805 = vmatprep.subr.mxu0 %v6889_v0  ;;  %v7346_v15 = vld [vmem:[%s7343_s0] sm:$0xff] }
  0xf8   : > { %5806 = vmatpush3.msra.mxu0 %v1041_v4 }
  0xf9   : > { %5808 = vmatmul.mubr.msk.f32.vlgmr.msra.gmra.mxu0 %vm1052_vm1, %v7310_v5  ;;  %5830 = vmatprep.subr.mxu0 %v6889_v0 }
  0xfa   : > { %5832 = vmatprep.mubr.msk.f32.mxu0 %vm6890_vm0, %v6889_v0 }
 0x1b9   : > { %v1122_v7 = vpop.f32.mrf.mxu0 }
 0x1ba   : > { %v7318_v8 = vadd.f32 %v5525_v6, %v1122_v7 }
 0x1bb   : > { %v5809_v9 = vpop.f32.mrf.mxu0 }
 0x1bc   : > { %1217 = vrot.lane.b32.xlu1 %v7318_v8, %s8050_s4  ;;  %1127 = vrot.lane.b32.xlu0 %v7318_v8, %s8057_s6  ;;  %s8063_s4 = smov 8   ;;  %s8144_s6 = sld [smem:[#allocation45_spill]] }
 0x1c0   : > { %1295 = vrot.lane.b32.xlu1 %v7318_v8, %s8051_s28  ;;  %s8061_s28 = smov 16  }
 0x1c4   : > { %1293 = vrot.lane.b32.xlu1 %v7318_v8, %s8069_s1  ;;  %s8138_s1 = sld [smem:[#allocation43_spill]] }
 0x1c8   : > { %1462 = vrot.lane.b32.xlu1 %v7318_v8, %s8055_s11  ;;  %s8059_s11 = smov 24  }
 0x1ca   : > { %s1029_s13 = scalar_lea.vmem %s8138_s1, %s7290_s10  ;;  %s8146_s10 = smov 80  }
 0x1cb   : > { %s8147_s1 = smov 72  }
 0x22e   : > { %v1218_v10 = vpop.permute.xlu1 %1217  ;;  %v1128_v11 = vpop.permute.xlu0 %1127 }
 0x22f   : > { %5811 = vmatpush3.xpose.msk.msra.mxu1 %vm1129_vm2, %v1128_v11 }
 0x230   : > { %5815 = vmatprep.subr.mxu1 %v6889_v0 }
 0x232   : > { %v1296_v12 = vpop.permute.xlu1 %1295  ;;  %5813 = vmatmul.mubr.msk.f32.vlgmr.msra.gmra.mxu1 %vm1129_vm2, %v7318_v8 }
 0x233   : > { %5816 = vmatpush3.msra.mxu1 %v1218_v10  ;;  %5817 = vmatprep.mubr.msk.f32.mxu1 %vm6890_vm0, %v6889_v0 }
 0x234   : > { %5820 = vmatprep.subr.mxu1 %v6889_v0 }
 0x236   : > { %v1294_v13 = vpop.permute.xlu1 %1293 }
 0x23a   : > { %v1463_v14 = vpop.permute.xlu1 %1462 }
 0x23b   : > { %5831 = vmatpush3.xpose.msk.msra.mxu0 %vm1129_vm2, %v1463_v14 }
 0x23c   : > { %5840 = vmatprep.subr.mxu0 %v6889_v0 }
 0x2f2   : > { %v1200_v16 = vpop.f32.mrf.mxu1 }
 0x2f3   : > { %v1204_v17 = vmul.f32 0.35355338, %v1200_v16 }
 0x2f4   : > { %v5814_v18 = vpop.f32.mrf.mxu1 }
 0x2f5   : > { %v1205_v19 = vadd.f32 %v1204_v17, %v7346_v15 }
 0x2f7   : > { %v1206_v20 = vsel %vm1129_vm2, %v1205_v19, -inf }
 0x2f8   : > { %1207 = vmax.xlane.f32.xlu0 %v1206_v20 }
 0x30e   : > { %1629 = vrot.lane.b32.xlu0 %v7318_v8, %s8053_s26  ;;  %s8148_s26 = smov 88  }
 0x381   : > { %v1208_v21 = vpop.xlane.xlu0 %1207 }
 0x382   : > { %v1209_v22 = vsub.f32 %v1205_v19, %v1208_v21 }
 0x384   : > { %v1210_v23 = vmul.f32 1.442695, %v1209_v22 }
 0x385   : > { %v1630_v28 = vpop.permute.xlu0 %1629 }
 0x386   : > { %6338 = vpow2.f32 %v1210_v23 }
 0x393   : > { %v6339_v24 = vpop.eup %6338 }
 0x394   : > { %v1212_v25 = vsel %vm1129_vm2, %v6339_v24, 0.0 }
 0x395   : > { %1213 = vadd.xlane.f32.xlu1 %v1212_v25 }
 0x3a6   : > { %1460 = vrot.lane.b32.xlu1 %v7318_v8, %s8067_s7  ;;  %s8149_s7 = smov 8  }
 0x3aa   : > { %1627 = vrot.lane.b32.xlu1 %v7318_v8, %s8065_s2  ;;  %s8142_s2 = smov 112  }
 0x41e   : > { %v1214_v26 = vpop.xlane.xlu1 %1213 }
 0x41f   : > { %6340 = vrcp.f32 %v1214_v26 }
 0x422   : > { %v1461_v27 = vpop.permute.xlu1 %1460 }
 0x423   : > { %5833 = vmatmul.mubr.msk.f32.vlgmr.msra.gmra.mxu0 %vm1129_vm2, %v1461_v27 }
 0x424   : > { %5841 = vmatpush3.xpose.msk.msra.mxu0 %vm1129_vm2, %v1630_v28  ;;  %5842 = vmatprep.mubr.msk.f32.mxu0 %vm6890_vm0, %v6889_v0 }
 0x425   : > { %5850 = vmatprep.subr.mxu0 %v6889_v0 }
 0x426   : > { %v1628_v29 = vpop.permute.xlu1 %1627 }
 0x427   : > { %5843 = vmatmul.mubr.msk.f32.vlgmr.msra.gmra.mxu0 %vm1129_vm2, %v1628_v29 }
 0x428   : > { %5858 = vmatprep.mubr.msk.f32.mxu0 %vm6890_vm0, %v6889_v0 }
 0x42c   : > { %v6341_v30 = vpop.eup %6340 }
 0x42d   : > { %v1216_v31 = vmul.f32 %v6341_v30, %v6339_v24 }
 0x42f   : > { %5818 = vmatmul.mubr.msk.f32.vlgmr.msra.gmra.mxu1 %vm1129_vm2, %v1216_v31  ;;  %v5539_v31 = vld [vmem:[#allocation5] ss:$0 sm:$0xff] }
 0x430   : > { %5821 = vmatpush3.xpose.msk.msra.mxu1 %vm1129_vm2, %v1296_v12  ;;  %5822 = vmatprep.mubr.msk.f32.mxu1 %vm6890_vm0, %v6889_v0 }
 0x431   : > { %5825 = vmatprep.subr.mxu1 %v6889_v0 }
 0x433   : > { %5823 = vmatmul.mubr.msk.f32.vlgmr.msra.gmra.mxu1 %vm1129_vm2, %v1294_v13 }
 0x434   : > { %5827 = vmatprep.mubr.msk.f32.mxu1 %vm6890_vm0, %v6889_v0 }
 0x4e3   : > { %v1534_v32 = vpop.f32.mrf.mxu0 }
 0x4e4   : > { %v1538_v33 = vmul.f32 0.35355338, %v1534_v32 }
 0x4e5   : > { %v5834_v34 = vpop.f32.mrf.mxu0 }
 0x4e6   : > { %v1539_v35 = vadd.f32 %v1538_v33, %v7346_v15 }
 0x4e7   : > { %v1701_v36 = vpop.f32.mrf.mxu0 }
 0x4e8   : > { %v1540_v37 = vsel %vm1129_vm2, %v1539_v35, -inf  ;;  %v1705_v42 = vmul.f32 0.35355338, %v1701_v36 }
 0x4e9   : > { %1541 = vmax.xlane.f32.xlu0 %v1540_v37  ;;  %v5844_v38 = vpop.f32.mrf.mxu0 }
 0x4ea   : > { %v1706_v47 = vadd.f32 %v1705_v42, %v7346_v15 }
 0x4ec   : > { %v1707_v48 = vsel %vm1129_vm2, %v1706_v47, -inf }
 0x4ef   : > { %v7375_v39 = vpop.f32.mrf.mxu1 }
 0x4f1   : > { %v5819_v40 = vpop.f32.mrf.mxu1 }
 0x4f3   : > { %v1367_v41 = vpop.f32.mrf.mxu1 }
 0x4f4   : > { %v1371_v43 = vmul.f32 0.35355338, %v1367_v41 }
 0x4f5   : > { %v5824_v44 = vpop.f32.mrf.mxu1 }
 0x4f6   : > { %v1372_v45 = vadd.f32 %v1371_v43, %v7346_v15 }
 0x4f8   : > { %v1373_v46 = vsel %vm1129_vm2, %v1372_v45, -inf }
 0x4f9   : > { %1374 = vmax.xlane.f32.xlu1 %v1373_v46 }
 0x4fd   : > { %1708 = vmax.xlane.f32.xlu1 %v1707_v48 }
 0x572   : > { %v1542_v49 = vpop.xlane.xlu0 %1541 }
 0x573   : > { %v1543_v50 = vsub.f32 %v1539_v35, %v1542_v49 }
 0x575   : > { %v1544_v51 = vmul.f32 1.442695, %v1543_v50 }
 0x577   : > { %6342 = vpow2.f32 %v1544_v51 }
 0x582   : > { %v1375_v52 = vpop.xlane.xlu1 %1374 }
 0x583   : > { %v1376_v60 = vsub.f32 %v1372_v45, %v1375_v52  ;;  %v7450_v45 = vld [vmem:[%s1029_s13] sm:$0xff]  ;;  %s1036_s13 = scalar_lea.vmem %s8144_s6, %s7284_s29  ;;  %s8145_s29 = smov 96  }
 0x584   : > { %v6343_v53 = vpop.eup %6342  ;;  %s8154_s6 = smov 40  }
 0x585   : > { %v1546_v54 = vsel %vm1129_vm2, %v6343_v53, 0.0  ;;  %v1377_v61 = vmul.f32 1.442695, %v1376_v60 }
 0x586   : > { %1547 = vadd.xlane.f32.xlu1 %v1546_v54  ;;  %v1709_v55 = vpop.xlane.xlu1 %1708  ;;  %v5541_v54 = vld [vmem:[#allocation14] ss:$0 sm:$0xff] }
 0x587   : > { %v1710_v56 = vsub.f32 %v1706_v47, %v1709_v55 }
 0x589   : > { %v1711_v57 = vmul.f32 1.442695, %v1710_v56  ;;  %v5542_v56 = vld [vmem:[#allocation16] ss:$0 sm:$0xff] }
 0x58b   : > { %6344 = vpow2.f32 %v1711_v57 }
 0x58c   : > { %6346 = vpow2.f32 %v1377_v61 }
 0x597   : > { %1384 = vrot.lane.b32.xlu1 %v7318_v8, %s8047_s5 }
 0x598   : > { %v6345_v58 = vpop.eup %6344 }
 0x599   : > { %v1713_v59 = vsel %vm1129_vm2, %v6345_v58, 0.0  ;;  %v6347_v62 = vpop.eup %6346 }
 0x59a   : > { %1714 = vadd.xlane.f32.xlu0 %v1713_v59  ;;  %v1379_v63 = vsel %vm1129_vm2, %v6347_v62, 0.0  ;;  %v5545_v59 = vld [vmem:[#allocation8] ss:$0 sm:$0xff] }
 0x5b0   : > { %1551 = vrot.lane.b32.xlu0 %v7318_v8, %s8049_s9  ;;  %s8135_s9 = sld [smem:[#allocation48_spill]] }
 0x5b6   : > { %v1814_v14 = vld [vmem:[%s8135_s9 + $0x18] sm:$0xff]  ;;  %v1813_v16 = vld [vmem:[%s8135_s9 + $0x10] sm:$0xff]  ;;  %v1812_v17 = vld [vmem:[%s8135_s9 + $0x8] sm:$0xff] }
 0x5b7   : > { %5851 = vmatpush3.msra.mxu0 %v1814_v14  ;;  %v1811_v18 = vld [vmem:[%s8135_s9] sm:$0xff] }
 0x5b8   : > { %5852 = vmatprep.subr.mxu0 %v6889_v0 }
 0x5b9   : > { %5853 = vmatpush3.msra.mxu0 %v1813_v16 }
 0x5ba   : > { %5854 = vmatprep.subr.mxu0 %v6889_v0 }
 0x5bb   : > { %1380 = vadd.xlane.f32.xlu1 %v1379_v63  ;;  %5855 = vmatpush3.msra.mxu0 %v1812_v17 }
 0x5bc   : > { %5856 = vmatprep.subr.mxu0 %v6889_v0 }
 0x5bd   : > { %5857 = vmatpush3.msra.mxu0 %v1811_v18 }
 0x5be   : > { %5872 = vmatprep.subr.mxu0 %v6889_v0 }
 0x5cc   : > { %1718 = vrot.lane.b32.xlu1 %v7318_v8, %s8048_s27  ;;  %s8136_s27 = sld [smem:[#allocation52_spill]] }
 0x5d2   : > { %s8137_s5 = smov %s8136_s27  ;;  %v2013_v42 = vld [vmem:[%s8136_s27 + $0x18] sm:$0xff]  ;;  %s8141_s27 = smov 120  }
 0x5d3   : > { %v2011_v43 = vld [vmem:[%s8137_s5 + $0x8] sm:$0xff]  ;;  %v2010_v44 = vld [vmem:[%s8137_s5] sm:$0xff] }
 0x60f   : > { %v1548_v1 = vpop.xlane.xlu1 %1547 }
 0x613   : > { %v1385_v2 = vpop.permute.xlu1 %1384 }
 0x614   : > { %5826 = vmatpush3.msra.mxu1 %v1385_v2 }
 0x615   : > { %5835 = vmatprep.subr.mxu1 %v6889_v0 }
 0x623   : > { %v1715_v4 = vpop.xlane.xlu0 %1714 }
 0x627   : > { %v1552_v10 = vpop.permute.xlu0 %1551 }
 0x644   : > { %v1381_v3 = vpop.xlane.xlu1 %1380 }
 0x645   : > { %6348 = vrcp.f32 %v1381_v3 }
 0x646   : > { %6350 = vrcp.f32 %v1548_v1  ;;  %v5543_v1 = vld [vmem:[#allocation7] ss:$0 sm:$0xff] }
 0x647   : > { %6352 = vrcp.f32 %v1715_v4 }
 0x648   : > { %v1719_v12 = vpop.permute.xlu1 %1718 }
 0x652   : > { %v6349_v6 = vpop.eup %6348 }
 0x653   : > { %v1383_v7 = vmul.f32 %v6349_v6, %v6347_v62  ;;  %v6351_v9 = vpop.eup %6350 }
 0x654   : > { %v1550_v8 = vmul.f32 %v6351_v9, %v6343_v53  ;;  %v6353_v11 = vpop.eup %6352 }
 0x655   : > { %5828 = vmatmul.mubr.msk.f32.vlgmr.msra.gmra.mxu1 %vm1129_vm2, %v1383_v7  ;;  %v1717_v13 = vmul.f32 %v6353_v11, %v6345_v58  ;;  %v7515_v11 = vld [vmem:[%s1036_s13] ss:$0 sm:$0xff]  ;;  %s8155_s13 = smov 56  }
 0x656   : > { %5836 = vmatpush3.msra.mxu1 %v1552_v10  ;;  %5837 = vmatprep.mubr.msk.f32.mxu1 %vm6890_vm0, %v6889_v0 }
 0x657   : > { %5845 = vmatprep.subr.mxu1 %v6889_v0 }
 0x659   : > { %5838 = vmatmul.mubr.msk.f32.vlgmr.msra.gmra.mxu1 %vm1129_vm2, %v1550_v8 }
 0x65a   : > { %5846 = vmatpush3.msra.mxu1 %v1719_v12  ;;  %5847 = vmatprep.mubr.msk.f32.mxu1 %vm6890_vm0, %v6889_v0 }
 0x65b   : > { %5861 = vmatprep.subr.mxu1 %v6889_v0 }
 0x65d   : > { %5848 = vmatmul.mubr.msk.f32.vlgmr.msra.gmra.mxu1 %vm1129_vm2, %v1717_v13 }
 0x65e   : > { %5869 = vmatprep.mubr.msk.f32.mxu1 %vm6890_vm0, %v6889_v0 }
 0x715   : > { %v1456_v19 = vpop.f32.mrf.mxu1 }
 0x716   : > { %1795 = vrot.lane.b32.xlu1 %v1456_v19, %s8063_s4  ;;  %s8143_s4 = smov 104  }
 0x717   : > { %v5829_v20 = vpop.f32.mrf.mxu1 }
 0x719   : > { %v1623_v21 = vpop.f32.mrf.mxu1 }
 0x71a   : > { %1799 = vrot.lane.b32.xlu0 %v1623_v21, %s8061_s28  ;;  %s8139_s28 = sld [smem:[#allocation50_spill]] }
 0x71b   : > { %v5839_v22 = vpop.f32.mrf.mxu1 }
 0x71d   : > { %v1790_v23 = vpop.f32.mrf.mxu1 }
 0x71e   : > { %1803 = vrot.lane.b32.xlu1 %v1790_v23, %s8059_s11 }
 0x71f   : > { %v5849_v24 = vpop.f32.mrf.mxu1 }
 0x720   : > { %s8140_s11 = smov %s8139_s28  ;;  %v1929_v46 = vld [vmem:[%s8139_s28 + $0x18] sm:$0xff] }
 0x721   : > { %5862 = vmatpush3.msra.mxu1 %v1929_v46  ;;  %v1928_v47 = vld [vmem:[%s8140_s11 + $0x10] sm:$0xff]  ;;  %v1927_v48 = vld [vmem:[%s8140_s11 + $0x8] sm:$0xff]  ;;  %v1926_v49 = vld [vmem:[%s8140_s11] sm:$0xff] }
 0x722   : > { %5863 = vmatprep.subr.mxu1 %v6889_v0 }
 0x723   : > { %5864 = vmatpush3.msra.mxu1 %v1928_v47 }
 0x724   : > { %5865 = vmatprep.subr.mxu1 %v6889_v0 }
 0x725   : > { %5866 = vmatpush3.msra.mxu1 %v1927_v48 }
 0x726   : > { %5867 = vmatprep.subr.mxu1 %v6889_v0 }
 0x727   : > { %5868 = vmatpush3.msra.mxu1 %v1926_v49 }
 0x728   : > { %5883 = vmatprep.subr.mxu1 %v6889_v0 }
 0x788   : > { %v1796_v25 = vpop.permute.xlu1 %1795 }
 0x789   : > { %v1806_v27 = vsel %vm1129_vm2, %v7375_v39, %v1796_v25 }
 0x78c   : > { %v1800_v26 = vpop.permute.xlu0 %1799 }
 0x78d   : > { %v1808_v28 = vsel %vm1807_vm3, %v1806_v27, %v1800_v26 }
 0x790   : > { %v1804_v29 = vpop.permute.xlu1 %1803 }
 0x791   : > { %v1810_v30 = vsel %vm1809_vm4, %v1808_v28, %v1804_v29 }
 0x792   : > { %5859 = vmatmul.mubr.msk.f32.vlgmr.msra.gmra.mxu0 %vm1052_vm1, %v1810_v30 }
 0x793   : > { %5880 = vmatprep.mubr.msk.f32.mxu0 %vm6890_vm0, %v6889_v0  ;;  %5873 = vmatpush3.msra.mxu0 %v2013_v42 }
 0x794   : > { %5874 = vmatprep.subr.mxu0 %v6889_v0 }
 0x852   : > { %v1891_v32 = vpop.f32.mrf.mxu0 }
 0x853   : > { %v1892_v33 = vadd.f32 %v5539_v31, %v1891_v32 }
 0x854   : > { %v5860_v34 = vpop.f32.mrf.mxu0 }
 0x855   : > { %v1895_v35 = vadd.f32 %v1892_v33, %v7310_v5  ;;  %v2012_v5 = vld [vmem:[%s8137_s5 + $0x10] sm:$0xff] }
 0x856   : > { %5875 = vmatpush3.msra.mxu0 %v2012_v5 }
 0x857   : > { %v1898_v36 = vsel %vm1052_vm1, %v1895_v35, 0.0  ;;  %5876 = vmatprep.subr.mxu0 %v6889_v0 }
 0x858   : > { %1899 = vadd.xlane.f32.xlu0 %v1898_v36  ;;  %5877 = vmatpush3.msra.mxu0 %v2011_v43 }
 0x859   : > { %5878 = vmatprep.subr.mxu0 %v6889_v0 }
 0x85a   : > { %5879 = vmatpush3.msra.mxu0 %v2010_v44 }
 0x85b   : > { %5881 = vmatmul.mubr.msk.f32.vlgmr.msra.gmra.mxu0 %vm1052_vm1, %v7450_v45  ;;  %5893 = vmatprep.subr.mxu0 %v6889_v0 }
 0x85c   : > { %5895 = vmatprep.mubr.msk.f32.mxu0 %vm6890_vm0, %v6889_v0 }
 0x8e1   : > { %v1900_v37 = vpop.xlane.xlu0 %1899 }
 0x8e2   : > { %v1902_v38 = vmul.f32 0.03125, %v1900_v37 }
 0x8e4   : > { %v1903_v39 = vsub.f32 %v1895_v35, %v1902_v38 }
 0x8e6   : > { %v1904_v40 = vmul.f32 %v1903_v39, %v1903_v39 }
 0x8e8   : > { %v1905_v41 = vsel %vm1052_vm1, %v1904_v40, 0.0 }
 0x8e9   : > { %1906 = vadd.xlane.f32.xlu1 %v1905_v41 }
 0x91b   : > { %v2090_v60 = vpop.f32.mrf.mxu0 }
 0x91c   : > { %v7479_v61 = vadd.f32 %v5545_v59, %v2090_v60 }
 0x91d   : > { %v5882_v62 = vpop.f32.mrf.mxu0 }
 0x91e   : > { %2267 = vrot.lane.b32.xlu0 %v7479_v61, %s8141_s27 }
 0x922   : > { %2434 = vrot.lane.b32.xlu0 %v7479_v61, %s8142_s2 }
 0x926   : > { %2601 = vrot.lane.b32.xlu0 %v7479_v61, %s8143_s4 }
 0x972   : > { %v1907_v50 = vpop.xlane.xlu1 %1906 }
 0x973   : > { %v1908_v51 = vmul.f32 0.03125, %v1907_v50 }
 0x975   : > { %v1909_v52 = vadd.f32 1e-05, %v1908_v51 }
 0x977   : > { %6354 = vrsqrt.f32 %v1909_v52 }
 0x984   : > { %v6355_v53 = vpop.eup %6354 }
 0x985   : > { %v1911_v55 = vmul.f32 %v6355_v53, %v1903_v39 }
 0x987   : > { %v1918_v57 = vmul.f32 %v5541_v54, %v1911_v55 }
 0x989   : > { %v7473_v58 = vadd.f32 %v5542_v56, %v1918_v57 }
 0x98b   : > { %5870 = vmatmul.mubr.msk.f32.vlgmr.msra.gmra.mxu1 %vm1052_vm1, %v7473_v58 }
 0x98c   : > { %5885 = vmatprep.mubr.msk.f32.mxu1 %vm6890_vm0, %v6889_v0  ;;  %5884 = vmatpush3.xpose.msk.msra.mxu1 %vm1129_vm2, %v7479_v61 }
 0x98d   : > { %5888 = vmatprep.subr.mxu1 %v6889_v0 }
 0x990   : > { %v2268_v63 = vpop.permute.xlu0 %2267 }
 0x991   : > { %5894 = vmatpush3.xpose.msk.msra.mxu0 %vm1129_vm2, %v2268_v63 }
 0x992   : > { %5903 = vmatprep.subr.mxu0 %v6889_v0 }
 0x994   : > { %v2435_v6 = vpop.permute.xlu0 %2434 }
 0x998   : > { %v2602_v10 = vpop.permute.xlu0 %2601 }
 0xa4b   : > { %v2006_v2 = vpop.f32.mrf.mxu1 }
 0xa4c   : > { %v2007_v3 = vadd.f32 %v5543_v1, %v2006_v2 }
 0xa4d   : > { %v5871_v4 = vpop.f32.mrf.mxu1 }
 0xa4e   : > { %2265 = vrot.lane.b32.xlu1 %v2007_v3, %s8141_s27  ;;  %5886 = vmatmul.mubr.msk.f32.vlgmr.msra.gmra.mxu1 %vm1129_vm2, %v2007_v3 }
 0xa4f   : > { %5890 = vmatprep.mubr.msk.f32.mxu1 %vm6890_vm0, %v6889_v0 }
 0xa52   : > { %2432 = vrot.lane.b32.xlu1 %v2007_v3, %s8142_s2 }
 0xa56   : > { %2599 = vrot.lane.b32.xlu1 %v2007_v3, %s8143_s4 }
 0xac0   : > { %v2266_v7 = vpop.permute.xlu1 %2265 }
 0xac1   : > { %5896 = vmatmul.mubr.msk.f32.vlgmr.msra.gmra.mxu0 %vm1129_vm2, %v2266_v7 }
 0xac2   : > { %5904 = vmatpush3.xpose.msk.msra.mxu0 %vm1129_vm2, %v2435_v6  ;;  %5905 = vmatprep.mubr.msk.f32.mxu0 %vm6890_vm0, %v6889_v0 }
 0xac3   : > { %5913 = vmatprep.subr.mxu0 %v6889_v0 }
 0xac4   : > { %v2433_v9 = vpop.permute.xlu1 %2432 }
 0xac5   : > { %5906 = vmatmul.mubr.msk.f32.vlgmr.msra.gmra.mxu0 %vm1129_vm2, %v2433_v9 }
 0xac6   : > { %5914 = vmatpush3.xpose.msk.msra.mxu0 %vm1129_vm2, %v2602_v10  ;;  %5915 = vmatprep.mubr.msk.f32.mxu0 %vm6890_vm0, %v6889_v0 }
 0xac7   : > { %5923 = vmatprep.subr.mxu0 %v6889_v0 }
 0xac8   : > { %v2600_v8 = vpop.permute.xlu1 %2599 }
 0xac9   : > { %5916 = vmatmul.mubr.msk.f32.vlgmr.msra.gmra.mxu0 %vm1129_vm2, %v2600_v8  ;;  %v2784_v8 = vld [vmem:[%s8018_s12 + $0x18] sm:$0xff] }
 0xaca   : > { %5931 = vmatprep.mubr.msk.f32.mxu0 %vm6890_vm0, %v6889_v0  ;;  %5924 = vmatpush3.msra.mxu0 %v2784_v8 }
 0xacb   : > { %5925 = vmatprep.subr.mxu0 %v6889_v0 }
 0xb0e   : > { %v2166_v12 = vpop.f32.mrf.mxu1 }
 0xb0f   : > { %v2170_v13 = vmul.f32 0.35355338, %v2166_v12  ;;  %v2783_v12 = vld [vmem:[%s8018_s12 + $0x10] sm:$0xff] }
 0xb10   : > { %v5887_v14 = vpop.f32.mrf.mxu1  ;;  %5926 = vmatpush3.msra.mxu0 %v2783_v12 }
 0xb11   : > { %v2177_v16 = vadd.f32 %v7515_v11, %v2170_v13  ;;  %v2782_v13 = vld [vmem:[%s8018_s12 + $0x8] sm:$0xff]  ;;  %5927 = vmatprep.subr.mxu0 %v6889_v0  ;;  %v2781_v14 = vld [vmem:[%s8018_s12] sm:$0xff] }
 0xb12   : > { %5928 = vmatpush3.msra.mxu0 %v2782_v13 }
 0xb13   : > { %v2178_v17 = vsel %vm1129_vm2, %v2177_v16, -inf  ;;  %5929 = vmatprep.subr.mxu0 %v6889_v0 }
 0xb14   : > { %2179 = vmax.xlane.f32.xlu0 %v2178_v17  ;;  %5930 = vmatpush3.msra.mxu0 %v2781_v14 }
 0xb15   : > { %5945 = vmatprep.subr.mxu0 %v6889_v0 }
 0xb81   : > { %v2339_v18 = vpop.f32.mrf.mxu0 }
 0xb82   : > { %v2343_v19 = vmul.f32 0.35355338, %v2339_v18 }
 0xb83   : > { %v5897_v20 = vpop.f32.mrf.mxu0 }
 0xb84   : > { %v2344_v21 = vadd.f32 %v7515_v11, %v2343_v19 }
 0xb85   : > { %v2506_v22 = vpop.f32.mrf.mxu0 }
 0xb86   : > { %v2510_v23 = vmul.f32 0.35355338, %v2506_v22  ;;  %v2345_v24 = vsel %vm1129_vm2, %v2344_v21, -inf }
 0xb87   : > { %2346 = vmax.xlane.f32.xlu1 %v2345_v24  ;;  %v5907_v25 = vpop.f32.mrf.mxu0 }
 0xb88   : > { %v2511_v26 = vadd.f32 %v7515_v11, %v2510_v23 }
 0xb89   : > { %v2673_v27 = vpop.f32.mrf.mxu0 }
 0xb8a   : > { %v2677_v28 = vmul.f32 0.35355338, %v2673_v27  ;;  %v2512_v29 = vsel %vm1129_vm2, %v2511_v26, -inf }
 0xb8b   : > { %2513 = vmax.xlane.f32.xlu0 %v2512_v29  ;;  %v5917_v30 = vpop.f32.mrf.mxu0 }
 0xb8c   : > { %v2678_v31 = vadd.f32 %v7515_v11, %v2677_v28  ;;  %v5560_v28 = vld [vmem:[#allocation10] ss:$0 sm:$0xff] }
 0xb8e   : > { %v2679_v32 = vsel %vm1129_vm2, %v2678_v31, -inf }
 0xb8f   : > { %2680 = vmax.xlane.f32.xlu0 %v2679_v32 }
 0xb98   : > { %2189 = vrot.lane.b32.xlu1 %v7479_v61, %s8145_s29 }
 0xb9d   : > { %v2180_v33 = vpop.xlane.xlu0 %2179 }
 0xb9e   : > { %v2181_v34 = vsub.f32 %v2177_v16, %v2180_v33 }
 0xba0   : > { %v2182_v35 = vmul.f32 1.442695, %v2181_v34 }
 0xba2   : > { %6356 = vpow2.f32 %v2182_v35 }
 0xbaf   : > { %v6357_v36 = vpop.eup %6356 }
 0xbb0   : > { %v2184_v37 = vsel %vm1129_vm2, %v6357_v36, 0.0 }
 0xbbc   : > { %2185 = vadd.xlane.f32.xlu1 %v2184_v37 }
 0xc10   : > { %v2347_v38 = vpop.xlane.xlu1 %2346 }
 0xc11   : > { %v2348_v39 = vsub.f32 %v2344_v21, %v2347_v38 }
 0xc13   : > { %v2349_v40 = vmul.f32 1.442695, %v2348_v39  ;;  %v2898_v39 = vld [vmem:[%s8020_s14 + $0x18] sm:$0xff] }
 0xc14   : > { %v2190_v41 = vpop.permute.xlu1 %2189  ;;  %v2514_v42 = vpop.xlane.xlu0 %2513 }
 0xc15   : > { %6358 = vpow2.f32 %v2349_v40  ;;  %v2515_v5 = vsub.f32 %v2511_v26, %v2514_v42  ;;  %5889 = vmatpush3.msra.mxu1 %v2190_v41  ;;  %v2897_v40 = vld [vmem:[%s8020_s14 + $0x10] sm:$0xff]  ;;  %v2895_v41 = vld [vmem:[%s8020_s14] sm:$0xff]  ;;  %v2987_v42 = vld [vmem:[%s8022_s16 + $0x38] sm:$0xff] }
 0xc16   : > { %5898 = vmatprep.subr.mxu1 %v6889_v0 }
 0xc17   : > { %v2516_v43 = vmul.f32 1.442695, %v2515_v5  ;;  %v2986_v5 = vld [vmem:[%s8022_s16 + $0x30] sm:$0xff] }
 0xc18   : > { %v2681_v44 = vpop.xlane.xlu0 %2680 }
 0xc19   : > { %6360 = vpow2.f32 %v2516_v43  ;;  %v2682_v46 = vsub.f32 %v2678_v31, %v2681_v44  ;;  %v2985_v43 = vld [vmem:[%s8022_s16 + $0x28] sm:$0xff]  ;;  %v2984_v44 = vld [vmem:[%s8022_s16 + $0x20] sm:$0xff] }
 0xc1b   : > { %v2683_v47 = vmul.f32 1.442695, %v2682_v46  ;;  %v2983_v46 = vld [vmem:[%s8022_s16 + $0x18] sm:$0xff] }
 0xc1d   : > { %6362 = vpow2.f32 %v2683_v47 }
 0xc22   : > { %v6359_v48 = vpop.eup %6358 }
 0xc23   : > { %v2351_v49 = vsel %vm1129_vm2, %v6359_v48, 0.0 }
 0xc24   : > { %2352 = vadd.xlane.f32.xlu0 %v2351_v49 }
 0xc26   : > { %v6361_v50 = vpop.eup %6360 }
 0xc27   : > { %v2518_v51 = vsel %vm1129_vm2, %v6361_v50, 0.0 }
 0xc28   : > { %2519 = vadd.xlane.f32.xlu1 %v2518_v51  ;;  %v5562_v51 = vld [vmem:[#allocation17] ss:$0 sm:$0xff] }
 0xc2a   : > { %v6363_v52 = vpop.eup %6362 }
 0xc2b   : > { %v2685_v53 = vsel %vm1129_vm2, %v6363_v52, 0.0 }
 0xc2c   : > { %2686 = vadd.xlane.f32.xlu0 %v2685_v53  ;;  %v5563_v53 = vld [vmem:[#allocation19] ss:$0 sm:$0xff] }
 0xc39   : > { %2523 = vrot.lane.b32.xlu1 %v7479_v61, %s8146_s10 }
 0xc3d   : > { %2690 = vrot.lane.b32.xlu1 %v7479_v61, %s8147_s1 }
 0xc42   : > { %2356 = vrot.lane.b32.xlu0 %v7479_v61, %s8148_s26 }
 0xc45   : > { %v2186_v54 = vpop.xlane.xlu1 %2185 }
 0xc46   : > { %6364 = vrcp.f32 %v2186_v54 }
 0xc53   : > { %v6365_v55 = vpop.eup %6364 }
 0xc54   : > { %v2188_v56 = vmul.f32 %v6365_v55, %v6357_v36 }
 0xc56   : > { %5891 = vmatmul.mubr.msk.f32.vlgmr.msra.gmra.mxu1 %vm1129_vm2, %v2188_v56  ;;  %v2982_v56 = vld [vmem:[%s8022_s16 + $0x10] sm:$0xff] }
 0xc57   : > { %5900 = vmatprep.mubr.msk.f32.mxu1 %vm6890_vm0, %v6889_v0 }
 0xcad   : > { %v2353_v57 = vpop.xlane.xlu0 %2352 }
 0xcae   : > { %6366 = vrcp.f32 %v2353_v57  ;;  %v2981_v57 = vld [vmem:[%s8022_s16 + $0x8] sm:$0xff] }
 0xcb1   : > { %v2520_v59 = vpop.xlane.xlu1 %2519 }
 0xcb2   : > { %6368 = vrcp.f32 %v2520_v59  ;;  %v2980_v59 = vld [vmem:[%s8022_s16] sm:$0xff] }
 0xcb5   : > { %v2687_v60 = vpop.xlane.xlu0 %2686  ;;  %v2524_v61 = vpop.permute.xlu1 %2523 }
 0xcb6   : > { %6370 = vrcp.f32 %v2687_v60  ;;  %v5564_v60 = vld [vmem:[#allocation11] ss:$0 sm:$0xff] }
 0xcb9   : > { %v2357_v62 = vpop.permute.xlu0 %2356  ;;  %v2691_v4 = vpop.permute.xlu1 %2690 }
 0xcba   : > { %5899 = vmatpush3.msra.mxu1 %v2357_v62 }
 0xcbb   : > { %v6367_v63 = vpop.eup %6366  ;;  %5908 = vmatprep.subr.mxu1 %v6889_v0 }
 0xcbc   : > { %v2355_v1 = vmul.f32 %v6367_v63, %v6359_v48 }
 0xcbe   : > { %5901 = vmatmul.mubr.msk.f32.vlgmr.msra.gmra.mxu1 %vm1129_vm2, %v2355_v1 }
 0xcbf   : > { %v6369_v2 = vpop.eup %6368  ;;  %5909 = vmatpush3.msra.mxu1 %v2524_v61  ;;  %5910 = vmatprep.mubr.msk.f32.mxu1 %vm6890_vm0, %v6889_v0 }
 0xcc0   : > { %5918 = vmatprep.subr.mxu1 %v6889_v0  ;;  %v2522_v3 = vmul.f32 %v6369_v2, %v6361_v50  ;;  %v5566_v2 = vld [vmem:[#allocation13] ss:$0 sm:$0xff] }
 0xcc2   : > { %5911 = vmatmul.mubr.msk.f32.vlgmr.msra.gmra.mxu1 %vm1129_vm2, %v2522_v3 }
 0xcc3   : > { %v6371_v6 = vpop.eup %6370  ;;  %5919 = vmatpush3.msra.mxu1 %v2691_v4  ;;  %5920 = vmatprep.mubr.msk.f32.mxu1 %vm6890_vm0, %v6889_v0 }
 0xcc4   : > { %v2689_v7 = vmul.f32 %v6371_v6, %v6363_v52  ;;  %5934 = vmatprep.subr.mxu1 %v6889_v0 }
 0xcc6   : > { %5921 = vmatmul.mubr.msk.f32.vlgmr.msra.gmra.mxu1 %vm1129_vm2, %v2689_v7 }
 0xcc7   : > { %5942 = vmatprep.mubr.msk.f32.mxu1 %vm6890_vm0, %v6889_v0  ;;  %5935 = vmatpush3.msra.mxu1 %v2898_v39 }
 0xcc8   : > { %5936 = vmatprep.subr.mxu1 %v6889_v0 }
 0xcc9   : > { %5937 = vmatpush3.msra.mxu1 %v2897_v40 }
 0xcca   : > { %5938 = vmatprep.subr.mxu1 %v6889_v0 }
 0xd16   : > { %v2261_v9 = vpop.f32.mrf.mxu1 }
 0xd18   : > { %v5892_v10 = vpop.f32.mrf.mxu1 }
 0xd7e   : > { %v2428_v16 = vpop.f32.mrf.mxu1 }
 0xd7f   : > { %2767 = vrot.lane.b32.xlu0 %v2428_v16, %s8149_s7  ;;  %v5573_v16 = vld [vmem:[%s8132_s30 + $0x38] sm:$0xff] }
 0xd80   : > { %v5902_v17 = vpop.f32.mrf.mxu1 }
 0xd81   : > { %v5572_v17 = vld [vmem:[%s8132_s30 + $0x30] sm:$0xff] }
 0xd82   : > { %v2595_v18 = vpop.f32.mrf.mxu1 }
 0xd83   : > { %2771 = vrot.lane.b32.xlu1 %v2595_v18, %s8150_s15  ;;  %v5571_v18 = vld [vmem:[%s8132_s30 + $0x28] sm:$0xff] }
 0xd84   : > { %v5912_v19 = vpop.f32.mrf.mxu1 }
 0xd85   : > { %v5570_v19 = vld [vmem:[%s8132_s30 + $0x20] sm:$0xff] }
 0xd86   : > { %v2762_v20 = vpop.f32.mrf.mxu1 }
 0xd87   : > { %2775 = vrot.lane.b32.xlu0 %v2762_v20, %s8151_s17 }
 0xd88   : > { %v5922_v21 = vpop.f32.mrf.mxu1 }
 0xdf1   : > { %v2768_v22 = vpop.permute.xlu0 %2767 }
 0xdf2   : > { %v2778_v24 = vsel %vm1129_vm2, %v2261_v9, %v2768_v22 }
 0xdf5   : > { %v2772_v23 = vpop.permute.xlu1 %2771 }
 0xdf6   : > { %v2779_v25 = vsel %vm1807_vm3, %v2778_v24, %v2772_v23  ;;  %v5568_v24 = vld [vmem:[#allocation20] ss:$0 sm:$0xff] }
 0xdf9   : > { %v2776_v26 = vpop.permute.xlu0 %2775 }
 0xdfa   : > { %v2780_v27 = vsel %vm1809_vm4, %v2779_v25, %v2776_v26  ;;  %v5569_v26 = vld [vmem:[#allocation22] ss:$0 sm:$0xff] }
 0xdfb   : > { %5932 = vmatmul.mubr.msk.f32.vlgmr.msra.gmra.mxu0 %vm1052_vm1, %v2780_v27 }
 0xdfc   : > { %5961 = vmatprep.mubr.msk.f32.mxu0 %vm6890_vm0, %v6889_v0  ;;  %5946 = vmatpush3.msra.mxu0 %v2987_v42 }
 0xdfd   : > { %5947 = vmatprep.subr.mxu0 %v6889_v0 }
 0xdfe   : > { %5948 = vmatpush3.msra.mxu0 %v2986_v5 }
 0xdff   : > { %5949 = vmatprep.subr.mxu0 %v6889_v0 }
 0xe00   : > { %5950 = vmatpush3.msra.mxu0 %v2985_v43 }
 0xe01   : > { %5951 = vmatprep.subr.mxu0 %v6889_v0 }
 0xe02   : > { %5952 = vmatpush3.msra.mxu0 %v2984_v44 }
 0xe03   : > { %5953 = vmatprep.subr.mxu0 %v6889_v0 }
 0xe04   : > { %5954 = vmatpush3.msra.mxu0 %v2983_v46 }
 0xe05   : > { %5955 = vmatprep.subr.mxu0 %v6889_v0 }
 0xe06   : > { %5956 = vmatpush3.msra.mxu0 %v2982_v56 }
 0xe07   : > { %5957 = vmatprep.subr.mxu0 %v6889_v0 }
 0xe08   : > { %5958 = vmatpush3.msra.mxu0 %v2981_v57 }
 0xe09   : > { %5959 = vmatprep.subr.mxu0 %v6889_v0 }
 0xe0a   : > { %5960 = vmatpush3.msra.mxu0 %v2980_v59 }
 0xe0b   : > { %5985 = vmatprep.subr.mxu0 %v6889_v0 }
 0xebb   : > { %v2861_v29 = vpop.f32.mrf.mxu0 }
 0xebc   : > { %v2862_v30 = vadd.f32 %v5560_v28, %v2861_v29  ;;  %v5574_v29 = vld [vmem:[#allocation2 + $0x1] ss:$0 sm:$0xff] }
 0xebd   : > { %v5933_v31 = vpop.f32.mrf.mxu0 }
 0xebe   : > { %v2865_v32 = vadd.f32 %v2862_v30, %v7473_v58  ;;  %v2896_v58 = vld [vmem:[%s8020_s14 + $0x8] sm:$0xff] }
 0xebf   : > { %5939 = vmatpush3.msra.mxu1 %v2896_v58 }
 0xec0   : > { %v2868_v33 = vsel %vm1052_vm1, %v2865_v32, 0.0  ;;  %5940 = vmatprep.subr.mxu1 %v6889_v0 }
 0xec1   : > { %2869 = vadd.xlane.f32.xlu1 %v2868_v33  ;;  %5941 = vmatpush3.msra.mxu1 %v2895_v41 }
 0xec2   : > { %5964 = vmatprep.subr.mxu1 %v6889_v0 }
 0xf4a   : > { %v2870_v34 = vpop.xlane.xlu1 %2869 }
 0xf4b   : > { %v2871_v35 = vmul.f32 0.03125, %v2870_v34 }
 0xf4d   : > { %v2872_v36 = vsub.f32 %v2865_v32, %v2871_v35 }
 0xf4f   : > { %v2873_v37 = vmul.f32 %v2872_v36, %v2872_v36 }
 0xf51   : > { %v2874_v38 = vsel %vm1052_vm1, %v2873_v37, 0.0 }
 0xf52   : > { %2875 = vadd.xlane.f32.xlu0 %v2874_v38 }
 0xfdb   : > { %v2876_v47 = vpop.xlane.xlu0 %2875 }
 0xfdc   : > { %v2877_v48 = vmul.f32 0.03125, %v2876_v47 }
 0xfde   : > { %v2878_v49 = vadd.f32 1e-05, %v2877_v48 }
 0xfe0   : > { %6372 = vrsqrt.f32 %v2878_v49 }
 0xfed   : > { %v6373_v50 = vpop.eup %6372 }
 0xfee   : > { %v2880_v52 = vmul.f32 %v6373_v50, %v2872_v36 }
 0xff0   : > { %v2887_v54 = vmul.f32 %v5562_v51, %v2880_v52  ;;  %v6414_v52 = vld [vmem:[%s7343_s0] sm:$0xff]  ;;  %s8153_s0 = smov 48  }
 0xff2   : > { %v2894_v55 = vadd.f32 %v5563_v53, %v2887_v54 }
 0xff4   : > { %5943 = vmatmul.mubr.msk.f32.vlgmr.msra.gmra.mxu1 %vm1052_vm1, %v2894_v55 }
 0xff5   : > { %5972 = vmatprep.mubr.msk.f32.mxu1 %vm6890_vm0, %v6889_v0  ;;  %5965 = vmatpush3.msra.mxu1 %v5573_v16 }
 0xff6   : > { %5966 = vmatprep.subr.mxu1 %v6889_v0 }
 0xff7   : > { %5967 = vmatpush3.msra.mxu1 %v5572_v17 }
 0xff8   : > { %5968 = vmatprep.subr.mxu1 %v6889_v0 }
 0xff9   : > { %5969 = vmatpush3.msra.mxu1 %v5571_v18 }
 0xffa   : > { %5970 = vmatprep.subr.mxu1 %v6889_v0 }
 0xffb   : > { %5971 = vmatpush3.msra.mxu1 %v5570_v19 }
 0xffc   : > { %5975 = vmatprep.subr.mxu1 %v6889_v0 }
0x10b4   : > { %v2975_v62 = vpop.f32.mrf.mxu1 }
0x10b5   : > { %v2976_v63 = vadd.f32 %v5564_v60, %v2975_v62 }
0x10b6   : > { %v5944_v61 = vpop.f32.mrf.mxu1 }
0x10b7   : > { %v2979_v1 = vmax.f32 %v2976_v63, 0.0 }
0x10b9   : > { %5962 = vmatmul.mubr.msk.f32.vlgmr.msra.gmra.mxu0 %vm2995_vm5, %v2979_v1 }
0x10ba   : > { %5987 = vmatprep.mubr.msk.f32.mxu0 %vm6890_vm0, %v6889_v0 }
0x1179   : > { %v3065_v3 = vpop.f32.mrf.mxu0 }
0x117a   : > { %v3066_v4 = vadd.f32 %v5566_v2, %v3065_v3 }
0x117b   : > { %v5963_v6 = vpop.f32.mrf.mxu0 }
0x117c   : > { %v3069_v7 = vadd.f32 %v3066_v4, %v2894_v55 }
0x117e   : > { %v3072_v9 = vsel %vm1052_vm1, %v3069_v7, 0.0 }
0x117f   : > { %3073 = vadd.xlane.f32.xlu0 %v3072_v9 }
0x1208   : > { %v3074_v10 = vpop.xlane.xlu0 %3073 }
0x1209   : > { %v3075_v8 = vmul.f32 0.03125, %v3074_v10 }
0x120b   : > { %v3076_v12 = vsub.f32 %v3069_v7, %v3075_v8 }
0x120d   : > { %v3077_v13 = vmul.f32 %v3076_v12, %v3076_v12 }
0x120f   : > { %v3078_v14 = vsel %vm1052_vm1, %v3077_v13, 0.0 }
0x1210   : > { %3079 = vadd.xlane.f32.xlu1 %v3078_v14 }
0x1299   : > { %v3080_v20 = vpop.xlane.xlu1 %3079 }
0x129a   : > { %v3081_v21 = vmul.f32 0.03125, %v3080_v20 }
0x129c   : > { %v3082_v22 = vadd.f32 1e-05, %v3081_v21 }
0x129e   : > { %6374 = vrsqrt.f32 %v3082_v22 }
0x12ab   : > { %v6375_v23 = vpop.eup %6374 }
0x12ac   : > { %v3084_v25 = vmul.f32 %v6375_v23, %v3076_v12 }
0x12ae   : > { %v3091_v27 = vmul.f32 %v5568_v24, %v3084_v25 }
0x12b0   : > { %v7653_v28 = vadd.f32 %v5569_v26, %v3091_v27 }
0x12b2   : > { %5973 = vmatmul.mubr.msk.f32.vlgmr.msra.gmra.mxu1 %vm1052_vm1, %v7653_v28 }
0x12b3   : > { %5977 = vmatprep.mubr.msk.f32.mxu1 %vm6890_vm0, %v6889_v0 }
0x1372   : > { %v3181_v30 = vpop.f32.mrf.mxu1 }
0x1373   : > { %v7659_v31 = vadd.f32 %v5574_v29, %v3181_v30 }
0x1374   : > { %v5974_v32 = vpop.f32.mrf.mxu1 }
0x1375   : > { %3353 = vrot.lane.b32.xlu1 %v7659_v31, %s8148_s26  ;;  %3186 = vrot.lane.b32.xlu0 %v7659_v31, %s8145_s29 }
0x1379   : > { %3351 = vrot.lane.b32.xlu1 %v7659_v31, %s8141_s27  ;;  %3520 = vrot.lane.b32.xlu0 %v7659_v31, %s8146_s10 }
0x137d   : > { %3518 = vrot.lane.b32.xlu1 %v7659_v31, %s8142_s2  ;;  %3687 = vrot.lane.b32.xlu0 %v7659_v31, %s8147_s1 }
0x1381   : > { %3685 = vrot.lane.b32.xlu1 %v7659_v31, %s8143_s4 }
0x13e7   : > { %v3354_v33 = vpop.permute.xlu1 %3353  ;;  %v3187_v34 = vpop.permute.xlu0 %3186 }
0x13e8   : > { %5976 = vmatpush3.xpose.msk.msra.mxu1 %vm1129_vm2, %v3187_v34  ;;  %5986 = vmatpush3.xpose.msk.msra.mxu0 %vm1129_vm2, %v3354_v33 }
0x13e9   : > { %5995 = vmatprep.subr.mxu0 %v6889_v0  ;;  %5980 = vmatprep.subr.mxu1 %v6889_v0 }
0x13eb   : > { %v3352_v35 = vpop.permute.xlu1 %3351  ;;  %5978 = vmatmul.mubr.msk.f32.vlgmr.msra.gmra.mxu1 %vm1129_vm2, %v7659_v31  ;;  %v3521_v36 = vpop.permute.xlu0 %3520 }
0x13ec   : > { %5988 = vmatmul.mubr.msk.f32.vlgmr.msra.gmra.mxu0 %vm1129_vm2, %v3352_v35  ;;  %5982 = vmatprep.mubr.msk.f32.mxu1 %vm6890_vm0, %v6889_v0 }
0x13ed   : > { %5996 = vmatpush3.xpose.msk.msra.mxu0 %vm1129_vm2, %v3521_v36  ;;  %5997 = vmatprep.mubr.msk.f32.mxu0 %vm6890_vm0, %v6889_v0 }
0x13ee   : > { %6005 = vmatprep.subr.mxu0 %v6889_v0 }
0x13ef   : > { %v3519_v37 = vpop.permute.xlu1 %3518  ;;  %v3688_v38 = vpop.permute.xlu0 %3687 }
0x13f0   : > { %5998 = vmatmul.mubr.msk.f32.vlgmr.msra.gmra.mxu0 %vm1129_vm2, %v3519_v37  ;;  %v5591_v37 = vld [vmem:[%s8135_s9 + $0x38] sm:$0xff] }
0x13f1   : > { %6006 = vmatpush3.xpose.msk.msra.mxu0 %vm1129_vm2, %v3688_v38  ;;  %6007 = vmatprep.mubr.msk.f32.mxu0 %vm6890_vm0, %v6889_v0  ;;  %v5590_v38 = vld [vmem:[%s8135_s9 + $0x30] sm:$0xff] }
0x13f2   : > { %6015 = vmatprep.subr.mxu0 %v6889_v0 }
0x13f3   : > { %v3686_v39 = vpop.permute.xlu1 %3685 }
0x13f4   : > { %6008 = vmatmul.mubr.msk.f32.vlgmr.msra.gmra.mxu0 %vm1129_vm2, %v3686_v39  ;;  %v5589_v39 = vld [vmem:[%s8135_s9 + $0x28] sm:$0xff] }
0x13f5   : > { %6023 = vmatprep.mubr.msk.f32.mxu0 %vm6890_vm0, %v6889_v0  ;;  %6016 = vmatpush3.msra.mxu0 %v5591_v37 }
0x13f6   : > { %6017 = vmatprep.subr.mxu0 %v6889_v0 }
0x13f7   : > { %6018 = vmatpush3.msra.mxu0 %v5590_v38 }
0x13f8   : > { %6019 = vmatprep.subr.mxu0 %v6889_v0 }
0x13f9   : > { %6020 = vmatpush3.msra.mxu0 %v5589_v39 }
0x13fa   : > { %6021 = vmatprep.subr.mxu0 %v6889_v0 }
0x14ab   : > { %v3258_v40 = vpop.f32.mrf.mxu1 }
0x14ac   : > { %v3262_v58 = vmul.f32 0.35355338, %v3258_v40  ;;  %v3425_v41 = vpop.f32.mrf.mxu0 }
0x14ad   : > { %v3429_v42 = vmul.f32 0.35355338, %v3425_v41  ;;  %v5979_v5 = vpop.f32.mrf.mxu1 }
0x14ae   : > { %v5989_v43 = vpop.f32.mrf.mxu0  ;;  %v3263_v44 = vadd.f32 %v3262_v58, %v7346_v15  ;;  %v5588_v58 = vld [vmem:[%s8135_s9 + $0x20] sm:$0xff] }
0x14af   : > { %v3430_v46 = vadd.f32 %v3429_v42, %v7346_v15  ;;  %6022 = vmatpush3.msra.mxu0 %v5588_v58 }
0x14b0   : > { %v3592_v47 = vpop.f32.mrf.mxu0  ;;  %v3264_v48 = vsel %vm1129_vm2, %v3263_v44, -inf  ;;  %6037 = vmatprep.subr.mxu0 %v6889_v0 }
0x14b1   : > { %v3596_v49 = vmul.f32 0.35355338, %v3592_v47  ;;  %3265 = vmax.xlane.f32.xlu0 %v3264_v48  ;;  %v3431_v50 = vsel %vm1129_vm2, %v3430_v46, -inf }
0x14b2   : > { %3432 = vmax.xlane.f32.xlu1 %v3431_v50  ;;  %v5999_v51 = vpop.f32.mrf.mxu0 }
0x14b3   : > { %v3597_v53 = vadd.f32 %v6414_v52, %v3596_v49 }
0x14b4   : > { %v3759_v54 = vpop.f32.mrf.mxu0 }
0x14b5   : > { %v3763_v55 = vmul.f32 0.35355338, %v3759_v54  ;;  %v3598_v56 = vsel %vm1129_vm2, %v3597_v53, -inf  ;;  %v5592_v54 = vld [vmem:[#allocation5 + $0x1] ss:$0 sm:$0xff] }
0x14b6   : > { %3599 = vmax.xlane.f32.xlu0 %v3598_v56  ;;  %v6009_v57 = vpop.f32.mrf.mxu0 }
0x14b7   : > { %v3764_v59 = vadd.f32 %v6414_v52, %v3763_v55 }
0x14b9   : > { %v3765_v15 = vsel %vm1129_vm2, %v3764_v59, -inf }
0x14ba   : > { %3766 = vmax.xlane.f32.xlu0 %v3765_v15 }
0x14c3   : > { %3275 = vrot.lane.b32.xlu1 %v7659_v31, %s8152_s18 }
0x153a   : > { %v3266_v60 = vpop.xlane.xlu0 %3265 }
0x153b   : > { %v3267_v62 = vsub.f32 %v3263_v44, %v3266_v60  ;;  %v3433_v63 = vpop.xlane.xlu1 %3432 }
0x153c   : > { %v3434_v61 = vsub.f32 %v3430_v46, %v3433_v63 }
0x153d   : > { %v3268_v1 = vmul.f32 1.442695, %v3267_v62 }
0x153e   : > { %v3435_v2 = vmul.f32 1.442695, %v3434_v61 }
0x153f   : > { %6376 = vpow2.f32 %v3268_v1  ;;  %v3276_v3 = vpop.permute.xlu1 %3275  ;;  %v3600_v4 = vpop.xlane.xlu0 %3599 }
0x1540   : > { %6378 = vpow2.f32 %v3435_v2  ;;  %v3601_v6 = vsub.f32 %v3597_v53, %v3600_v4  ;;  %5981 = vmatpush3.msra.mxu1 %v3276_v3  ;;  %v5605_v2 = vld [vmem:[%s8137_s5 + $0x38] sm:$0xff]  ;;  %v5603_v4 = vld [vmem:[%s8137_s5 + $0x28] sm:$0xff] }
0x1541   : > { %5990 = vmatprep.subr.mxu1 %v6889_v0  ;;  %v5599_v3 = vld [vmem:[%s8140_s11 + $0x38] sm:$0xff] }
0x1542   : > { %v3602_v7 = vmul.f32 1.442695, %v3601_v6  ;;  %v5598_v6 = vld [vmem:[%s8140_s11 + $0x30] sm:$0xff] }
0x1543   : > { %v3767_v9 = vpop.xlane.xlu0 %3766 }
0x1544   : > { %6380 = vpow2.f32 %v3602_v7  ;;  %v3768_v10 = vsub.f32 %v3764_v59, %v3767_v9  ;;  %v5602_v7 = vld [vmem:[%s8137_s5 + $0x20] sm:$0xff]  ;;  %v5597_v9 = vld [vmem:[%s8140_s11 + $0x28] sm:$0xff] }
0x1546   : > { %v3769_v8 = vmul.f32 1.442695, %v3768_v10  ;;  %v5596_v10 = vld [vmem:[%s8140_s11 + $0x20] sm:$0xff] }
0x1548   : > { %6382 = vpow2.f32 %v3769_v8 }
0x154c   : > { %v6377_v12 = vpop.eup %6376 }
0x154d   : > { %v6379_v13 = vpop.eup %6378  ;;  %v3270_v14 = vsel %vm1129_vm2, %v6377_v12, 0.0 }
0x154e   : > { %3271 = vadd.xlane.f32.xlu1 %v3270_v14  ;;  %v3437_v16 = vsel %vm1129_vm2, %v6379_v13, 0.0  ;;  %v5594_v14 = vld [vmem:[#allocation14 + $0x1] ss:$0 sm:$0xff] }
0x154f   : > { %3438 = vadd.xlane.f32.xlu0 %v3437_v16 }
0x1551   : > { %v6381_v17 = vpop.eup %6380 }
0x1552   : > { %v3604_v18 = vsel %vm1129_vm2, %v6381_v17, 0.0 }
0x1553   : > { %3605 = vadd.xlane.f32.xlu1 %v3604_v18 }
0x1555   : > { %v6383_v19 = vpop.eup %6382 }
0x1556   : > { %v3771_v20 = vsel %vm1129_vm2, %v6383_v19, 0.0 }
0x1557   : > { %3772 = vadd.xlane.f32.xlu0 %v3771_v20  ;;  %v5606_v20 = vld [vmem:[#allocation8 + $0x1] ss:$0 sm:$0xff] }
0x1564   : > { %3609 = vrot.lane.b32.xlu1 %v7659_v31, %s8153_s0 }
0x1568   : > { %3776 = vrot.lane.b32.xlu1 %v7659_v31, %s8154_s6 }
0x156d   : > { %3442 = vrot.lane.b32.xlu0 %v7659_v31, %s8155_s13 }
0x15d7   : > { %v3272_v21 = vpop.xlane.xlu1 %3271 }
0x15d8   : > { %6384 = vrcp.f32 %v3272_v21  ;;  %v3439_v22 = vpop.xlane.xlu0 %3438 }
0x15d9   : > { %6386 = vrcp.f32 %v3439_v22 }
0x15dc   : > { %v3606_v23 = vpop.xlane.xlu1 %3605 }
0x15dd   : > { %6388 = vrcp.f32 %v3606_v23 }
0x15e0   : > { %v3773_v24 = vpop.xlane.xlu0 %3772  ;;  %v3610_v30 = vpop.permute.xlu1 %3609 }
0x15e1   : > { %6390 = vrcp.f32 %v3773_v24 }
0x15e4   : > { %v3443_v29 = vpop.permute.xlu0 %3442  ;;  %v3777_v35 = vpop.permute.xlu1 %3776 }
0x15e5   : > { %v6385_v25 = vpop.eup %6384 }
0x15e6   : > { %v3274_v26 = vmul.f32 %v6385_v25, %v6377_v12  ;;  %v6387_v27 = vpop.eup %6386  ;;  %v5600_v25 = vld [vmem:[#allocation7 + $0x1] ss:$0 sm:$0xff] }
0x15e7   : > { %v3441_v31 = vmul.f32 %v6387_v27, %v6379_v13 }
0x15e8   : > { %5983 = vmatmul.mubr.msk.f32.vlgmr.msra.gmra.mxu1 %vm1129_vm2, %v3274_v26 }
0x15e9   : > { %5991 = vmatpush3.msra.mxu1 %v3443_v29  ;;  %5992 = vmatprep.mubr.msk.f32.mxu1 %vm6890_vm0, %v6889_v0 }
0x15ea   : > { %6000 = vmatprep.subr.mxu1 %v6889_v0  ;;  %v6389_v32 = vpop.eup %6388 }
0x15eb   : > { %v3608_v33 = vmul.f32 %v6389_v32, %v6381_v17  ;;  %v5595_v17 = vld [vmem:[#allocation16 + $0x1] ss:$0 sm:$0xff] }
0x15ec   : > { %5993 = vmatmul.mubr.msk.f32.vlgmr.msra.gmra.mxu1 %vm1129_vm2, %v3441_v31 }
0x15ed   : > { %6001 = vmatpush3.msra.mxu1 %v3610_v30  ;;  %6002 = vmatprep.mubr.msk.f32.mxu1 %vm6890_vm0, %v6889_v0 }
0x15ee   : > { %6010 = vmatprep.subr.mxu1 %v6889_v0  ;;  %v6391_v34 = vpop.eup %6390 }
0x15ef   : > { %v3775_v36 = vmul.f32 %v6391_v34, %v6383_v19 }
0x15f0   : > { %6003 = vmatmul.mubr.msk.f32.vlgmr.msra.gmra.mxu1 %vm1129_vm2, %v3608_v33 }
0x15f1   : > { %6011 = vmatpush3.msra.mxu1 %v3777_v35  ;;  %6012 = vmatprep.mubr.msk.f32.mxu1 %vm6890_vm0, %v6889_v0 }
0x15f2   : > { %6026 = vmatprep.subr.mxu1 %v6889_v0 }
0x15f4   : > { %6013 = vmatmul.mubr.msk.f32.vlgmr.msra.gmra.mxu1 %vm1129_vm2, %v3775_v36 }
0x15f5   : > { %6034 = vmatprep.mubr.msk.f32.mxu1 %vm6890_vm0, %v6889_v0  ;;  %6027 = vmatpush3.msra.mxu1 %v5599_v3 }
0x15f6   : > { %6028 = vmatprep.subr.mxu1 %v6889_v0 }
0x15f7   : > { %6029 = vmatpush3.msra.mxu1 %v5598_v6 }
0x15f8   : > { %6030 = vmatprep.subr.mxu1 %v6889_v0 }
0x15f9   : > { %6031 = vmatpush3.msra.mxu1 %v5597_v9 }
0x15fa   : > { %6032 = vmatprep.subr.mxu1 %v6889_v0 }
0x15fb   : > { %6033 = vmatpush3.msra.mxu1 %v5596_v10 }
0x15fc   : > { %6048 = vmatprep.subr.mxu1 %v6889_v0 }
0x16a8   : > { %v3347_v40 = vpop.f32.mrf.mxu1 }
0x16aa   : > { %v5984_v41 = vpop.f32.mrf.mxu1 }
0x16ac   : > { %v3514_v42 = vpop.f32.mrf.mxu1 }
0x16ad   : > { %3853 = vrot.lane.b32.xlu0 %v3514_v42, %s8149_s7 }
0x16ae   : > { %v5994_v5 = vpop.f32.mrf.mxu1 }
0x16b0   : > { %v3681_v43 = vpop.f32.mrf.mxu1 }
0x16b1   : > { %3857 = vrot.lane.b32.xlu1 %v3681_v43, %s8150_s15 }
0x16b2   : > { %v6004_v44 = vpop.f32.mrf.mxu1 }
0x16b4   : > { %v3848_v46 = vpop.f32.mrf.mxu1 }
0x16b5   : > { %3861 = vrot.lane.b32.xlu0 %v3848_v46, %s8151_s17 }
0x16b6   : > { %v6014_v47 = vpop.f32.mrf.mxu1 }
0x171f   : > { %v3854_v48 = vpop.permute.xlu0 %3853 }
0x1720   : > { %v3864_v50 = vsel %vm1129_vm2, %v3347_v40, %v3854_v48 }
0x1723   : > { %v3858_v49 = vpop.permute.xlu1 %3857 }
0x1724   : > { %v3865_v51 = vsel %vm1807_vm3, %v3864_v50, %v3858_v49 }
0x1727   : > { %v3862_v52 = vpop.permute.xlu0 %3861 }
0x1728   : > { %v3866_v53 = vsel %vm1809_vm4, %v3865_v51, %v3862_v52 }
0x1729   : > { %6024 = vmatmul.mubr.msk.f32.vlgmr.msra.gmra.mxu0 %vm1052_vm1, %v3866_v53 }
0x172a   : > { %6045 = vmatprep.mubr.msk.f32.mxu0 %vm6890_vm0, %v6889_v0  ;;  %6038 = vmatpush3.msra.mxu0 %v5605_v2 }
0x172b   : > { %6039 = vmatprep.subr.mxu0 %v6889_v0 }
0x17e9   : > { %v3949_v55 = vpop.f32.mrf.mxu0 }
0x17ea   : > { %v3950_v56 = vadd.f32 %v5592_v54, %v3949_v55 }
0x17eb   : > { %v6025_v57 = vpop.f32.mrf.mxu0 }
0x17ec   : > { %v3953_v59 = vadd.f32 %v3950_v56, %v7653_v28  ;;  %v5604_v28 = vld [vmem:[%s8137_s5 + $0x30] sm:$0xff] }
0x17ed   : > { %6040 = vmatpush3.msra.mxu0 %v5604_v28 }
0x17ee   : > { %v3958_v15 = vsel %vm1052_vm1, %v3953_v59, 0.0  ;;  %6041 = vmatprep.subr.mxu0 %v6889_v0 }
0x17ef   : > { %3959 = vadd.xlane.f32.xlu1 %v3958_v15  ;;  %6042 = vmatpush3.msra.mxu0 %v5603_v4 }
0x17f0   : > { %6043 = vmatprep.subr.mxu0 %v6889_v0 }
0x17f1   : > { %6044 = vmatpush3.msra.mxu0 %v5602_v7 }
0x17f2   : > { %6046 = vmatmul.mubr.msk.f32.vlgmr.msra.gmra.mxu0 %vm1052_vm1, %v7450_v45  ;;  %6058 = vmatprep.subr.mxu0 %v6889_v0 }
0x17f3   : > { %6060 = vmatprep.mubr.msk.f32.mxu0 %vm6890_vm0, %v6889_v0 }
0x1878   : > { %v3960_v60 = vpop.xlane.xlu1 %3959 }
0x1879   : > { %v3961_v62 = vmul.f32 0.03125, %v3960_v60 }
0x187b   : > { %v3962_v63 = vsub.f32 %v3953_v59, %v3961_v62 }
0x187d   : > { %v3963_v61 = vmul.f32 %v3962_v63, %v3962_v63 }
0x187f   : > { %v3964_v1 = vsel %vm1052_vm1, %v3963_v61, 0.0 }
0x1880   : > { %3965 = vadd.xlane.f32.xlu0 %v3964_v1 }
0x18b2   : > { %v4150_v21 = vpop.f32.mrf.mxu0 }
0x18b3   : > { %v7801_v22 = vadd.f32 %v5606_v20, %v4150_v21 }
0x18b4   : > { %v6047_v23 = vpop.f32.mrf.mxu0 }
0x18b5   : > { %4321 = vrot.lane.b32.xlu0 %v7801_v22, %s8141_s27 }
0x1909   : > { %v3966_v8 = vpop.xlane.xlu0 %3965 }
0x190a   : > { %v3967_v12 = vmul.f32 0.03125, %v3966_v8 }
0x190c   : > { %v3968_v13 = vadd.f32 1e-05, %v3967_v12 }
0x190e   : > { %6392 = vrsqrt.f32 %v3968_v13 }
0x191b   : > { %v6393_v45 = vpop.eup %6392 }
0x191c   : > { %v3970_v16 = vmul.f32 %v6393_v45, %v3962_v63 }
0x191e   : > { %v3977_v18 = vmul.f32 %v5594_v14, %v3970_v16 }
0x1920   : > { %v7795_v19 = vadd.f32 %v5595_v17, %v3977_v18 }
0x1922   : > { %6035 = vmatmul.mubr.msk.f32.vlgmr.msra.gmra.mxu1 %vm1052_vm1, %v7795_v19 }
0x1923   : > { %6050 = vmatprep.mubr.msk.f32.mxu1 %vm6890_vm0, %v6889_v0  ;;  %6049 = vmatpush3.xpose.msk.msra.mxu1 %vm1129_vm2, %v7801_v22 }
0x1924   : > { %6053 = vmatprep.subr.mxu1 %v6889_v0 }
0x1927   : > { %v4322_v24 = vpop.permute.xlu0 %4321 }
0x1928   : > { %6059 = vmatpush3.xpose.msk.msra.mxu0 %vm1129_vm2, %v4322_v24 }
0x1929   : > { %6068 = vmatprep.subr.mxu0 %v6889_v0 }
0x19e2   : > { %v4067_v26 = vpop.f32.mrf.mxu1 }
0x19e3   : > { %v4068_v27 = vadd.f32 %v5600_v25, %v4067_v26 }
0x19e4   : > { %v6036_v29 = vpop.f32.mrf.mxu1 }
0x19e5   : > { %4319 = vrot.lane.b32.xlu1 %v4068_v27, %s8141_s27  ;;  %4486 = vrot.lane.b32.xlu0 %v4068_v27, %s8142_s2 }
0x19e6   : > { %6051 = vmatmul.mubr.msk.f32.vlgmr.msra.gmra.mxu1 %vm1129_vm2, %v4068_v27 }
0x19e7   : > { %6055 = vmatprep.mubr.msk.f32.mxu1 %vm6890_vm0, %v6889_v0 }
0x19e9   : > { %4488 = vrot.lane.b32.xlu1 %v7801_v22, %s8142_s2  ;;  %4653 = vrot.lane.b32.xlu0 %v4068_v27, %s8143_s4 }
0x19ed   : > { %4655 = vrot.lane.b32.xlu1 %v7801_v22, %s8143_s4 }
0x1a57   : > { %v4320_v30 = vpop.permute.xlu1 %4319  ;;  %v4487_v32 = vpop.permute.xlu0 %4486 }
0x1a58   : > { %6061 = vmatmul.mubr.msk.f32.vlgmr.msra.gmra.mxu0 %vm1129_vm2, %v4320_v30 }
0x1a59   : > { %6070 = vmatprep.mubr.msk.f32.mxu0 %vm6890_vm0, %v6889_v0 }
0x1a5b   : > { %v4489_v31 = vpop.permute.xlu1 %4488  ;;  %v4654_v34 = vpop.permute.xlu0 %4653 }
0x1a5c   : > { %6069 = vmatpush3.xpose.msk.msra.mxu0 %vm1129_vm2, %v4489_v31  ;;  %v5623_v31 = vld [vmem:[%s8018_s12 + $0x38] sm:$0xff] }
0x1a5d   : > { %6078 = vmatprep.subr.mxu0 %v6889_v0 }
0x1a5f   : > { %v4656_v33 = vpop.permute.xlu1 %4655  ;;  %6071 = vmatmul.mubr.msk.f32.vlgmr.msra.gmra.mxu0 %vm1129_vm2, %v4487_v32  ;;  %v5622_v32 = vld [vmem:[%s8018_s12 + $0x30] sm:$0xff] }
0x1a60   : > { %6079 = vmatpush3.xpose.msk.msra.mxu0 %vm1129_vm2, %v4656_v33  ;;  %6080 = vmatprep.mubr.msk.f32.mxu0 %vm6890_vm0, %v6889_v0  ;;  %v5621_v33 = vld [vmem:[%s8018_s12 + $0x28] sm:$0xff] }
0x1a61   : > { %6088 = vmatprep.subr.mxu0 %v6889_v0 }
0x1a63   : > { %6081 = vmatmul.mubr.msk.f32.vlgmr.msra.gmra.mxu0 %vm1129_vm2, %v4654_v34  ;;  %v5620_v34 = vld [vmem:[%s8018_s12 + $0x20] sm:$0xff] }
0x1a64   : > { %6096 = vmatprep.mubr.msk.f32.mxu0 %vm6890_vm0, %v6889_v0  ;;  %6089 = vmatpush3.msra.mxu0 %v5623_v31 }
0x1a65   : > { %6090 = vmatprep.subr.mxu0 %v6889_v0 }
0x1a66   : > { %6091 = vmatpush3.msra.mxu0 %v5622_v32  ;;  %v5165_v32 = vld [vmem:[%s8030_s24 + $0x18] sm:$0xff] }
0x1a67   : > { %6092 = vmatprep.subr.mxu0 %v6889_v0 }
0x1a68   : > { %6093 = vmatpush3.msra.mxu0 %v5621_v33  ;;  %v5164_v33 = vld [vmem:[%s8030_s24 + $0x10] sm:$0xff] }
0x1a69   : > { %6094 = vmatprep.subr.mxu0 %v6889_v0 }
0x1a6a   : > { %6095 = vmatpush3.msra.mxu0 %v5620_v34  ;;  %v5163_v34 = vld [vmem:[%s8030_s24 + $0x8] sm:$0xff] }
0x1a6b   : > { %6110 = vmatprep.subr.mxu0 %v6889_v0 }
0x1aa6   : > { %v4226_v35 = vpop.f32.mrf.mxu1 }
0x1aa7   : > { %v4230_v36 = vmul.f32 0.35355338, %v4226_v35 }
0x1aa8   : > { %v6052_v37 = vpop.f32.mrf.mxu1 }
0x1aa9   : > { %v4231_v38 = vadd.f32 %v7515_v11, %v4230_v36 }
0x1aab   : > { %v4232_v39 = vsel %vm1129_vm2, %v4231_v38, -inf }
0x1aac   : > { %4233 = vmax.xlane.f32.xlu1 %v4232_v39 }
0x1b18   : > { %v4393_v40 = vpop.f32.mrf.mxu0 }
0x1b19   : > { %v4397_v58 = vmul.f32 0.35355338, %v4393_v40 }
0x1b1a   : > { %v6062_v41 = vpop.f32.mrf.mxu0 }
0x1b1b   : > { %v4398_v42 = vadd.f32 %v7515_v11, %v4397_v58 }
0x1b1d   : > { %v4399_v5 = vsel %vm1129_vm2, %v4398_v42, -inf }
0x1b1e   : > { %4400 = vmax.xlane.f32.xlu0 %v4399_v5 }
0x1b1f   : > { %v4560_v43 = vpop.f32.mrf.mxu0 }
0x1b20   : > { %v4564_v44 = vmul.f32 0.35355338, %v4560_v43 }
0x1b21   : > { %v6072_v46 = vpop.f32.mrf.mxu0 }
0x1b22   : > { %v4565_v47 = vadd.f32 %v7515_v11, %v4564_v44  ;;  %v5624_v46 = vld [vmem:[#allocation10 + $0x1] ss:$0 sm:$0xff] }
0x1b23   : > { %v4727_v48 = vpop.f32.mrf.mxu0 }
0x1b24   : > { %v4731_v49 = vmul.f32 0.35355338, %v4727_v48  ;;  %v4566_v50 = vsel %vm1129_vm2, %v4565_v47, -inf }
0x1b25   : > { %4567 = vmax.xlane.f32.xlu0 %v4566_v50  ;;  %v6082_v51 = vpop.f32.mrf.mxu0 }
0x1b26   : > { %v4732_v52 = vadd.f32 %v7515_v11, %v4731_v49 }
0x1b28   : > { %v4733_v53 = vsel %vm1129_vm2, %v4732_v52, -inf }
0x1b29   : > { %4734 = vmax.xlane.f32.xlu1 %v4733_v53 }
0x1b35   : > { %v4234_v54 = vpop.xlane.xlu1 %4233 }
0x1b36   : > { %v4235_v55 = vsub.f32 %v4231_v38, %v4234_v54 }
0x1b38   : > { %v4236_v56 = vmul.f32 1.442695, %v4235_v55 }
0x1b3a   : > { %6394 = vpow2.f32 %v4236_v56  ;;  %4410 = vrot.lane.b32.xlu1 %v7801_v22, %s8148_s26 }
0x1b47   : > { %v6395_v57 = vpop.eup %6394 }
0x1b48   : > { %v4238_v59 = vsel %vm1129_vm2, %v6395_v57, 0.0 }
0x1b49   : > { %4239 = vadd.xlane.f32.xlu0 %v4238_v59  ;;  %v5630_v59 = vld [vmem:[%s8020_s14 + $0x30] sm:$0xff] }
0x1b5f   : > { %4243 = vrot.lane.b32.xlu0 %v7801_v22, %s8145_s29  ;;  %s1019_s29 = sand.u32 1, %s6863_s3  }
0x1b60   : > { %s5248_s13 = scalar_lea.sflag [#allocation4], %s1019_s29 }
0x1ba7   : > { %v4401_v15 = vpop.xlane.xlu0 %4400 }
0x1ba8   : > { %v4402_v60 = vsub.f32 %v4398_v42, %v4401_v15  ;;  %v5628_v15 = vld [vmem:[%s8020_s14 + $0x20] sm:$0xff] }
0x1baa   : > { %v4403_v11 = vmul.f32 1.442695, %v4402_v60  ;;  %v5641_v60 = vld [vmem:[%s8022_s16 + $0x78] sm:$0xff] }
0x1bac   : > { %6396 = vpow2.f32 %v4403_v11  ;;  %v5640_v11 = vld [vmem:[%s8022_s16 + $0x70] sm:$0xff] }
0x1bae   : > { %v4568_v62 = vpop.xlane.xlu0 %4567 }
0x1baf   : > { %v4569_v63 = vsub.f32 %v4565_v47, %v4568_v62  ;;  %v5639_v62 = vld [vmem:[%s8022_s16 + $0x68] sm:$0xff] }
0x1bb1   : > { %v4570_v61 = vmul.f32 1.442695, %v4569_v63  ;;  %v5638_v63 = vld [vmem:[%s8022_s16 + $0x60] sm:$0xff] }
0x1bb2   : > { %v4735_v1 = vpop.xlane.xlu1 %4734 }
0x1bb3   : > { %6398 = vpow2.f32 %v4570_v61  ;;  %v4736_v2 = vsub.f32 %v4732_v52, %v4735_v1  ;;  %v5637_v61 = vld [vmem:[%s8022_s16 + $0x58] sm:$0xff] }
0x1bb5   : > { %v4737_v28 = vmul.f32 1.442695, %v4736_v2 }
0x1bb6   : > { %v4411_v14 = vpop.permute.xlu1 %4410 }
0x1bb7   : > { %6400 = vpow2.f32 %v4737_v28 }
0x1bb9   : > { %v6397_v3 = vpop.eup %6396 }
0x1bba   : > { %v4405_v4 = vsel %vm1129_vm2, %v6397_v3, 0.0 }
0x1bbb   : > { %4406 = vadd.xlane.f32.xlu1 %v4405_v4  ;;  %v5626_v4 = vld [vmem:[#allocation17 + $0x1] ss:$0 sm:$0xff] }
0x1bc0   : > { %v6399_v6 = vpop.eup %6398 }
0x1bc1   : > { %v4572_v7 = vsel %vm1129_vm2, %v6399_v6, 0.0 }
0x1bc2   : > { %4573 = vadd.xlane.f32.xlu0 %v4572_v7  ;;  %v5627_v7 = vld [vmem:[#allocation19 + $0x1] ss:$0 sm:$0xff] }
0x1bc4   : > { %v6401_v9 = vpop.eup %6400 }
0x1bc5   : > { %v4739_v10 = vsel %vm1129_vm2, %v6401_v9, 0.0 }
0x1bc6   : > { %4740 = vadd.xlane.f32.xlu1 %v4739_v10 }
0x1bd2   : > { %v4240_v8 = vpop.xlane.xlu0 %4239 }
0x1bd3   : > { %6402 = vrcp.f32 %v4240_v8  ;;  %v5636_v8 = vld [vmem:[%s8022_s16 + $0x50] sm:$0xff] }
0x1bd6   : > { %v4244_v12 = vpop.permute.xlu0 %4243 }
0x1bd7   : > { %6054 = vmatpush3.msra.mxu1 %v4244_v12  ;;  %4577 = vrot.lane.b32.xlu1 %v7801_v22, %s8146_s10  ;;  %v5635_v12 = vld [vmem:[%s8022_s16 + $0x48] sm:$0xff]  ;;  %s5521_s10 = sshll.u32 %s1019_s29, 3 }
0x1bd8   : > { %4744 = vrot.lane.b32.xlu0 %v7801_v22, %s8147_s1  ;;  %6063 = vmatprep.subr.mxu1 %v6889_v0  ;;  %s5649_s1 = sshll.u32 %s7062_s8, 7  ;;  %s1021_s26 = scalar_lea.vmem [#allocation25], %s5521_s10 }
0x1bd9   : > { %s5261_s0 = sshll.u32 %s1021_s26, 4  ;;  %s6783_s8 = sshll.u32 %s6905_s19, 4  ;;  %s5262_s0 = int_to_ptr.vmem [resolvable:$true] %s5261_s0  ;;  %s6784_s8 = int_to_ptr.vmem [resolvable:$false] %s6783_s8 }
0x1bda   : > { %s6779_s28 = scalar_lea.vmem %s5262_s0, 128  ;;  %s6785_s20 = scalar_lea.vmem %s6784_s8, 256 }
0x1bdb   : > { %p6780_p12 = scmp.ne.s32.totalorder %s5262_s0, %s6779_s28  ;;  %p6786_p9 = scmp.lt.s32.totalorder %s5262_s0, %s6784_s8 }
0x1bdc   : > { %p6787_p8 = scmp.lt.s32.totalorder %s6785_s20, %s6779_s28 }
0x1bdd   : > { %p6781_p10 = pnand %p6780_p12, %p7079_p5 }
0x1bde   : > { %p6788_p11 = por %p6787_p8, %p6786_p9 }
0x1bdf   : > { %p6782_p1 = pneg %p6781_p10 }
0x1be0   : > { %v6403_v13 = vpop.eup %6402 }
0x1be1   : > { %v4242_v45 = vmul.f32 %v6403_v13, %v6395_v57  ;;  %v5631_v57 = vld [vmem:[%s8020_s14 + $0x38] sm:$0xff]  ;;  %v5634_v13 = vld [vmem:[%s8022_s16 + $0x40] sm:$0xff]  ;;  %p6789_p0 = pnand %p6788_p11, %p6782_p1 }
0x1be3   : > { %6056 = vmatmul.mubr.msk.f32.vlgmr.msra.gmra.mxu1 %vm1129_vm2, %v4242_v45  ;;  %v5632_v45 = vld [vmem:[#allocation11 + $0x1] ss:$0 sm:$0xff] }
0x1be4   : > { %6064 = vmatpush3.msra.mxu1 %v4411_v14  ;;  %6065 = vmatprep.mubr.msk.f32.mxu1 %vm6890_vm0, %v6889_v0 }
0x1be5   : > { %6073 = vmatprep.subr.mxu1 %v6889_v0 }
0x1c44   : > { %v4407_v16 = vpop.xlane.xlu1 %4406 }
0x1c45   : > { %6404 = vrcp.f32 %v4407_v16 }
0x1c4b   : > { %v4574_v17 = vpop.xlane.xlu0 %4573 }
0x1c4c   : > { %6406 = vrcp.f32 %v4574_v17 }
0x1c4f   : > { %v4741_v18 = vpop.xlane.xlu1 %4740  ;;  %v4745_v25 = vpop.permute.xlu0 %4744 }
0x1c50   : > { %6408 = vrcp.f32 %v4741_v18 }
0x1c52   : > { %v6405_v20 = vpop.eup %6404 }
0x1c53   : > { %v4578_v21 = vpop.permute.xlu1 %4577  ;;  %v4409_v22 = vmul.f32 %v6405_v20, %v6397_v3  ;;  %v5642_v20 = vld [vmem:[#allocation13 + $0x1] ss:$0 sm:$0xff] }
0x1c55   : > { %6066 = vmatmul.mubr.msk.f32.vlgmr.msra.gmra.mxu1 %vm1129_vm2, %v4409_v22 }
0x1c56   : > { %6074 = vmatpush3.msra.mxu1 %v4578_v21  ;;  %6075 = vmatprep.mubr.msk.f32.mxu1 %vm6890_vm0, %v6889_v0 }
0x1c57   : > { %6083 = vmatprep.subr.mxu1 %v6889_v0 }
0x1c59   : > { %v6407_v23 = vpop.eup %6406 }
0x1c5a   : > { %v4576_v24 = vmul.f32 %v6407_v23, %v6399_v6 }
0x1c5c   : > { %6076 = vmatmul.mubr.msk.f32.vlgmr.msra.gmra.mxu1 %vm1129_vm2, %v4576_v24 }
0x1c5d   : > { %v6409_v26 = vpop.eup %6408  ;;  %6084 = vmatpush3.msra.mxu1 %v4745_v25  ;;  %6085 = vmatprep.mubr.msk.f32.mxu1 %vm6890_vm0, %v6889_v0 }
0x1c5e   : > { %v4743_v27 = vmul.f32 %v6409_v26, %v6401_v9  ;;  %6099 = vmatprep.subr.mxu1 %v6889_v0 }
0x1c60   : > { %6086 = vmatmul.mubr.msk.f32.vlgmr.msra.gmra.mxu1 %vm1129_vm2, %v4743_v27 }
0x1c61   : > { %6107 = vmatprep.mubr.msk.f32.mxu1 %vm6890_vm0, %v6889_v0  ;;  %6100 = vmatpush3.msra.mxu1 %v5631_v57 }
0x1c62   : > { %6101 = vmatprep.subr.mxu1 %v6889_v0 }
0x1c63   : > { %6102 = vmatpush3.msra.mxu1 %v5630_v59 }
0x1c64   : > { %6103 = vmatprep.subr.mxu1 %v6889_v0 }
0x1ca3   : > { %v4315_v29 = vpop.f32.mrf.mxu1 }
0x1ca5   : > { %v6057_v30 = vpop.f32.mrf.mxu1 }
0x1d15   : > { %v4482_v35 = vpop.f32.mrf.mxu1 }
0x1d16   : > { %4821 = vrot.lane.b32.xlu1 %v4482_v35, %s8149_s7  ;;  %v5162_v35 = vld [vmem:[%s8030_s24] sm:$0xff] }
0x1d17   : > { %v6067_v36 = vpop.f32.mrf.mxu1 }
0x1d1c   : > { %v4649_v37 = vpop.f32.mrf.mxu1 }
0x1d1d   : > { %4825 = vrot.lane.b32.xlu0 %v4649_v37, %s8150_s15 }
0x1d1e   : > { %v6077_v38 = vpop.f32.mrf.mxu1 }
0x1d20   : > { %v4816_v39 = vpop.f32.mrf.mxu1 }
0x1d21   : > { %4829 = vrot.lane.b32.xlu1 %v4816_v39, %s8151_s17  ;;  %s8157_s17 = sld [smem:[#allocation62_spill]] }
0x1d22   : > { %v6087_v40 = vpop.f32.mrf.mxu1 }
0x1d23   : > { %v5644_v40 = vld [vmem:[#allocation20 + $0x1] ss:$0 sm:$0xff] }
0x1d27   : > { %s7971_s6 = scalar_lea.hbm %s8157_s17, %s5649_s1 }
0x1d88   : > { %v4822_v58 = vpop.permute.xlu1 %4821 }
0x1d89   : > { %v4832_v42 = vsel %vm1129_vm2, %v4315_v29, %v4822_v58 }
0x1d8f   : > { %v4826_v41 = vpop.permute.xlu0 %4825 }
0x1d90   : > { %v4833_v5 = vsel %vm1807_vm3, %v4832_v42, %v4826_v41  ;;  %v5645_v41 = vld [vmem:[#allocation22 + $0x1] ss:$0 sm:$0xff] }
0x1d93   : > { %v4830_v43 = vpop.permute.xlu1 %4829 }
0x1d94   : > { %v4834_v44 = vsel %vm1809_vm4, %v4833_v5, %v4830_v43  ;;  %v5646_v43 = vld [vmem:[#allocation23] ss:$0 sm:$0xff] }
0x1d95   : > { %6097 = vmatmul.mubr.msk.f32.vlgmr.msra.gmra.mxu0 %vm1052_vm1, %v4834_v44 }
0x1d96   : > { %6126 = vmatprep.mubr.msk.f32.mxu0 %vm6890_vm0, %v6889_v0  ;;  %6111 = vmatpush3.msra.mxu0 %v5641_v60 }
0x1d97   : > { %6112 = vmatprep.subr.mxu0 %v6889_v0 }
0x1d98   : > { %6113 = vmatpush3.msra.mxu0 %v5640_v11 }
0x1d99   : > { %6114 = vmatprep.subr.mxu0 %v6889_v0 }
0x1d9a   : > { %6115 = vmatpush3.msra.mxu0 %v5639_v62 }
0x1d9b   : > { %6116 = vmatprep.subr.mxu0 %v6889_v0 }
0x1d9c   : > { %6117 = vmatpush3.msra.mxu0 %v5638_v63 }
0x1d9d   : > { %6118 = vmatprep.subr.mxu0 %v6889_v0 }
0x1d9e   : > { %6119 = vmatpush3.msra.mxu0 %v5637_v61 }
0x1d9f   : > { %6120 = vmatprep.subr.mxu0 %v6889_v0 }
0x1da0   : > { %6121 = vmatpush3.msra.mxu0 %v5636_v8 }
0x1da1   : > { %6122 = vmatprep.subr.mxu0 %v6889_v0 }
0x1da2   : > { %6123 = vmatpush3.msra.mxu0 %v5635_v12 }
0x1da3   : > { %6124 = vmatprep.subr.mxu0 %v6889_v0 }
0x1da4   : > { %6125 = vmatpush3.msra.mxu0 %v5634_v13 }
0x1e55   : > { %v4917_v47 = vpop.f32.mrf.mxu0 }
0x1e56   : > { %v4918_v48 = vadd.f32 %v5624_v46, %v4917_v47 }
0x1e57   : > { %v6098_v49 = vpop.f32.mrf.mxu0 }
0x1e58   : > { %v4921_v50 = vadd.f32 %v4918_v48, %v7795_v19  ;;  %v5629_v19 = vld [vmem:[%s8020_s14 + $0x28] sm:$0xff] }
0x1e59   : > { %6104 = vmatpush3.msra.mxu1 %v5629_v19 }
0x1e5a   : > { %v4926_v51 = vsel %vm1052_vm1, %v4921_v50, 0.0  ;;  %6105 = vmatprep.subr.mxu1 %v6889_v0 }
0x1e5b   : > { %4927 = vadd.xlane.f32.xlu0 %v4926_v51  ;;  %6106 = vmatpush3.msra.mxu1 %v5628_v15 }
0x1e5c   : > { %6129 = vmatprep.subr.mxu1 %v6889_v0 }
0x1ee4   : > { %v4928_v52 = vpop.xlane.xlu0 %4927 }
0x1ee5   : > { %v4929_v53 = vmul.f32 0.03125, %v4928_v52 }
0x1ee7   : > { %v4930_v54 = vsub.f32 %v4921_v50, %v4929_v53 }
0x1ee9   : > { %v4931_v55 = vmul.f32 %v4930_v54, %v4930_v54 }
0x1eeb   : > { %v4932_v56 = vsel %vm1052_vm1, %v4931_v55, 0.0 }
0x1eec   : > { %4933 = vadd.xlane.f32.xlu1 %v4932_v56 }
0x1f75   : > { %v4934_v1 = vpop.xlane.xlu1 %4933 }
0x1f76   : > { %v4935_v2 = vmul.f32 0.03125, %v4934_v1 }
0x1f78   : > { %v4936_v28 = vadd.f32 1e-05, %v4935_v2 }
0x1f7a   : > { %6410 = vrsqrt.f32 %v4936_v28 }
0x1f87   : > { %v6411_v3 = vpop.eup %6410 }
0x1f88   : > { %v4938_v6 = vmul.f32 %v6411_v3, %v4930_v54 }
0x1f8a   : > { %v4945_v9 = vmul.f32 %v5626_v4, %v4938_v6 }
0x1f8c   : > { %v4952_v10 = vadd.f32 %v5627_v7, %v4945_v9 }
0x1f8e   : > { %6108 = vmatmul.mubr.msk.f32.vlgmr.msra.gmra.mxu1 %vm1052_vm1, %v4952_v10 }
0x1f8f   : > { %6137 = vmatprep.mubr.msk.f32.mxu1 %vm6890_vm0, %v6889_v0  ;;  %6130 = vmatpush3.msra.mxu1 %v5165_v32 }
0x1f90   : > { %6131 = vmatprep.subr.mxu1 %v6889_v0 }
0x1f91   : > { %6132 = vmatpush3.msra.mxu1 %v5164_v33 }
0x1f92   : > { %6133 = vmatprep.subr.mxu1 %v6889_v0 }
0x1f93   : > { %6134 = vmatpush3.msra.mxu1 %v5163_v34 }
0x1f94   : > { %6135 = vmatprep.subr.mxu1 %v6889_v0 }
0x1f95   : > { %6136 = vmatpush3.msra.mxu1 %v5162_v35 }
0x204e   : > { %v5035_v14 = vpop.f32.mrf.mxu1 }
0x204f   : > { %v5036_v16 = vadd.f32 %v5632_v45, %v5035_v14 }
0x2050   : > { %v6109_v17 = vpop.f32.mrf.mxu1 }
0x2051   : > { %v5039_v18 = vmax.f32 %v5036_v16, 0.0 }
0x2053   : > { %6127 = vmatmul.mubr.msk.f32.vlgmr.msra.gmra.mxu0 %vm2995_vm5, %v5039_v18 }
0x2113   : > { %v5126_v21 = vpop.f32.mrf.mxu0 }
0x2114   : > { %v5127_v22 = vadd.f32 %v5642_v20, %v5126_v21 }
0x2115   : > { %v6128_v23 = vpop.f32.mrf.mxu0 }
0x2116   : > { %v5130_v24 = vadd.f32 %v5127_v22, %v4952_v10 }
0x2118   : > { %v5135_v25 = vsel %vm1052_vm1, %v5130_v24, 0.0 }
0x2119   : > { %5136 = vadd.xlane.f32.xlu0 %v5135_v25 }
0x21a2   : > { %v5137_v26 = vpop.xlane.xlu0 %5136 }
0x21a3   : > { %v5138_v27 = vmul.f32 0.03125, %v5137_v26 }
0x21a5   : > { %v5139_v29 = vsub.f32 %v5130_v24, %v5138_v27 }
0x21a7   : > { %v5140_v30 = vmul.f32 %v5139_v29, %v5139_v29 }
0x21a9   : > { %v5141_v31 = vsel %vm1052_vm1, %v5140_v30, 0.0 }
0x21aa   : > { %5142 = vadd.xlane.f32.xlu0 %v5141_v31 }
0x2233   : > { %v5143_v36 = vpop.xlane.xlu0 %5142 }
0x2234   : > { %v5144_v37 = vmul.f32 0.03125, %v5143_v36 }
0x2236   : > { %v5145_v38 = vadd.f32 1e-05, %v5144_v37 }
0x2238   : > { %6412 = vrsqrt.f32 %v5145_v38 }
0x2245   : > { %v6413_v39 = vpop.eup %6412 }
0x2246   : > { %v5147_v58 = vmul.f32 %v6413_v39, %v5139_v29 }
0x2248   : > { %v5154_v42 = vmul.f32 %v5644_v40, %v5147_v58 }
0x224a   : > { %v5161_v5 = vadd.f32 %v5645_v41, %v5154_v42 }
0x224c   : > { %6138 = vmatmul.mubr.msk.f32.vlgmr.msra.gmra.mxu1 %vm1052_vm1, %v5161_v5 }
0x230c   : > { %v5242_v0 = vpop.f32.mrf.mxu1 }
0x230d   : > { %v5243_v44 = vadd.f32 %v5646_v43, %v5242_v0 }
0x230e   : > { %v6139_v46 = vpop.f32.mrf.mxu1 }
0x230f   : > { %5246 = vst [vmem:[%s1021_s26] sm:$0xff] %v5243_v44 }
0x2310   : > { %6792 = shalt.err (!%p6789_p0)
}
0x2311   : > { %s6793_s21 = scalar_lea.hbm %s7971_s6, 128  ;;  %s6797_s27 = scalar_lea.hbm %s8157_s17, 256 }
0x2312   : > { %p6794_p7 = scmp.ne.s32.totalorder %s7971_s6, %s6793_s21  ;;  %p6798_p2 = scmp.lt.s32.totalorder %s7971_s6, %s8157_s17 }
0x2313   : > { %p6799_p4 = scmp.lt.s32.totalorder %s6797_s27, %s6793_s21 }
0x2314   : > { %p6795_p13 = pnand %p6794_p7, %p7079_p5 }
0x2315   : > { %p6800_p12 = por %p6799_p4, %p6798_p2 }
0x2316   : > { %p6796_p3 = pneg %p6795_p13 }
0x2318   : > { %p6801_p10 = pnand %p6800_p12, %p6796_p3 }
0x231a   : > { %6804 = shalt.err (!%p6801_p10)
}
0x231b   : > { %6196 = dma.vmem_to_hbm [thread:$0]  (%p7079_p5), %s5262_s0, 128, %s7971_s6, %s5248_s13  }
0x231c PF: > { %s8158_s10 = sld [smem:[#allocation37_spill]] }
0x231d   : > { %s8159_s1 = sld [smem:[#allocation35_spill]] }
0x2322   : > { %p6273_p1 = scmp.ge.s32.totalorder %s8158_s10, 2 }
0x2323   : > { %s5273_s7 = sand.u32 1, %s8159_s1  }
0x2324   : > { %p6242_p9 = pnand %p6273_p1, %p7083_p6  ;;  %s5274_s15 = scalar_lea.sflag [#allocation4], %s5273_s7 }
0x2326   : > { %p6243_p8 = pneg %p6242_p9 }
0x2328   : > { %6854 = dma.done.wait (%p6243_p8), %s5274_s15, 128  }
0x2329   : > { %6856 = vsyncadd (%p6243_p8), %s5274_s15, 4294967168  ;;  %s8161_s28 = sld [smem:[#allocation38_spill]]  ;;  %s8164_s27 = smov %s6863_s3 }
0x232a   : > { %s8162_s19 = sld [smem:[#allocation36_spill]] }
0x232b   : > { %s8163_s7 = sld [smem:[#allocation39_spill]] }
0x232f   : > { %p44_p11 = scmp.ge.s32.totalorder %s8161_s28, 4  }
0x2330   : > { %s8165_s3 = smov %s8162_s19 }
0x2331   :  { %46 = sbr.rel (!%p44_p11) target bundleno = 33 (0x21), region = 245 }
0x2336   :  { %5279 = vsyncpa [#allocation3], 1 }
0x2337   :  { %5281 = vsyncpa [#allocation3 + $0x1], 1 }
0x2338   :  { %5282 = vsyncpa [#allocation6], 1 }
0x2339   :  { %5283 = vsyncpa [#allocation9], 1 }
0x233a   :  { %5284 = vsyncpa [#allocation12], 1 }
0x233b   :  { %5285 = vsyncpa [#allocation15], 1 }
0x233c   :  { %5286 = vsyncpa [#allocation18], 1 }
0x233d   :  { %5287 = vsyncpa [#allocation21], 1 }
0x233e   :  { %5288 = vsyncpa [#allocation24], 1 }
0x233f   :  { %5289 = vsyncpa [#allocation4], 1 }
0x2340   :  { %5291 = vsyncpa [#allocation4 + $0x1], 1 }

</bundles_post_ra>
